<compile_context>
chip_gen: v6e
topology: v6e:2x2x1
jax: 0.10.0
libtpu: 0.0.40
codegen_flags: <defaults>
</compile_context>

<pallas_src>
import math
import jax
import jax.numpy as jnp
import numpy as np
from jax.experimental import pallas as pl
from jax.experimental.pallas import tpu as pltpu


def goinnet_stem_forward(img_nchw, x_nchw, conv_w, bn_gamma, bn_beta,
                         bn_mean, bn_var, eps=1e-5):
    """img, x: [N, 1, H, W] NCHW; conv_w: [64, 2, 7, 7] OIHW.
    Returns [N, 64, H//4, W//4] NCHW (stem of GoinNet)."""
    kk, pad = 7, 3
    x_cat = jnp.concatenate([img_nchw, x_nchw], axis=1)          # [N, 2, H, W]
    x_nhwc = jnp.transpose(x_cat, (0, 2, 3, 1))                  # [N, H, W, 2]
    N, H, W, Cin = x_nhwc.shape
    Cout = conv_w.shape[0]
    assert H % 4 == 0 and W % 4 == 0, "stem kernel assumes H, W divisible by 4"

    Ho, Wo = H // 2, W // 2          # conv output (7x7, s=2, p=3)
    Hp, Wp = Ho // 2, Wo // 2        # pool output (3x3, s=2, p=1)
    K = kk * kk * Cin                # 98
    Kpad = 128                       # pad contraction dim to a full lane width

    # ---------------- wrapper-side prep (no im2col, ~input-sized traffic) ----
    xp = jnp.pad(x_nhwc, ((0, 0), (pad, pad), (pad, pad), (0, 0)))  # [N,H+6,W+6,2]
    Hpad, Wpad = H + 2 * pad, W + 2 * pad
    Hh, Wh = Hpad // 2, Wpad // 2
    # 2x2 phase split so all in-kernel slices are contiguous (conv stride is 2):
    #   phases[n, 2*a+b, i, j, c] == xp[n, 2*i + a, 2*j + b, c]
    phases = xp.reshape(N, Hh, 2, Wh, 2, Cin).transpose(0, 2, 4, 1, 3, 5)
    phases = phases.reshape(N, 4, Hh, Wh, Cin)

    # Fold eval-mode BatchNorm into the conv weights (f32 fold, then bf16 cast).
    #   BN(conv(x)) = scale*conv(x) + (beta - mean*scale)  with scale = g/sqrt(v+e)
    scale = (bn_gamma / jnp.sqrt(bn_var + eps)).astype(jnp.float32)      # [Cout]
    bias = (bn_beta - bn_mean * scale).astype(jnp.float32).reshape(1, Cout)

    # weights: OIHW -> (kh, kw, cin, cout) -> [98, 64] -> fold scale -> pad -> bf16
    w_mat = jnp.transpose(conv_w, (2, 3, 1, 0)).reshape(K, Cout).astype(jnp.float32)
    w_mat = w_mat * scale[None, :]
    w_mat = jnp.pad(w_mat, ((0, Kpad - K), (0, 0))).astype(jnp.bfloat16)

    # ------------------------------ fused kernel -----------------------------
    def kernel(ph_ref, w_ref, bias_ref, out_ref, scr_w, scr_h):
        # ph_ref: [4, Hh, Wh, Cin] (phase-split padded input for this image)
        # Build the [Ho*Wo, Kpad] patch tile in VMEM from 49 contiguous slices.
        pieces = []
        for dh in range(kk):
            a, i = dh % 2, dh // 2
            for dw in range(kk):
                b, j = dw % 2, dw // 2
                # == xp[dh + 2t, dw + 2u, :] for t in [0,Ho), u in [0,Wo)
                pieces.append(ph_ref[2 * a + b, i:i + Ho, j:j + Wo, :])
        pieces.append(jnp.zeros((Ho, Wo, Kpad - K), jnp.float32))   # K: 98 -> 128
        patches = jnp.concatenate(pieces, axis=-1)                  # [Ho, Wo, Kpad]
        patches = patches.reshape(Ho * Wo, Kpad).astype(jnp.bfloat16)

        # Conv+BN as one MXU matmul (scale folded into weights) + bias + ReLU.
        acc = jnp.dot(patches, w_ref[...], preferred_element_type=jnp.float32)
        y = jnp.maximum(acc + bias_ref[...], 0.0)                   # [M, Cout] f32
        y = y.reshape(Ho, Wo, Cout)

        # Fused 3x3/s2/p1 max-pool. Zero padding is exact here: y >= 0 after ReLU
        # and every pool window contains at least one real element. Only the left
        # pad column / top pad row is zeroed; with even Wo/Ho the far pad is never
        # read by a 3-wide stride-2 window, so the buffers are Wo+1 / Ho+1.
        # Stage 1: max over the W direction (sublane-strided reads from scratch).
        scr_w[:, 0:1, :] = jnp.zeros((Ho, 1, Cout), jnp.float32)
        scr_w[:, 1:Wo + 1, :] = y
        cm = jnp.maximum(
            jnp.maximum(scr_w[:, pl.ds(0, Wp, 2), :],
                        scr_w[:, pl.ds(1, Wp, 2), :]),
            scr_w[:, pl.ds(2, Wp, 2), :])                           # [Ho, Wp, Cout]
        # Stage 2: max over the H direction.
        scr_h[0:1, :, :] = jnp.zeros((1, Wp, Cout), jnp.float32)
        scr_h[1:Ho + 1, :, :] = cm
        out_ref[...] = jnp.maximum(
            jnp.maximum(scr_h[pl.ds(0, Hp, 2), :, :],
                        scr_h[pl.ds(1, Hp, 2), :, :]),
            scr_h[pl.ds(2, Hp, 2), :, :])                           # [Hp, Wp, Cout]

    flops = 2 * N * Ho * Wo * Kpad * Cout
    bytes_accessed = (N * 4 * Hh * Wh * Cin * 4          # phase-split input (f32)
                      + Kpad * Cout * 2                  # bf16 folded weights
                      + Cout * 4                         # bias
                      + N * Hp * Wp * Cout * 4)          # pooled output

    pooled = pl.pallas_call(
        kernel,
        out_shape=jax.ShapeDtypeStruct((N, Hp, Wp, Cout), jnp.float32),
        grid=(N,),
        in_specs=[
            pl.BlockSpec((None, 4, Hh, Wh, Cin), lambda n: (n, 0, 0, 0, 0)),
            pl.BlockSpec((Kpad, Cout), lambda n: (0, 0)),
            pl.BlockSpec((1, Cout), lambda n: (0, 0)),
        ],
        out_specs=pl.BlockSpec((None, Hp, Wp, Cout), lambda n: (n, 0, 0, 0)),
        scratch_shapes=[
            pltpu.VMEM((Ho, Wo + 1, Cout), jnp.float32),
            pltpu.VMEM((Ho + 1, Wp, Cout), jnp.float32),
        ],
        compiler_params=pltpu.CompilerParams(
            dimension_semantics=("parallel",)),
        cost_estimate=pl.CostEstimate(flops=flops, transcendentals=0,
                                      bytes_accessed=bytes_accessed),
    )(phases, w_mat, bias)

    # back to NCHW to match the PyTorch convention
    return jnp.transpose(pooled, (0, 3, 1, 2))           # [N, 64, H//4, W//4]


# ------------------------------ reference ------------------------------------

def _reference(img_nchw, x_nchw, conv_w, bn_gamma, bn_beta, bn_mean, bn_var,
               eps=1e-5):
    x = jnp.concatenate([img_nchw, x_nchw], axis=1)
    y = jax.lax.conv_general_dilated(
        x, conv_w, window_strides=(2, 2), padding=((3, 3), (3, 3)),
        dimension_numbers=("NCHW", "OIHW", "NCHW"))
    scale = bn_gamma / jnp.sqrt(bn_var + eps)
    bias = bn_beta - bn_mean * scale
    y = y * scale[None, :, None, None] + bias[None, :, None, None]
    y = jnp.maximum(y, 0.0)
    y = jax.lax.reduce_window(
        y, -jnp.inf, jax.lax.max,
        window_dimensions=(1, 1, 3, 3), window_strides=(1, 1, 2, 2),
        padding=((0, 0), (0, 0), (1, 1), (1, 1)))
    return y


# --------------------------------- main ---------------------------------------

if __name__ == "__main__":
    key = jax.random.PRNGKey(0)
    k_img, k_x, k_w, k_m, k_v = jax.random.split(key, 5)

    N, H, W = 2, 16, 16
    img = jax.random.normal(k_img, (N, 1, H, W), dtype=jnp.float32)
    x = jax.random.normal(k_x, (N, 1, H, W), dtype=jnp.float32)

    # conv1 weight init: normal(0, sqrt(2/n)), n = kh*kw*out_channels (per __init__)
    cout, cin, kh, kw = 64, 2, 7, 7
    n = kh * kw * cout
    conv_w = jax.random.normal(k_w, (cout, cin, kh, kw), dtype=jnp.float32) \
        * math.sqrt(2.0 / n)

    # BatchNorm2d(64): weight=1, bias=0 (per __init__); nontrivial eval-mode stats
    # to actually exercise the folded-BN path.
    bn_gamma = jnp.ones((cout,), jnp.float32)
    bn_beta = jnp.zeros((cout,), jnp.float32)
    bn_mean = 0.1 * jax.random.normal(k_m, (cout,), dtype=jnp.float32)
    bn_var = jax.random.uniform(k_v, (cout,), dtype=jnp.float32,
                                minval=0.5, maxval=1.5)

    fwd = jax.jit(goinnet_stem_forward)
    out = fwd(img, x, conv_w, bn_gamma, bn_beta, bn_mean, bn_var)
    out = jax.block_until_ready(out)

    ref = _reference(img, x, conv_w, bn_gamma, bn_beta, bn_mean, bn_var)
    assert out.shape == (N, 64, H // 4, W // 4), out.shape
    # bf16 MXU operands (with BN folded into weights) + f32 accumulation ->
    # loosened tolerance.
    assert np.allclose(np.asarray(out), np.asarray(ref), atol=2e-2, rtol=2e-2)

    print("KERNEL_OK")
</pallas_src>

<mosaic_0001>
module attributes {stable_mosaic.version = 11 : i64} {
  func.func @kernel(%arg0: i32, %arg1: memref<1x4x11x11x2xf32, #tpu.memory_space<vmem>>, %arg2: memref<128x64xbf16, #tpu.memory_space<vmem>>, %arg3: memref<1x64xf32, #tpu.memory_space<vmem>>, %arg4: memref<1x4x4x64xf32, #tpu.memory_space<vmem>>, %arg5: memref<8x9x64xf32, #tpu.memory_space<vmem>>, %arg6: memref<9x4x64xf32, #tpu.memory_space<vmem>>) attributes {dimension_semantics = [#tpu.dimension_semantics<parallel>], iteration_bounds = array<i64: 2>, scalar_prefetch = 0 : i64, scratch_operands = 2 : i64, tpu.core_type = #tpu.core_type<tc>, window_params = [{transform_indices = @transform_0, window_bounds = array<i64: 1, 4, 11, 11, 2>}, {pipeline_mode = #tpu.pipeline_mode<synchronous>, transform_indices = @transform_1, window_bounds = array<i64: 128, 64>}, {pipeline_mode = #tpu.pipeline_mode<synchronous>, transform_indices = @transform_2, window_bounds = array<i64: 1, 64>}, {transform_indices = @transform_3, window_bounds = array<i64: 1, 4, 4, 64>}]} {
    %c0 = arith.constant 0 : index
    %c0_0 = arith.constant 0 : index
    %c0_1 = arith.constant 0 : index
    %c0_2 = arith.constant 0 : index
    %c0_3 = arith.constant 0 : index
    %0 = vector.load %arg1[%c0, %c0_0, %c0_1, %c0_2, %c0_3] : memref<1x4x11x11x2xf32, #tpu.memory_space<vmem>>, vector<1x1x8x8x2xf32>
    %1 = vector.shape_cast %0 : vector<1x1x8x8x2xf32> to vector<8x8x2xf32>
    %c0_4 = arith.constant 0 : index
    %c1 = arith.constant 1 : index
    %c0_5 = arith.constant 0 : index
    %c0_6 = arith.constant 0 : index
    %c0_7 = arith.constant 0 : index
    %2 = vector.load %arg1[%c0_4, %c1, %c0_5, %c0_6, %c0_7] : memref<1x4x11x11x2xf32, #tpu.memory_space<vmem>>, vector<1x1x8x8x2xf32>
    %3 = vector.shape_cast %2 : vector<1x1x8x8x2xf32> to vector<8x8x2xf32>
    %c0_8 = arith.constant 0 : index
    %c0_9 = arith.constant 0 : index
    %c0_10 = arith.constant 0 : index
    %c1_11 = arith.constant 1 : index
    %c0_12 = arith.constant 0 : index
    %4 = vector.load %arg1[%c0_8, %c0_9, %c0_10, %c1_11, %c0_12] : memref<1x4x11x11x2xf32, #tpu.memory_space<vmem>>, vector<1x1x8x8x2xf32>
    %5 = vector.shape_cast %4 : vector<1x1x8x8x2xf32> to vector<8x8x2xf32>
    %c0_13 = arith.constant 0 : index
    %c1_14 = arith.constant 1 : index
    %c0_15 = arith.constant 0 : index
    %c1_16 = arith.constant 1 : index
    %c0_17 = arith.constant 0 : index
    %6 = vector.load %arg1[%c0_13, %c1_14, %c0_15, %c1_16, %c0_17] : memref<1x4x11x11x2xf32, #tpu.memory_space<vmem>>, vector<1x1x8x8x2xf32>
    %7 = vector.shape_cast %6 : vector<1x1x8x8x2xf32> to vector<8x8x2xf32>
    %c0_18 = arith.constant 0 : index
    %c0_19 = arith.constant 0 : index
    %c0_20 = arith.constant 0 : index
    %c2 = arith.constant 2 : index
    %c0_21 = arith.constant 0 : index
    %8 = vector.load %arg1[%c0_18, %c0_19, %c0_20, %c2, %c0_21] : memref<1x4x11x11x2xf32, #tpu.memory_space<vmem>>, vector<1x1x8x8x2xf32>
    %9 = vector.shape_cast %8 : vector<1x1x8x8x2xf32> to vector<8x8x2xf32>
    %c0_22 = arith.constant 0 : index
    %c1_23 = arith.constant 1 : index
    %c0_24 = arith.constant 0 : index
    %c2_25 = arith.constant 2 : index
    %c0_26 = arith.constant 0 : index
    %10 = vector.load %arg1[%c0_22, %c1_23, %c0_24, %c2_25, %c0_26] : memref<1x4x11x11x2xf32, #tpu.memory_space<vmem>>, vector<1x1x8x8x2xf32>
    %11 = vector.shape_cast %10 : vector<1x1x8x8x2xf32> to vector<8x8x2xf32>
    %c0_27 = arith.constant 0 : index
    %c0_28 = arith.constant 0 : index
    %c0_29 = arith.constant 0 : index
    %c3 = arith.constant 3 : index
    %c0_30 = arith.constant 0 : index
    %12 = vector.load %arg1[%c0_27, %c0_28, %c0_29, %c3, %c0_30] : memref<1x4x11x11x2xf32, #tpu.memory_space<vmem>>, vector<1x1x8x8x2xf32>
    %13 = vector.shape_cast %12 : vector<1x1x8x8x2xf32> to vector<8x8x2xf32>
    %c0_31 = arith.constant 0 : index
    %c2_32 = arith.constant 2 : index
    %c0_33 = arith.constant 0 : index
    %c0_34 = arith.constant 0 : index
    %c0_35 = arith.constant 0 : index
    %14 = vector.load %arg1[%c0_31, %c2_32, %c0_33, %c0_34, %c0_35] : memref<1x4x11x11x2xf32, #tpu.memory_space<vmem>>, vector<1x1x8x8x2xf32>
    %15 = vector.shape_cast %14 : vector<1x1x8x8x2xf32> to vector<8x8x2xf32>
    %c0_36 = arith.constant 0 : index
    %c3_37 = arith.constant 3 : index
    %c0_38 = arith.constant 0 : index
    %c0_39 = arith.constant 0 : index
    %c0_40 = arith.constant 0 : index
    %16 = vector.load %arg1[%c0_36, %c3_37, %c0_38, %c0_39, %c0_40] : memref<1x4x11x11x2xf32, #tpu.memory_space<vmem>>, vector<1x1x8x8x2xf32>
    %17 = vector.shape_cast %16 : vector<1x1x8x8x2xf32> to vector<8x8x2xf32>
    %c0_41 = arith.constant 0 : index
    %c2_42 = arith.constant 2 : index
    %c0_43 = arith.constant 0 : index
    %c1_44 = arith.constant 1 : index
    %c0_45 = arith.constant 0 : index
    %18 = vector.load %arg1[%c0_41, %c2_42, %c0_43, %c1_44, %c0_45] : memref<1x4x11x11x2xf32, #tpu.memory_space<vmem>>, vector<1x1x8x8x2xf32>
    %19 = vector.shape_cast %18 : vector<1x1x8x8x2xf32> to vector<8x8x2xf32>
    %c0_46 = arith.constant 0 : index
    %c3_47 = arith.constant 3 : index
    %c0_48 = arith.constant 0 : index
    %c1_49 = arith.constant 1 : index
    %c0_50 = arith.constant 0 : index
    %20 = vector.load %arg1[%c0_46, %c3_47, %c0_48, %c1_49, %c0_50] : memref<1x4x11x11x2xf32, #tpu.memory_space<vmem>>, vector<1x1x8x8x2xf32>
    %21 = vector.shape_cast %20 : vector<1x1x8x8x2xf32> to vector<8x8x2xf32>
    %c0_51 = arith.constant 0 : index
    %c2_52 = arith.constant 2 : index
    %c0_53 = arith.constant 0 : index
    %c2_54 = arith.constant 2 : index
    %c0_55 = arith.constant 0 : index
    %22 = vector.load %arg1[%c0_51, %c2_52, %c0_53, %c2_54, %c0_55] : memref<1x4x11x11x2xf32, #tpu.memory_space<vmem>>, vector<1x1x8x8x2xf32>
    %23 = vector.shape_cast %22 : vector<1x1x8x8x2xf32> to vector<8x8x2xf32>
    %c0_56 = arith.constant 0 : index
    %c3_57 = arith.constant 3 : index
    %c0_58 = arith.constant 0 : index
    %c2_59 = arith.constant 2 : index
    %c0_60 = arith.constant 0 : index
    %24 = vector.load %arg1[%c0_56, %c3_57, %c0_58, %c2_59, %c0_60] : memref<1x4x11x11x2xf32, #tpu.memory_space<vmem>>, vector<1x1x8x8x2xf32>
    %25 = vector.shape_cast %24 : vector<1x1x8x8x2xf32> to vector<8x8x2xf32>
    %c0_61 = arith.constant 0 : index
    %c2_62 = arith.constant 2 : index
    %c0_63 = arith.constant 0 : index
    %c3_64 = arith.constant 3 : index
    %c0_65 = arith.constant 0 : index
    %26 = vector.load %arg1[%c0_61, %c2_62, %c0_63, %c3_64, %c0_65] : memref<1x4x11x11x2xf32, #tpu.memory_space<vmem>>, vector<1x1x8x8x2xf32>
    %27 = vector.shape_cast %26 : vector<1x1x8x8x2xf32> to vector<8x8x2xf32>
    %c0_66 = arith.constant 0 : index
    %c0_67 = arith.constant 0 : index
    %c1_68 = arith.constant 1 : index
    %c0_69 = arith.constant 0 : index
    %c0_70 = arith.constant 0 : index
    %28 = vector.load %arg1[%c0_66, %c0_67, %c1_68, %c0_69, %c0_70] : memref<1x4x11x11x2xf32, #tpu.memory_space<vmem>>, vector<1x1x8x8x2xf32>
    %29 = vector.shape_cast %28 : vector<1x1x8x8x2xf32> to vector<8x8x2xf32>
    %c0_71 = arith.constant 0 : index
    %c1_72 = arith.constant 1 : index
    %c1_73 = arith.constant 1 : index
    %c0_74 = arith.constant 0 : index
    %c0_75 = arith.constant 0 : index
    %30 = vector.load %arg1[%c0_71, %c1_72, %c1_73, %c0_74, %c0_75] : memref<1x4x11x11x2xf32, #tpu.memory_space<vmem>>, vector<1x1x8x8x2xf32>
    %31 = vector.shape_cast %30 : vector<1x1x8x8x2xf32> to vector<8x8x2xf32>
    %c0_76 = arith.constant 0 : index
    %c0_77 = arith.constant 0 : index
    %c1_78 = arith.constant 1 : index
    %c1_79 = arith.constant 1 : index
    %c0_80 = arith.constant 0 : index
    %32 = vector.load %arg1[%c0_76, %c0_77, %c1_78, %c1_79, %c0_80] : memref<1x4x11x11x2xf32, #tpu.memory_space<vmem>>, vector<1x1x8x8x2xf32>
    %33 = vector.shape_cast %32 : vector<1x1x8x8x2xf32> to vector<8x8x2xf32>
    %c0_81 = arith.constant 0 : index
    %c1_82 = arith.constant 1 : index
    %c1_83 = arith.constant 1 : index
    %c1_84 = arith.constant 1 : index
    %c0_85 = arith.constant 0 : index
    %34 = vector.load %arg1[%c0_81, %c1_82, %c1_83, %c1_84, %c0_85] : memref<1x4x11x11x2xf32, #tpu.memory_space<vmem>>, vector<1x1x8x8x2xf32>
    %35 = vector.shape_cast %34 : vector<1x1x8x8x2xf32> to vector<8x8x2xf32>
    %c0_86 = arith.constant 0 : index
    %c0_87 = arith.constant 0 : index
    %c1_88 = arith.constant 1 : index
    %c2_89 = arith.constant 2 : index
    %c0_90 = arith.constant 0 : index
    %36 = vector.load %arg1[%c0_86, %c0_87, %c1_88, %c2_89, %c0_90] : memref<1x4x11x11x2xf32, #tpu.memory_space<vmem>>, vector<1x1x8x8x2xf32>
    %37 = vector.shape_cast %36 : vector<1x1x8x8x2xf32> to vector<8x8x2xf32>
    %c0_91 = arith.constant 0 : index
    %c1_92 = arith.constant 1 : index
    %c1_93 = arith.constant 1 : index
    %c2_94 = arith.constant 2 : index
    %c0_95 = arith.constant 0 : index
    %38 = vector.load %arg1[%c0_91, %c1_92, %c1_93, %c2_94, %c0_95] : memref<1x4x11x11x2xf32, #tpu.memory_space<vmem>>, vector<1x1x8x8x2xf32>
    %39 = vector.shape_cast %38 : vector<1x1x8x8x2xf32> to vector<8x8x2xf32>
    %c0_96 = arith.constant 0 : index
    %c0_97 = arith.constant 0 : index
    %c1_98 = arith.constant 1 : index
    %c3_99 = arith.constant 3 : index
    %c0_100 = arith.constant 0 : index
    %40 = vector.load %arg1[%c0_96, %c0_97, %c1_98, %c3_99, %c0_100] : memref<1x4x11x11x2xf32, #tpu.memory_space<vmem>>, vector<1x1x8x8x2xf32>
    %41 = vector.shape_cast %40 : vector<1x1x8x8x2xf32> to vector<8x8x2xf32>
    %c0_101 = arith.constant 0 : index
    %c2_102 = arith.constant 2 : index
    %c1_103 = arith.constant 1 : index
    %c0_104 = arith.constant 0 : index
    %c0_105 = arith.constant 0 : index
    %42 = vector.load %arg1[%c0_101, %c2_102, %c1_103, %c0_104, %c0_105] : memref<1x4x11x11x2xf32, #tpu.memory_space<vmem>>, vector<1x1x8x8x2xf32>
    %43 = vector.shape_cast %42 : vector<1x1x8x8x2xf32> to vector<8x8x2xf32>
    %c0_106 = arith.constant 0 : index
    %c3_107 = arith.constant 3 : index
    %c1_108 = arith.constant 1 : index
    %c0_109 = arith.constant 0 : index
    %c0_110 = arith.constant 0 : index
    %44 = vector.load %arg1[%c0_106, %c3_107, %c1_108, %c0_109, %c0_110] : memref<1x4x11x11x2xf32, #tpu.memory_space<vmem>>, vector<1x1x8x8x2xf32>
    %45 = vector.shape_cast %44 : vector<1x1x8x8x2xf32> to vector<8x8x2xf32>
    %c0_111 = arith.constant 0 : index
    %c2_112 = arith.constant 2 : index
    %c1_113 = arith.constant 1 : index
    %c1_114 = arith.constant 1 : index
    %c0_115 = arith.constant 0 : index
    %46 = vector.load %arg1[%c0_111, %c2_112, %c1_113, %c1_114, %c0_115] : memref<1x4x11x11x2xf32, #tpu.memory_space<vmem>>, vector<1x1x8x8x2xf32>
    %47 = vector.shape_cast %46 : vector<1x1x8x8x2xf32> to vector<8x8x2xf32>
    %c0_116 = arith.constant 0 : index
    %c3_117 = arith.constant 3 : index
    %c1_118 = arith.constant 1 : index
    %c1_119 = arith.constant 1 : index
    %c0_120 = arith.constant 0 : index
    %48 = vector.load %arg1[%c0_116, %c3_117, %c1_118, %c1_119, %c0_120] : memref<1x4x11x11x2xf32, #tpu.memory_space<vmem>>, vector<1x1x8x8x2xf32>
    %49 = vector.shape_cast %48 : vector<1x1x8x8x2xf32> to vector<8x8x2xf32>
    %c0_121 = arith.constant 0 : index
    %c2_122 = arith.constant 2 : index
    %c1_123 = arith.constant 1 : index
    %c2_124 = arith.constant 2 : index
    %c0_125 = arith.constant 0 : index
    %50 = vector.load %arg1[%c0_121, %c2_122, %c1_123, %c2_124, %c0_125] : memref<1x4x11x11x2xf32, #tpu.memory_space<vmem>>, vector<1x1x8x8x2xf32>
    %51 = vector.shape_cast %50 : vector<1x1x8x8x2xf32> to vector<8x8x2xf32>
    %c0_126 = arith.constant 0 : index
    %c3_127 = arith.constant 3 : index
    %c1_128 = arith.constant 1 : index
    %c2_129 = arith.constant 2 : index
    %c0_130 = arith.constant 0 : index
    %52 = vector.load %arg1[%c0_126, %c3_127, %c1_128, %c2_129, %c0_130] : memref<1x4x11x11x2xf32, #tpu.memory_space<vmem>>, vector<1x1x8x8x2xf32>
    %53 = vector.shape_cast %52 : vector<1x1x8x8x2xf32> to vector<8x8x2xf32>
    %c0_131 = arith.constant 0 : index
    %c2_132 = arith.constant 2 : index
    %c1_133 = arith.constant 1 : index
    %c3_134 = arith.constant 3 : index
    %c0_135 = arith.constant 0 : index
    %54 = vector.load %arg1[%c0_131, %c2_132, %c1_133, %c3_134, %c0_135] : memref<1x4x11x11x2xf32, #tpu.memory_space<vmem>>, vector<1x1x8x8x2xf32>
    %55 = vector.shape_cast %54 : vector<1x1x8x8x2xf32> to vector<8x8x2xf32>
    %c0_136 = arith.constant 0 : index
    %c0_137 = arith.constant 0 : index
    %c2_138 = arith.constant 2 : index
    %c0_139 = arith.constant 0 : index
    %c0_140 = arith.constant 0 : index
    %56 = vector.load %arg1[%c0_136, %c0_137, %c2_138, %c0_139, %c0_140] : memref<1x4x11x11x2xf32, #tpu.memory_space<vmem>>, vector<1x1x8x8x2xf32>
    %57 = vector.shape_cast %56 : vector<1x1x8x8x2xf32> to vector<8x8x2xf32>
    %c0_141 = arith.constant 0 : index
    %c1_142 = arith.constant 1 : index
    %c2_143 = arith.constant 2 : index
    %c0_144 = arith.constant 0 : index
    %c0_145 = arith.constant 0 : index
    %58 = vector.load %arg1[%c0_141, %c1_142, %c2_143, %c0_144, %c0_145] : memref<1x4x11x11x2xf32, #tpu.memory_space<vmem>>, vector<1x1x8x8x2xf32>
    %59 = vector.shape_cast %58 : vector<1x1x8x8x2xf32> to vector<8x8x2xf32>
    %c0_146 = arith.constant 0 : index
    %c0_147 = arith.constant 0 : index
    %c2_148 = arith.constant 2 : index
    %c1_149 = arith.constant 1 : index
    %c0_150 = arith.constant 0 : index
    %60 = vector.load %arg1[%c0_146, %c0_147, %c2_148, %c1_149, %c0_150] : memref<1x4x11x11x2xf32, #tpu.memory_space<vmem>>, vector<1x1x8x8x2xf32>
    %61 = vector.shape_cast %60 : vector<1x1x8x8x2xf32> to vector<8x8x2xf32>
    %c0_151 = arith.constant 0 : index
    %c1_152 = arith.constant 1 : index
    %c2_153 = arith.constant 2 : index
    %c1_154 = arith.constant 1 : index
    %c0_155 = arith.constant 0 : index
    %62 = vector.load %arg1[%c0_151, %c1_152, %c2_153, %c1_154, %c0_155] : memref<1x4x11x11x2xf32, #tpu.memory_space<vmem>>, vector<1x1x8x8x2xf32>
    %63 = vector.shape_cast %62 : vector<1x1x8x8x2xf32> to vector<8x8x2xf32>
    %c0_156 = arith.constant 0 : index
    %c0_157 = arith.constant 0 : index
    %c2_158 = arith.constant 2 : index
    %c2_159 = arith.constant 2 : index
    %c0_160 = arith.constant 0 : index
    %64 = vector.load %arg1[%c0_156, %c0_157, %c2_158, %c2_159, %c0_160] : memref<1x4x11x11x2xf32, #tpu.memory_space<vmem>>, vector<1x1x8x8x2xf32>
    %65 = vector.shape_cast %64 : vector<1x1x8x8x2xf32> to vector<8x8x2xf32>
    %c0_161 = arith.constant 0 : index
    %c1_162 = arith.constant 1 : index
    %c2_163 = arith.constant 2 : index
    %c2_164 = arith.constant 2 : index
    %c0_165 = arith.constant 0 : index
    %66 = vector.load %arg1[%c0_161, %c1_162, %c2_163, %c2_164, %c0_165] : memref<1x4x11x11x2xf32, #tpu.memory_space<vmem>>, vector<1x1x8x8x2xf32>
    %67 = vector.shape_cast %66 : vector<1x1x8x8x2xf32> to vector<8x8x2xf32>
    %c0_166 = arith.constant 0 : index
    %c0_167 = arith.constant 0 : index
    %c2_168 = arith.constant 2 : index
    %c3_169 = arith.constant 3 : index
    %c0_170 = arith.constant 0 : index
    %68 = vector.load %arg1[%c0_166, %c0_167, %c2_168, %c3_169, %c0_170] : memref<1x4x11x11x2xf32, #tpu.memory_space<vmem>>, vector<1x1x8x8x2xf32>
    %69 = vector.shape_cast %68 : vector<1x1x8x8x2xf32> to vector<8x8x2xf32>
    %c0_171 = arith.constant 0 : index
    %c2_172 = arith.constant 2 : index
    %c2_173 = arith.constant 2 : index
    %c0_174 = arith.constant 0 : index
    %c0_175 = arith.constant 0 : index
    %70 = vector.load %arg1[%c0_171, %c2_172, %c2_173, %c0_174, %c0_175] : memref<1x4x11x11x2xf32, #tpu.memory_space<vmem>>, vector<1x1x8x8x2xf32>
    %71 = vector.shape_cast %70 : vector<1x1x8x8x2xf32> to vector<8x8x2xf32>
    %c0_176 = arith.constant 0 : index
    %c3_177 = arith.constant 3 : index
    %c2_178 = arith.constant 2 : index
    %c0_179 = arith.constant 0 : index
    %c0_180 = arith.constant 0 : index
    %72 = vector.load %arg1[%c0_176, %c3_177, %c2_178, %c0_179, %c0_180] : memref<1x4x11x11x2xf32, #tpu.memory_space<vmem>>, vector<1x1x8x8x2xf32>
    %73 = vector.shape_cast %72 : vector<1x1x8x8x2xf32> to vector<8x8x2xf32>
    %c0_181 = arith.constant 0 : index
    %c2_182 = arith.constant 2 : index
    %c2_183 = arith.constant 2 : index
    %c1_184 = arith.constant 1 : index
    %c0_185 = arith.constant 0 : index
    %74 = vector.load %arg1[%c0_181, %c2_182, %c2_183, %c1_184, %c0_185] : memref<1x4x11x11x2xf32, #tpu.memory_space<vmem>>, vector<1x1x8x8x2xf32>
    %75 = vector.shape_cast %74 : vector<1x1x8x8x2xf32> to vector<8x8x2xf32>
    %c0_186 = arith.constant 0 : index
    %c3_187 = arith.constant 3 : index
    %c2_188 = arith.constant 2 : index
    %c1_189 = arith.constant 1 : index
    %c0_190 = arith.constant 0 : index
    %76 = vector.load %arg1[%c0_186, %c3_187, %c2_188, %c1_189, %c0_190] : memref<1x4x11x11x2xf32, #tpu.memory_space<vmem>>, vector<1x1x8x8x2xf32>
    %77 = vector.shape_cast %76 : vector<1x1x8x8x2xf32> to vector<8x8x2xf32>
    %c0_191 = arith.constant 0 : index
    %c2_192 = arith.constant 2 : index
    %c2_193 = arith.constant 2 : index
    %c2_194 = arith.constant 2 : index
    %c0_195 = arith.constant 0 : index
    %78 = vector.load %arg1[%c0_191, %c2_192, %c2_193, %c2_194, %c0_195] : memref<1x4x11x11x2xf32, #tpu.memory_space<vmem>>, vector<1x1x8x8x2xf32>
    %79 = vector.shape_cast %78 : vector<1x1x8x8x2xf32> to vector<8x8x2xf32>
    %c0_196 = arith.constant 0 : index
    %c3_197 = arith.constant 3 : index
    %c2_198 = arith.constant 2 : index
    %c2_199 = arith.constant 2 : index
    %c0_200 = arith.constant 0 : index
    %80 = vector.load %arg1[%c0_196, %c3_197, %c2_198, %c2_199, %c0_200] : memref<1x4x11x11x2xf32, #tpu.memory_space<vmem>>, vector<1x1x8x8x2xf32>
    %81 = vector.shape_cast %80 : vector<1x1x8x8x2xf32> to vector<8x8x2xf32>
    %c0_201 = arith.constant 0 : index
    %c2_202 = arith.constant 2 : index
    %c2_203 = arith.constant 2 : index
    %c3_204 = arith.constant 3 : index
    %c0_205 = arith.constant 0 : index
    %82 = vector.load %arg1[%c0_201, %c2_202, %c2_203, %c3_204, %c0_205] : memref<1x4x11x11x2xf32, #tpu.memory_space<vmem>>, vector<1x1x8x8x2xf32>
    %83 = vector.shape_cast %82 : vector<1x1x8x8x2xf32> to vector<8x8x2xf32>
    %c0_206 = arith.constant 0 : index
    %c0_207 = arith.constant 0 : index
    %c3_208 = arith.constant 3 : index
    %c0_209 = arith.constant 0 : index
    %c0_210 = arith.constant 0 : index
    %84 = vector.load %arg1[%c0_206, %c0_207, %c3_208, %c0_209, %c0_210] : memref<1x4x11x11x2xf32, #tpu.memory_space<vmem>>, vector<1x1x8x8x2xf32>
    %85 = vector.shape_cast %84 : vector<1x1x8x8x2xf32> to vector<8x8x2xf32>
    %c0_211 = arith.constant 0 : index
    %c1_212 = arith.constant 1 : index
    %c3_213 = arith.constant 3 : index
    %c0_214 = arith.constant 0 : index
    %c0_215 = arith.constant 0 : index
    %86 = vector.load %arg1[%c0_211, %c1_212, %c3_213, %c0_214, %c0_215] : memref<1x4x11x11x2xf32, #tpu.memory_space<vmem>>, vector<1x1x8x8x2xf32>
    %87 = vector.shape_cast %86 : vector<1x1x8x8x2xf32> to vector<8x8x2xf32>
    %c0_216 = arith.constant 0 : index
    %c0_217 = arith.constant 0 : index
    %c3_218 = arith.constant 3 : index
    %c1_219 = arith.constant 1 : index
    %c0_220 = arith.constant 0 : index
    %88 = vector.load %arg1[%c0_216, %c0_217, %c3_218, %c1_219, %c0_220] : memref<1x4x11x11x2xf32, #tpu.memory_space<vmem>>, vector<1x1x8x8x2xf32>
    %89 = vector.shape_cast %88 : vector<1x1x8x8x2xf32> to vector<8x8x2xf32>
    %c0_221 = arith.constant 0 : index
    %c1_222 = arith.constant 1 : index
    %c3_223 = arith.constant 3 : index
    %c1_224 = arith.constant 1 : index
    %c0_225 = arith.constant 0 : index
    %90 = vector.load %arg1[%c0_221, %c1_222, %c3_223, %c1_224, %c0_225] : memref<1x4x11x11x2xf32, #tpu.memory_space<vmem>>, vector<1x1x8x8x2xf32>
    %91 = vector.shape_cast %90 : vector<1x1x8x8x2xf32> to vector<8x8x2xf32>
    %c0_226 = arith.constant 0 : index
    %c0_227 = arith.constant 0 : index
    %c3_228 = arith.constant 3 : index
    %c2_229 = arith.constant 2 : index
    %c0_230 = arith.constant 0 : index
    %92 = vector.load %arg1[%c0_226, %c0_227, %c3_228, %c2_229, %c0_230] : memref<1x4x11x11x2xf32, #tpu.memory_space<vmem>>, vector<1x1x8x8x2xf32>
    %93 = vector.shape_cast %92 : vector<1x1x8x8x2xf32> to vector<8x8x2xf32>
    %c0_231 = arith.constant 0 : index
    %c1_232 = arith.constant 1 : index
    %c3_233 = arith.constant 3 : index
    %c2_234 = arith.constant 2 : index
    %c0_235 = arith.constant 0 : index
    %94 = vector.load %arg1[%c0_231, %c1_232, %c3_233, %c2_234, %c0_235] : memref<1x4x11x11x2xf32, #tpu.memory_space<vmem>>, vector<1x1x8x8x2xf32>
    %95 = vector.shape_cast %94 : vector<1x1x8x8x2xf32> to vector<8x8x2xf32>
    %c0_236 = arith.constant 0 : index
    %c0_237 = arith.constant 0 : index
    %c3_238 = arith.constant 3 : index
    %c3_239 = arith.constant 3 : index
    %c0_240 = arith.constant 0 : index
    %96 = vector.load %arg1[%c0_236, %c0_237, %c3_238, %c3_239, %c0_240] : memref<1x4x11x11x2xf32, #tpu.memory_space<vmem>>, vector<1x1x8x8x2xf32>
    %97 = vector.shape_cast %96 : vector<1x1x8x8x2xf32> to vector<8x8x2xf32>
    %cst = arith.constant 0.000000e+00 : f32
    %98 = vector.broadcast %cst : f32 to vector<8x8x30xf32>
    %99 = tpu.concatenate %1, %3, %5, %7, %9, %11, %13, %15, %17, %19, %21, %23, %25, %27, %29, %31 in 2 : vector<8x8x2xf32>, vector<8x8x2xf32>, vector<8x8x2xf32>, vector<8x8x2xf32>, vector<8x8x2xf32>, vector<8x8x2xf32>, vector<8x8x2xf32>, vector<8x8x2xf32>, vector<8x8x2xf32>, vector<8x8x2xf32>, vector<8x8x2xf32>, vector<8x8x2xf32>, vector<8x8x2xf32>, vector<8x8x2xf32>, vector<8x8x2xf32>, vector<8x8x2xf32> -> vector<8x8x32xf32>
    %100 = tpu.concatenate %33, %35, %37, %39, %41, %43, %45, %47, %49, %51, %53, %55, %57, %59, %61, %63 in 2 : vector<8x8x2xf32>, vector<8x8x2xf32>, vector<8x8x2xf32>, vector<8x8x2xf32>, vector<8x8x2xf32>, vector<8x8x2xf32>, vector<8x8x2xf32>, vector<8x8x2xf32>, vector<8x8x2xf32>, vector<8x8x2xf32>, vector<8x8x2xf32>, vector<8x8x2xf32>, vector<8x8x2xf32>, vector<8x8x2xf32>, vector<8x8x2xf32>, vector<8x8x2xf32> -> vector<8x8x32xf32>
    %101 = tpu.concatenate %65, %67, %69, %71, %73, %75, %77, %79, %81, %83, %85, %87, %89, %91, %93, %95 in 2 : vector<8x8x2xf32>, vector<8x8x2xf32>, vector<8x8x2xf32>, vector<8x8x2xf32>, vector<8x8x2xf32>, vector<8x8x2xf32>, vector<8x8x2xf32>, vector<8x8x2xf32>, vector<8x8x2xf32>, vector<8x8x2xf32>, vector<8x8x2xf32>, vector<8x8x2xf32>, vector<8x8x2xf32>, vector<8x8x2xf32>, vector<8x8x2xf32>, vector<8x8x2xf32> -> vector<8x8x32xf32>
    %102 = tpu.concatenate %97, %98 in 2 : vector<8x8x2xf32>, vector<8x8x30xf32> -> vector<8x8x32xf32>
    %103 = tpu.concatenate %99, %100, %101, %102 in 2 : vector<8x8x32xf32>, vector<8x8x32xf32>, vector<8x8x32xf32>, vector<8x8x32xf32> -> vector<8x8x128xf32>
    %104 = vector.shape_cast %103 : vector<8x8x128xf32> to vector<64x128xf32>
    %105 = arith.truncf %104 : vector<64x128xf32> to vector<64x128xbf16>
    %c0_241 = arith.constant 0 : index
    %c0_242 = arith.constant 0 : index
    %106 = vector.load %arg2[%c0_241, %c0_242] : memref<128x64xbf16, #tpu.memory_space<vmem>>, vector<128x64xbf16>
    %cst_243 = arith.constant dense<0.000000e+00> : vector<64x64xf32>
    %107 = tpu.matmul %105, %106, %cst_243 {dimension_numbers = #tpu.dot_dimension_numbers<[1], [0], [0], [1], [0, 0, 1, 1], [], []>} : vector<64x128xbf16>, vector<128x64xbf16>, vector<64x64xf32> -> vector<64x64xf32>
    %c0_244 = arith.constant 0 : index
    %c0_245 = arith.constant 0 : index
    %108 = vector.load %arg3[%c0_244, %c0_245] : memref<1x64xf32, #tpu.memory_space<vmem>>, vector<1x64xf32>
    %109 = vector.broadcast %108 : vector<1x64xf32> to vector<64x64xf32>
    %110 = arith.addf %107, %109 : vector<64x64xf32>
    %cst_246 = arith.constant 0.000000e+00 : f32
    %111 = vector.broadcast %cst_246 : f32 to vector<64x64xf32>
    %112 = arith.maximumf %110, %111 : vector<64x64xf32>
    %113 = vector.shape_cast %112 : vector<64x64xf32> to vector<8x8x64xf32>
    %cst_247 = arith.constant 0.000000e+00 : f32
    %114 = vector.broadcast %cst_247 : f32 to vector<8x1x64xf32>
    %c0_248 = arith.constant 0 : index
    %c0_249 = arith.constant 0 : index
    %c0_250 = arith.constant 0 : index
    %115 = vector.load %arg5[%c0_248, %c0_249, %c0_250] : memref<8x9x64xf32, #tpu.memory_space<vmem>>, vector<8x1x64xf32>
    tpu.vector_store %arg5[%c0_248, %c0_249, %c0_250], %114 {strides = array<i32>} : memref<8x9x64xf32, #tpu.memory_space<vmem>>, vector<8x1x64xf32>,
    %c0_251 = arith.constant 0 : index
    %c1_252 = arith.constant 1 : index
    %c0_253 = arith.constant 0 : index
    %116 = vector.load %arg5[%c0_251, %c1_252, %c0_253] : memref<8x9x64xf32, #tpu.memory_space<vmem>>, vector<8x8x64xf32>
    tpu.vector_store %arg5[%c0_251, %c1_252, %c0_253], %113 {strides = array<i32>} : memref<8x9x64xf32, #tpu.memory_space<vmem>>, vector<8x8x64xf32>,
    %c0_254 = arith.constant 0 : index
    %c0_255 = arith.constant 0 : index
    %c0_256 = arith.constant 0 : index
    %117 = tpu.strided_load %arg5[%c0_254, %c0_255, %c0_256] {strides = array<i32: 1, 2, 1>} : memref<8x9x64xf32, #tpu.memory_space<vmem>>, vector<8x4x64xf32>
    %c0_257 = arith.constant 0 : index
    %c1_258 = arith.constant 1 : index
    %c0_259 = arith.constant 0 : index
    %118 = tpu.strided_load %arg5[%c0_257, %c1_258, %c0_259] {strides = array<i32: 1, 2, 1>} : memref<8x9x64xf32, #tpu.memory_space<vmem>>, vector<8x4x64xf32>
    %119 = arith.maximumf %117, %118 : vector<8x4x64xf32>
    %c0_260 = arith.constant 0 : index
    %c2_261 = arith.constant 2 : index
    %c0_262 = arith.constant 0 : index
    %120 = tpu.strided_load %arg5[%c0_260, %c2_261, %c0_262] {strides = array<i32: 1, 2, 1>} : memref<8x9x64xf32, #tpu.memory_space<vmem>>, vector<8x4x64xf32>
    %121 = arith.maximumf %119, %120 : vector<8x4x64xf32>
    %cst_263 = arith.constant 0.000000e+00 : f32
    %122 = vector.broadcast %cst_263 : f32 to vector<1x4x64xf32>
    %c0_264 = arith.constant 0 : index
    %c0_265 = arith.constant 0 : index
    %c0_266 = arith.constant 0 : index
    %123 = vector.load %arg6[%c0_264, %c0_265, %c0_266] : memref<9x4x64xf32, #tpu.memory_space<vmem>>, vector<1x4x64xf32>
    tpu.vector_store %arg6[%c0_264, %c0_265, %c0_266], %122 {strides = array<i32>} : memref<9x4x64xf32, #tpu.memory_space<vmem>>, vector<1x4x64xf32>,
    %c1_267 = arith.constant 1 : index
    %c0_268 = arith.constant 0 : index
    %c0_269 = arith.constant 0 : index
    %124 = vector.load %arg6[%c1_267, %c0_268, %c0_269] : memref<9x4x64xf32, #tpu.memory_space<vmem>>, vector<8x4x64xf32>
    tpu.vector_store %arg6[%c1_267, %c0_268, %c0_269], %121 {strides = array<i32>} : memref<9x4x64xf32, #tpu.memory_space<vmem>>, vector<8x4x64xf32>,
    %c0_270 = arith.constant 0 : index
    %c0_271 = arith.constant 0 : index
    %c0_272 = arith.constant 0 : index
    %125 = tpu.strided_load %arg6[%c0_270, %c0_271, %c0_272] {strides = array<i32: 2, 1, 1>} : memref<9x4x64xf32, #tpu.memory_space<vmem>>, vector<4x4x64xf32>
    %c1_273 = arith.constant 1 : index
    %c0_274 = arith.constant 0 : index
    %c0_275 = arith.constant 0 : index
    %126 = tpu.strided_load %arg6[%c1_273, %c0_274, %c0_275] {strides = array<i32: 2, 1, 1>} : memref<9x4x64xf32, #tpu.memory_space<vmem>>, vector<4x4x64xf32>
    %127 = arith.maximumf %125, %126 : vector<4x4x64xf32>
    %c2_276 = arith.constant 2 : index
    %c0_277 = arith.constant 0 : index
    %c0_278 = arith.constant 0 : index
    %128 = tpu.strided_load %arg6[%c2_276, %c0_277, %c0_278] {strides = array<i32: 2, 1, 1>} : memref<9x4x64xf32, #tpu.memory_space<vmem>>, vector<4x4x64xf32>
    %129 = arith.maximumf %127, %128 : vector<4x4x64xf32>
    %c0_279 = arith.constant 0 : index
    %c0_280 = arith.constant 0 : index
    %c0_281 = arith.constant 0 : index
    %c0_282 = arith.constant 0 : index
    %130 = vector.load %arg4[%c0_279, %c0_280, %c0_281, %c0_282] : memref<1x4x4x64xf32, #tpu.memory_space<vmem>>, vector<1x4x4x64xf32>
    %131 = vector.shape_cast %130 : vector<1x4x4x64xf32> to vector<4x4x64xf32>
    %132 = vector.shape_cast %129 : vector<4x4x64xf32> to vector<1x4x4x64xf32>
    tpu.vector_store %arg4[%c0_279, %c0_280, %c0_281, %c0_282], %132 {strides = array<i32>} : memref<1x4x4x64xf32, #tpu.memory_space<vmem>>, vector<1x4x4x64xf32>,
    return
  }
  func.func @transform_0(%arg0: i32) -> (i32, i32, i32, i32, i32) {
    %c0_i32 = arith.constant 0 : i32
    %c0_i32_0 = arith.constant 0 : i32
    %c0_i32_1 = arith.constant 0 : i32
    %c0_i32_2 = arith.constant 0 : i32
    %c0_i32_3 = arith.constant 0 : i32
    return %arg0, %c0_i32, %c0_i32_0, %c0_i32_1, %c0_i32_2 : i32, i32, i32, i32, i32
  }
  func.func @transform_1(%arg0: i32) -> (i32, i32) {
    %c0_i32 = arith.constant 0 : i32
    %c0_i32_0 = arith.constant 0 : i32
    %c0_i32_1 = arith.constant 0 : i32
    return %c0_i32, %c0_i32_0 : i32, i32
  }
  func.func @transform_2(%arg0: i32) -> (i32, i32) {
    %c0_i32 = arith.constant 0 : i32
    %c0_i32_0 = arith.constant 0 : i32
    %c0_i32_1 = arith.constant 0 : i32
    return %c0_i32, %c0_i32_0 : i32, i32
  }
  func.func @transform_3(%arg0: i32) -> (i32, i32, i32, i32) {
    %c0_i32 = arith.constant 0 : i32
    %c0_i32_0 = arith.constant 0 : i32
    %c0_i32_1 = arith.constant 0 : i32
    %c0_i32_2 = arith.constant 0 : i32
    return %arg0, %c0_i32, %c0_i32_0, %c0_i32_1 : i32, i32, i32, i32
  }
}

</mosaic_0001>

<bundles_post_ra>
// kernel: goinnet_stem_forward.1
= control target key start
LH: loop header
LB: loop body
LE: loop exit
PB: predicated region body
PF: predicated region fallthrough
CT: control target
= control target key end

     0   :  { %8 = vsyncpa [#allocation5], 0  ;;  %s6688_s0 = inlined_call_operand.vmem [shape: f32[2,4,11,11,2], index: 0, kind: input, shape index: {}]   ;;  %s6689_s1 = inlined_call_operand.vmem [shape: bf16[128,64], index: 1, kind: input, shape index: {}]   ;;  %s6690_s2 = inlined_call_operand.vmem [shape: f32[1,64], index: 2, kind: input, shape index: {}]   ;;  %s6691_s3 = inlined_call_operand.hbm [shape: f32[2,4,4,64], index: 3, kind: output, shape index: {}]  }
   0x1   :  { %10 = vsyncpa [#allocation5 + $0x1], 0  ;;  %s4430_s12 = smov 0   ;;  %s4432_s13 = smov 0  }
   0x2   :  { %s4434_s14 = smov 0   ;;  %s4436_s15 = smov 0  }
   0x3 LB: > { %s4451_s16 = sadd.s32 4294967295, %s4388_s15   ;;  %s2861_s17 = sadd.s32 4294967294, %s4388_s15   ;;  %s4388_s15 = sphi %s4436_s15, %s7048_s15   ;;  %s4384_s14 = sphi %s4434_s14, %s7047_s14   ;;  %s4380_s13 = sphi %s4432_s13, %s7046_s13   ;;  %s4376_s12 = sphi %s4430_s12, %s7045_s12  }
   0x4   : > { %s4455_s18 = sadd.s32 1, %s4388_s15   ;;  %s91_s19 = sadd.s32 1, %s4384_s14 }
   0x5   : > { %s88_s20 = ssub.s32 %s4388_s15, %s4455_s18  ;;  %p101_p0 = scmp.ne.s32.totalorder %s4384_s14, %s4380_s13 }
   0x6   : > { %p89_p1 = scmp.eq.s32.totalorder %s88_s20, 0  ;;  %p102_p2 = scmp.eq.s32.totalorder %s4451_s16, 1 }
   0x7   : > { %p107_p3 = scmp.ne.s32.totalorder %s4380_s13, %s4376_s12  ;;  %p108_p4 = scmp.eq.s32.totalorder %s2861_s17, 1 }
   0x8   : > { %s4466_s21 = scalar_select %p89_p1, %s4384_s14, %s91_s19  }
   0x9   : > { %p4468_p5 = por %p102_p2, %p101_p0  ;;  %p4472_p6 = por %p108_p4, %p107_p3 }
   0xa   : > { %p2864_p7 = scmp.ge.s32.totalorder %s4388_s15, 1  ;;  %p140_p8 = scmp.lt.s32.totalorder %s4388_s15, 3 }
   0xc   : > { %p141_p9 = pnand %p2864_p7, %p140_p8 }
   0xe   : > { %144 = sbr.rel (%p141_p9) target bundleno = 880 (0x370), region = 32 }
  0x13   : > { %p164_p10 = scmp.lt.s32.totalorder %s4451_s16, 1  ;;  %s4390_s29 = smov 2   ;;  %vm1055_vm0 = vcmask 15360   ;;  %vm1064_vm1 = vcmask 31744   ;;  %vm1073_vm2 = vcmask 48128   ;;  %vm1082_vm3 = vcmask 64512  }
  0x14   : > { %s4391_s30 = smov 4   ;;  %s4392_s4 = smov 6   ;;  %vm1091_vm4 = vcmask 80896   ;;  %vm1100_vm5 = vcmask 97280   ;;  %vm1109_vm6 = vcmask 113664   ;;  %vm1118_vm7 = vcmask 130048  }
  0x15   : > { %s165_s24 = scalar_select %p164_p10, %s4451_s16, 1  ;;  %vm1127_vm8 = vcmask 146432   ;;  %vm1136_vm9 = vcmask 162816   ;;  %vm1145_vm10 = vcmask 179200   ;;  %vm1154_vm11 = vcmask 195584  }
  0x16   : > { %s4393_s5 = smov 8   ;;  %s4394_s6 = smov 10   ;;  %vm1163_vm12 = vcmask 211968   ;;  %vm1172_vm13 = vcmask 228352   ;;  %vm1181_vm14 = vcmask 244736   ;;  %vm2494_vm15 = vcmask 261120  }
  0x17   : > { %s3294_s25 = smul.u32 704, %s165_s24  ;;  %s4395_s7 = smov 12  }
  0x18   : > { %s4396_s8 = smov 14   ;;  %s4397_s9 = smov 16  }
  0x19   : > { %s4483_s28 = scalar_lea.vmem %s6688_s0, %s3294_s25  ;;  %s4398_s10 = smov 18  }
  0x1a   : > { %v4486_v0 = vld [vmem:[%s4483_s28 + $0xf0] sm:$0xff]  ;;  %v4489_v1 = vld [vmem:[%s4483_s28 + $0x100] sm:$0xff]  ;;  %s4399_s11 = smov 20   ;;  %s4400_s17 = smov 22  }
  0x1b   : > { %v2867_v2 = vld [vmem:[%s4483_s28 + $0xb0] sm:$0xff]  ;;  %v3363_v3 = vpack.i.bf16 %v4489_v1, %v4486_v0  ;;  %v4495_v4 = vld [vmem:[%s4483_s28 + $0xc0] sm:$0xff]  ;;  %s4401_s19 = smov 24   ;;  %s4402_s20 = smov 26  }
  0x1c   : > { %v4498_v5 = vld [vmem:[%s4483_s28 + $0x110] sm:$0xff]  ;;  %v4501_v6 = vld [vmem:[%s4483_s28 + $0x120] sm:$0xff]  ;;  %v3353_v7 = vpack.i.bf16 %v4495_v4, %v2867_v2  ;;  %s4403_s24 = smov 28   ;;  %s4404_s25 = smov 30  }
  0x1d   : > { %v4505_v8 = vld [vmem:[%s4483_s28 + $0xd0] sm:$0xff]  ;;  %v4508_v9 = vld [vmem:[%s4483_s28 + $0xe0] sm:$0xff]  ;;  %3364 = vrot.lane.b32.xlu1 %v3363_v3, %s4390_s29  ;;  %v3368_v11 = vpack.i.bf16 %v4501_v6, %v4498_v5  ;;  %s4406_s27 = smov 64  }
  0x1e   : > { %3354 = vrot.lane.b32.xlu0 %v3353_v7, %s4390_s29  ;;  %v3358_v14 = vpack.i.bf16 %v4508_v9, %v4505_v8  ;;  %v189_v15 = vld [vmem:[%s4483_s28 + $0x21] sm:$0xff]  ;;  %v190_v16 = vld [vmem:[%s4483_s28 + $0x31] sm:$0xff] }
  0x1f   : > { %v187_v17 = vld [vmem:[%s4483_s28 + $0x1] sm:$0xff]  ;;  %v188_v18 = vld [vmem:[%s4483_s28 + $0x11] sm:$0xff]  ;;  %v3378_v23 = vpack.i.bf16 %v190_v16, %v189_v15 }
  0x20   : > { %v193_v19 = vld [vmem:[%s4483_s28 + $0x61] sm:$0xff]  ;;  %v4528_v20 = vld [vmem:[%s4483_s28 + $0xd1] sm:$0xff]  ;;  %v3373_v28 = vpack.i.bf16 %v188_v18, %v187_v17 }
  0x21   : > { %v4531_v21 = vld [vmem:[%s4483_s28 + $0xe1] sm:$0xff]  ;;  %3369 = vrot.lane.b32.xlu1 %v3368_v11, %s4390_s29  ;;  %v4538_v24 = vld [vmem:[%s4483_s28 + $0x111] sm:$0xff] }
  0x22   : > { %v4534_v22 = vld [vmem:[%s4483_s28 + $0xc1] sm:$0xff]  ;;  %v4541_v25 = vld [vmem:[%s4483_s28 + $0xf1] sm:$0xff]  ;;  %3359 = vrot.lane.b32.xlu0 %v3358_v14, %s4390_s29  ;;  %v3398_v55 = vpack.i.bf16 %v4531_v21, %v4528_v20 }
  0x23   : > { %v4544_v26 = vld [vmem:[%s4483_s28 + $0x101] sm:$0xff]  ;;  %v194_v29 = vld [vmem:[%s4483_s28 + $0x71] sm:$0xff] }
  0x24   : > { %v191_v30 = vld [vmem:[%s4483_s28 + $0x41] sm:$0xff]  ;;  %v192_v31 = vld [vmem:[%s4483_s28 + $0x51] sm:$0xff]  ;;  %v3388_v41 = vpack.i.bf16 %v194_v29, %v193_v19  ;;  %v3403_v3 = vpack.i.bf16 %v4544_v26, %v4541_v25 }
  0x25   : > { %v4557_v34 = vld [vmem:[%s4483_s28 + $0x22] sm:$0xff]  ;;  %v4560_v35 = vld [vmem:[%s4483_s28 + $0x32] sm:$0xff]  ;;  %3379 = vrot.lane.b32.xlu1 %v3378_v23, %s4391_s30  ;;  %v3383_v46 = vpack.i.bf16 %v192_v31, %v191_v30 }
  0x26   : > { %v4563_v36 = vld [vmem:[%s4483_s28 + $0x12] sm:$0xff]  ;;  %v4566_v37 = vld [vmem:[%s4483_s28 + $0x62] sm:$0xff]  ;;  %3374 = vrot.lane.b32.xlu0 %v3373_v28, %s4391_s30  ;;  %v3418_v16 = vpack.i.bf16 %v4560_v35, %v4557_v34 }
  0x27   : > { %v4569_v38 = vld [vmem:[%s4483_s28 + $0x42] sm:$0xff]  ;;  %v4572_v39 = vld [vmem:[%s4483_s28 + $0x52] sm:$0xff] }
  0x28   : > { %v4578_v42 = vld [vmem:[%s4483_s28 + $0xd2] sm:$0xff]  ;;  %v4581_v43 = vld [vmem:[%s4483_s28 + $0xc2] sm:$0xff] }
  0x29   : > { %v4589_v47 = vld [vmem:[%s4483_s28 + $0xe2] sm:$0xff]  ;;  %v4592_v48 = vld [vmem:[%s4483_s28 + $0xf2] sm:$0xff]  ;;  %3389 = vrot.lane.b32.xlu1 %v3388_v41, %s4391_s30 }
  0x2a   : > { %v2875_v50 = vld [vmem:[%s4483_s28 + $0xb1] sm:$0xff]  ;;  %v4601_v52 = vld [vmem:[%s4483_s28 + $0x102] sm:$0xff]  ;;  %3384 = vrot.lane.b32.xlu0 %v3383_v46, %s4391_s30  ;;  %v3423_v46 = vpack.i.bf16 %v4572_v39, %v4569_v38 }
  0x2b   : > { %v4598_v51 = vld [vmem:[%s4483_s28 + $0x112] sm:$0xff]  ;;  %v3393_v56 = vpack.i.bf16 %v4534_v22, %v2875_v50  ;;  %v4613_v57 = vld [vmem:[%s4483_s28 + $0x121] sm:$0xff]  ;;  %v3443_v15 = vpack.i.bf16 %v4601_v52, %v4592_v48 }
  0x2c   : > { %v4616_v58 = vld [vmem:[%s4483_s28 + $0x23] sm:$0xff]  ;;  %v4619_v59 = vld [vmem:[%s4483_s28 + $0x33] sm:$0xff]  ;;  %v3408_v2 = vpack.i.bf16 %v4613_v57, %v4538_v24 }
  0x2d   : > { %v4622_v60 = vld [vmem:[%s4483_s28 + $0x13] sm:$0xff]  ;;  %v4625_v61 = vld [vmem:[%s4483_s28 + $0x43] sm:$0xff]  ;;  %3399 = vrot.lane.b32.xlu1 %v3398_v55, %s4392_s4 }
  0x2e   : > { %3394 = vrot.lane.b32.xlu0 %v3393_v56, %s4392_s4  ;;  %v203_v7 = vld [vmem:[%s4483_s28 + $0x2] sm:$0xff]  ;;  %v4642_v14 = vld [vmem:[%s4483_s28 + $0x53] sm:$0xff] }
  0x2f   : > { %v4639_v11 = vld [vmem:[%s4483_s28 + $0x63] sm:$0xff]  ;;  %v3413_v17 = vpack.i.bf16 %v4563_v36, %v203_v7  ;;  %v4652_v18 = vld [vmem:[%s4483_s28 + $0x72] sm:$0xff] }
  0x30   : > { %v4655_v19 = vld [vmem:[%s4483_s28 + $0x180] sm:$0xff]  ;;  %v4658_v23 = vld [vmem:[%s4483_s28 + $0x190] sm:$0xff]  ;;  %v3428_v41 = vpack.i.bf16 %v4652_v18, %v4566_v37 }
  0x31   : > { %3409 = vrot.lane.b32.xlu1 %v3408_v2, %s4392_s4  ;;  %6796 = vst [vmem:[#allocation7_spill] sm:$0xff] %v4655_v19  ;;  %6797 = vst [vmem:[#allocation8_spill] sm:$0xff] %v4658_v23  ;;  %v4661_v28 = vld [vmem:[%s4483_s28 + $0x170] sm:$0xff]  ;;  %v4664_v29 = vld [vmem:[%s4483_s28 + $0x1a0] sm:$0xff] }
  0x32   : > { %3404 = vrot.lane.b32.xlu0 %v3403_v3, %s4392_s4  ;;  %6798 = vst [vmem:[#allocation9_spill] sm:$0xff] %v4661_v28  ;;  %v2883_v50 = vld [vmem:[%s4483_s28 + $0xb2] sm:$0xff]  ;;  %v4678_v55 = vld [vmem:[%s4483_s28 + $0x1c0] sm:$0xff]  ;;  %v3438_v3 = vpack.i.bf16 %v4589_v47, %v4578_v42 }
  0x33   : > { %6799 = vst [vmem:[#allocation10_spill] sm:$0xff] %v4678_v55  ;;  %v4681_v56 = vld [vmem:[%s4483_s28 + $0x1b0] sm:$0xff]  ;;  %v3433_v7 = vpack.i.bf16 %v4581_v43, %v2883_v50  ;;  %v4697_v31 = vld [vmem:[%s4483_s28 + $0x240] sm:$0xff] }
  0x34   : > { %6800 = vst [vmem:[#allocation11_spill] sm:$0xff] %v4681_v56  ;;  %6802 = vst [vmem:[#allocation13_spill] sm:$0xff] %v4697_v31  ;;  %v4700_v2 = vld [vmem:[%s4483_s28 + $0x220] sm:$0xff]  ;;  %v4717_v62 = vld [vmem:[%s4483_s28 + $0x270] sm:$0xff]  ;;  %v3483_v12 = vpack.i.bf16 %v4681_v56, %v4664_v29 }
  0x35   : > { %3419 = vrot.lane.b32.xlu1 %v3418_v16, %s4393_s5  ;;  %v4691_v16 = vld [vmem:[%s4483_s28 + $0x122] sm:$0xff]  ;;  %6803 = vst [vmem:[#allocation14_spill] sm:$0xff] %v4700_v2  ;;  %6805 = vst [vmem:[#allocation16_spill] sm:$0xff] %v4717_v62  ;;  %v4728_v54 = vld [vmem:[%s4483_s28 + $0x73] sm:$0xff] }
  0x36   : > { %3414 = vrot.lane.b32.xlu0 %v3413_v17, %s4393_s5  ;;  %v4694_v17 = vld [vmem:[%s4483_s28 + $0x230] sm:$0xff]  ;;  %v3448_v50 = vpack.i.bf16 %v4691_v16, %v4598_v51  ;;  %v219_v63 = vld [vmem:[%s4483_s28 + $0x3] sm:$0xff] }
  0x37   : > { %6801 = vst [vmem:[#allocation12_spill] sm:$0xff] %v4694_v17  ;;  %v4720_v30 = vld [vmem:[%s4483_s28 + $0x260] sm:$0xff]  ;;  %v4734_v49 = vld [vmem:[%s4483_s28 + $0x191] sm:$0xff]  ;;  %v3453_v53 = vpack.i.bf16 %v4622_v60, %v219_v63  ;;  %v3468_v63 = vpack.i.bf16 %v4728_v54, %v4639_v11 }
  0x38   : > { %6806 = vst [vmem:[#allocation17_spill] sm:$0xff] %v4720_v30  ;;  %6808 = vst [vmem:[#allocation19_spill] sm:$0xff] %v4734_v49  ;;  %v4739_v45 = vld [vmem:[%s4483_s28 + $0x171] sm:$0xff]  ;;  %v2891_v44 = vld [vmem:[%s4483_s28 + $0x160] sm:$0xff] }
  0x39   : > { %3429 = vrot.lane.b32.xlu1 %v3428_v41, %s4393_s5  ;;  %v4703_v41 = vld [vmem:[%s4483_s28 + $0x250] sm:$0xff]  ;;  %6809 = vst [vmem:[#allocation20_spill] sm:$0xff] %v4739_v45  ;;  %v4775_v10 = vld [vmem:[%s4483_s28 + $0x241] sm:$0xff] }
  0x3a   : > { %3424 = vrot.lane.b32.xlu0 %v3423_v46, %s4393_s5  ;;  %6804 = vst [vmem:[#allocation15_spill] sm:$0xff] %v4703_v41  ;;  %v4742_v46 = vld [vmem:[%s4483_s28 + $0x1a1] sm:$0xff]  ;;  %v4759_v33 = vld [vmem:[%s4483_s28 + $0x1b1] sm:$0xff] }
  0x3b   : > { %6810 = vst [vmem:[#allocation21_spill] sm:$0xff] %v4742_v46  ;;  %6812 = vst [vmem:[#allocation23_spill] sm:$0xff] %v4759_v33  ;;  %v4769_v27 = vld [vmem:[%s4483_s28 + $0x1d0] sm:$0xff]  ;;  %v4778_v13 = vld [vmem:[%s4483_s28 + $0x221] sm:$0xff] }
  0x3c   : > { %6813 = vst [vmem:[#allocation24_spill] sm:$0xff] %v4769_v27  ;;  %v4772_v32 = vld [vmem:[%s4483_s28 + $0x231] sm:$0xff]  ;;  %v4808_v56 = vld [vmem:[%s4483_s28 + $0x280] sm:$0xff] }
  0x3d   : > { %3439 = vrot.lane.b32.xlu1 %v3438_v3, %s4394_s6  ;;  %v3458_v3 = vpack.i.bf16 %v4619_v59, %v4616_v58  ;;  %v4781_v40 = vld [vmem:[%s4483_s28 + $0x251] sm:$0xff]  ;;  %6814 = vst [vmem:[#allocation25_spill] sm:$0xff] %v4808_v56 }
  0x3e   : > { %3434 = vrot.lane.b32.xlu0 %v3433_v7, %s4394_s6  ;;  %v4731_v7 = vld [vmem:[%s4483_s28 + $0x181] sm:$0xff] }
  0x3f   : > { %6807 = vst [vmem:[#allocation18_spill] sm:$0xff] %v4731_v7 }
  0x41   : > { %3449 = vrot.lane.b32.xlu1 %v3448_v50, %s4394_s6  ;;  %v4756_v50 = vld [vmem:[%s4483_s28 + $0x1c1] sm:$0xff] }
  0x42   : > { %3444 = vrot.lane.b32.xlu0 %v3443_v15, %s4394_s6  ;;  %v3463_v15 = vpack.i.bf16 %v4642_v14, %v4625_v61  ;;  %6811 = vst [vmem:[#allocation22_spill] sm:$0xff] %v4756_v50 }
  0x45   : > { %3459 = vrot.lane.b32.xlu1 %v3458_v3, %s4395_s7  ;;  %v3478_v3 = vpack.i.bf16 %v4658_v23, %v4655_v19  ;;  %v4798_v19 = vld [vmem:[%s4483_s28 + $0x261] sm:$0xff]  ;;  %v4817_v23 = vld [vmem:[%s4483_s28 + $0x172] sm:$0xff] }
  0x46   : > { %3454 = vrot.lane.b32.xlu0 %v3453_v53, %s4395_s7  ;;  %v3473_v53 = vpack.i.bf16 %v4661_v28, %v2891_v44  ;;  %v3488_v44 = vpack.i.bf16 %v4769_v27, %v4678_v55  ;;  %v2899_v28 = vld [vmem:[%s4483_s28 + $0x210] sm:$0xff]  ;;  %v4811_v55 = vld [vmem:[%s4483_s28 + $0x182] sm:$0xff]  ;;  %6816 = vst [vmem:[#allocation27_spill] sm:$0xff] %v4817_v23 }
  0x47   : > { %6815 = vst [vmem:[#allocation26_spill] sm:$0xff] %v4811_v55  ;;  %v4814_v27 = vld [vmem:[%s4483_s28 + $0x192] sm:$0xff] }
  0x49   : > { %3469 = vrot.lane.b32.xlu1 %v3468_v63, %s4395_s7  ;;  %v4795_v63 = vld [vmem:[%s4483_s28 + $0x271] sm:$0xff] }
  0x4a   : > { %3464 = vrot.lane.b32.xlu0 %v3463_v15, %s4395_s7  ;;  %v4820_v15 = vld [vmem:[%s4483_s28 + $0x1a2] sm:$0xff] }
  0x4d   : > { %3479 = vrot.lane.b32.xlu1 %v3478_v3, %s4396_s8  ;;  %v3498_v3 = vpack.i.bf16 %v4697_v31, %v4694_v17  ;;  %v2907_v17 = vld [vmem:[%s4483_s28 + $0x161] sm:$0xff]  ;;  %v4837_v31 = vld [vmem:[%s4483_s28 + $0x1b2] sm:$0xff] }
  0x4e   : > { %3474 = vrot.lane.b32.xlu0 %v3473_v53, %s4396_s8  ;;  %v3493_v53 = vpack.i.bf16 %v4700_v2, %v2899_v28  ;;  %v3508_v28 = vpack.i.bf16 %v4808_v56, %v4717_v62  ;;  %v3503_v2 = vpack.i.bf16 %v4720_v30, %v4703_v41  ;;  %6818 = vst [vmem:[#allocation29_spill] sm:$0xff] %v4837_v31  ;;  %v4847_v30 = vld [vmem:[%s4483_s28 + $0x1d1] sm:$0xff]  ;;  %v4853_v56 = vld [vmem:[%s4483_s28 + $0x242] sm:$0xff] }
  0x4f   : > { %6819 = vst [vmem:[#allocation30_spill] sm:$0xff] %v4847_v30  ;;  %v4850_v62 = vld [vmem:[%s4483_s28 + $0x232] sm:$0xff]  ;;  %6821 = vst [vmem:[#allocation32_spill] sm:$0xff] %v4853_v56  ;;  %v4856_v41 = vld [vmem:[%s4483_s28 + $0x222] sm:$0xff] }
  0x50   : > { %6820 = vst [vmem:[#allocation31_spill] sm:$0xff] %v4850_v62  ;;  %6822 = vst [vmem:[#allocation33_spill] sm:$0xff] %v4856_v41 }
  0x51   : > { %3489 = vrot.lane.b32.xlu1 %v3488_v44, %s4396_s8  ;;  %v4834_v44 = vld [vmem:[%s4483_s28 + $0x1c2] sm:$0xff] }
  0x52   : > { %3484 = vrot.lane.b32.xlu0 %v3483_v12, %s4396_s8  ;;  %6817 = vst [vmem:[#allocation28_spill] sm:$0xff] %v4834_v44  ;;  %v4859_v12 = vld [vmem:[%s4483_s28 + $0x252] sm:$0xff] }
  0x53   : > { %6823 = vst [vmem:[#allocation34_spill] sm:$0xff] %v4859_v12 }
  0x55   : > { %3499 = vrot.lane.b32.xlu1 %v3498_v3, %s4397_s9  ;;  %v3518_v3 = vpack.i.bf16 %v4734_v49, %v4731_v7  ;;  %v2915_v7 = vld [vmem:[%s4483_s28 + $0x211] sm:$0xff] }
  0x56   : > { %3494 = vrot.lane.b32.xlu0 %v3493_v53, %s4397_s9  ;;  %v3513_v53 = vpack.i.bf16 %v4739_v45, %v2907_v17  ;;  %v3528_v17 = vpack.i.bf16 %v4847_v30, %v4756_v50  ;;  %v3523_v45 = vpack.i.bf16 %v4759_v33, %v4742_v46  ;;  %v4873_v49 = vld [vmem:[%s4483_s28 + $0x272] sm:$0xff]  ;;  %v4886_v33 = vld [vmem:[%s4483_s28 + $0x281] sm:$0xff] }
  0x57   : > { %6824 = vst [vmem:[#allocation35_spill] sm:$0xff] %v4873_v49  ;;  %v4889_v50 = vld [vmem:[%s4483_s28 + $0x183] sm:$0xff]  ;;  %v4892_v30 = vld [vmem:[%s4483_s28 + $0x173] sm:$0xff] }
  0x58   : > { %6826 = vst [vmem:[#allocation37_spill] sm:$0xff] %v4889_v50  ;;  %6827 = vst [vmem:[#allocation38_spill] sm:$0xff] %v4892_v30 }
  0x59   : > { %3509 = vrot.lane.b32.xlu1 %v3508_v28, %s4397_s9  ;;  %v4876_v28 = vld [vmem:[%s4483_s28 + $0x262] sm:$0xff] }
  0x5a   : > { %3504 = vrot.lane.b32.xlu0 %v3503_v2, %s4397_s9  ;;  %6825 = vst [vmem:[#allocation36_spill] sm:$0xff] %v4876_v28  ;;  %v3558_v2 = vpack.i.bf16 %v4814_v27, %v4811_v55  ;;  %v2931_v55 = vld [vmem:[%s4483_s28 + $0x212] sm:$0xff] }
  0x5d   : > { %3519 = vrot.lane.b32.xlu1 %v3518_v3, %s4398_s10  ;;  %v3538_v3 = vpack.i.bf16 %v4775_v10, %v4772_v32 }
  0x5e   : > { %3514 = vrot.lane.b32.xlu0 %v3513_v53, %s4398_s10  ;;  %v3533_v53 = vpack.i.bf16 %v4778_v13, %v2915_v7  ;;  %v2923_v7 = vld [vmem:[%s4483_s28 + $0x162] sm:$0xff] }
  0x5f   : > { %v3553_v46 = vpack.i.bf16 %v4817_v23, %v2923_v7  ;;  %v4924_v7 = vld [vmem:[%s4483_s28 + $0x282] sm:$0xff] }
  0x60   : > { %6828 = vst [vmem:[#allocation39_spill] sm:$0xff] %v4924_v7  ;;  %v2952_v23 = vld [vmem:[%s4483_s28 + $0x60] sm:$0xff] }
  0x61   : > { %3529 = vrot.lane.b32.xlu1 %v3528_v17, %s4398_s10  ;;  %v3548_v17 = vpack.i.bf16 %v4886_v33, %v4795_v63 }
  0x62   : > { %3524 = vrot.lane.b32.xlu0 %v3523_v45, %s4398_s10  ;;  %v3543_v45 = vpack.i.bf16 %v4798_v19, %v4781_v40 }
  0x65   : > { %3539 = vrot.lane.b32.xlu1 %v3538_v3, %s4399_s11  ;;  %v4909_v3 = vld [vmem:[%s4483_s28 + $0x1d2] sm:$0xff] }
  0x66   : > { %3534 = vrot.lane.b32.xlu0 %v3533_v53, %s4399_s11  ;;  %v3568_v53 = vpack.i.bf16 %v4909_v3, %v4834_v44  ;;  %v2951_v44 = vld [vmem:[%s4483_s28 + $0x50] sm:$0xff] }
  0x69   : > { %3549 = vrot.lane.b32.xlu1 %v3548_v17, %s4399_s11  ;;  %v3563_v17 = vpack.i.bf16 %v4837_v31, %v4820_v15  ;;  %v2954_v31 = vld [vmem:[%s4483_s28 + $0x80] sm:$0xff] }
  0x6a   : > { %3544 = vrot.lane.b32.xlu0 %v3543_v45, %s4399_s11  ;;  %v3578_v45 = vpack.i.bf16 %v4853_v56, %v4850_v62  ;;  %v2942_v62 = vld [vmem:[%s4483_s28 + $0x193] sm:$0xff]  ;;  %v2948_v56 = vld [vmem:[%s4483_s28 + $0x20] sm:$0xff] }
  0x6d   : > { %3559 = vrot.lane.b32.xlu1 %v3558_v2, %s4400_s17  ;;  %v3573_v2 = vpack.i.bf16 %v4856_v41, %v2931_v55  ;;  %v3598_v55 = vpack.i.bf16 %v2942_v62, %v4889_v50  ;;  %v2946_v41 = vld [vmem:[%s4483_s28 + $0x1d3] sm:$0xff]  ;;  %v2950_v50 = vld [vmem:[%s4483_s28 + $0x40] sm:$0xff] }
  0x6e   : > { %3554 = vrot.lane.b32.xlu0 %v3553_v46, %s4400_s17  ;;  %v3588_v46 = vpack.i.bf16 %v4924_v7, %v4873_v49  ;;  %v2945_v49 = vld [vmem:[%s4483_s28 + $0x1c3] sm:$0xff]  ;;  %v2949_v62 = vld [vmem:[%s4483_s28 + $0x30] sm:$0xff] }
  0x6f   : > { %v3608_v7 = vpack.i.bf16 %v2946_v41, %v2945_v49  ;;  %v3623_v41 = vpack.i.bf16 %v2952_v23, %v2951_v44  ;;  %v6833_v44 = vpack.i.bf16 %v4498_v5, %v4489_v1 }
  0x71   : > { %3569 = vrot.lane.b32.xlu1 %v3568_v53, %s4400_s17  ;;  %v3583_v53 = vpack.i.bf16 %v4876_v28, %v4859_v12  ;;  %v2944_v28 = vld [vmem:[%s4483_s28 + $0x1b3] sm:$0xff] }
  0x72   : > { %3564 = vrot.lane.b32.xlu0 %v3563_v17, %s4400_s17  ;;  %v2939_v17 = vld [vmem:[%s4483_s28 + $0x163] sm:$0xff]  ;;  %v2953_v12 = vld [vmem:[%s4483_s28 + $0x70] sm:$0xff] }
  0x73   : > { %v3628_v49 = vpack.i.bf16 %v2954_v31, %v2953_v12  ;;  %v6830_v31 = vpack.i.bf16 %v4505_v8, %v4495_v4  ;;  %v6836_v4 = vpack.i.bf16 %v4541_v25, %v4531_v21  ;;  %v6837_v12 = vpack.i.bf16 %v4528_v20, %v4534_v22  ;;  %v2986_v21 = vld [vmem:[%s4483_s28 + $0x82] sm:$0xff] }
  0x74   : > { %v6843_v20 = vpack.i.bf16 %v4569_v38, %v4560_v35  ;;  %v3688_v22 = vpack.i.bf16 %v2986_v21, %v4652_v18  ;;  %v5024_v35 = vld [vmem:[%s4483_s28 + $0x132] sm:$0xff] }
  0x75   : > { %3579 = vrot.lane.b32.xlu1 %v3578_v45, %s4401_s19  ;;  %v3593_v45 = vpack.i.bf16 %v4892_v30, %v2939_v17  ;;  %v3618_v17 = vpack.i.bf16 %v2950_v50, %v2949_v62  ;;  %v2962_v50 = vld [vmem:[%s4483_s28 + $0x130] sm:$0xff]  ;;  %v6858_v62 = vpack.i.bf16 %v4616_v58, %v4622_v60 }
  0x76   : > { %3574 = vrot.lane.b32.xlu0 %v3573_v2, %s4401_s19  ;;  %v2943_v2 = vld [vmem:[%s4483_s28 + $0x1a3] sm:$0xff]  ;;  %v6864_v58 = vld [vmem:[#allocation8_spill] sm:$0xff]  ;;  %v6880_v21 = vld [vmem:[#allocation25_spill] sm:$0xff] }
  0x77   : > { %v6865_v60 = vpack.i.bf16 %v4664_v29, %v6864_v58  ;;  %v6891_v58 = vld [vmem:[#allocation21_spill] sm:$0xff] }
  0x79   : > { %3589 = vrot.lane.b32.xlu1 %v3588_v46, %s4401_s19  ;;  %v3603_v46 = vpack.i.bf16 %v2944_v28, %v2943_v2  ;;  %v3648_v28 = vpack.i.bf16 %v2962_v50, %v4501_v6  ;;  %v6851_v2 = vpack.i.bf16 %v4578_v42, %v4581_v43  ;;  %v6857_v42 = vpack.i.bf16 %v4625_v61, %v4619_v59  ;;  %v5076_v61 = vld [vmem:[%s4483_s28 + $0x1e0] sm:$0xff]  ;;  %v6868_v50 = vld [vmem:[#allocation9_spill] sm:$0xff] }
  0x7a   : > { %3584 = vrot.lane.b32.xlu0 %v3583_v53, %s4401_s19  ;;  %v2947_v53 = vld [vmem:[%s4483_s28 + $0x10] sm:$0xff]  ;;  %v6861_v59 = vpack.i.bf16 %v4639_v11, %v4642_v14 }
  0x7b   : > { %v3613_v30 = vpack.i.bf16 %v2948_v56, %v2947_v53  ;;  %v6829_v56 = vpack.i.bf16 %v4486_v0, %v4508_v9  ;;  %v2978_v0 = vld [vmem:[%s4483_s28 + $0x131] sm:$0xff] }
  0x7c   : > { %v3668_v8 = vpack.i.bf16 %v2978_v0, %v4613_v57 }
  0x7d   : > { %3599 = vrot.lane.b32.xlu1 %v3598_v55, %s4402_s20  ;;  %v6844_v55 = vpack.i.bf16 %v4557_v34, %v4563_v36  ;;  %v6850_v34 = vpack.i.bf16 %v4592_v48, %v4589_v47  ;;  %v3708_v36 = vpack.i.bf16 %v5024_v35, %v4691_v16  ;;  %v6854_v47 = vpack.i.bf16 %v4598_v51, %v4601_v52  ;;  %v5050_v48 = vld [vmem:[%s4483_s28 + $0x83] sm:$0xff] }
  0x7e   : > { %3594 = vrot.lane.b32.xlu0 %v3593_v45, %s4402_s20  ;;  %v6847_v45 = vpack.i.bf16 %v4566_v37, %v4572_v39  ;;  %v3728_v43 = vpack.i.bf16 %v5050_v48, %v4728_v54 }
  0x81   : > { %3609 = vrot.lane.b32.xlu1 %v3608_v7, %s4402_s20  ;;  %v6840_v7 = vpack.i.bf16 %v4538_v24, %v4544_v26 }
  0x82   : > { %3604 = vrot.lane.b32.xlu0 %v3603_v46, %s4402_s20 }
  0x85   : > { %3619 = vrot.lane.b32.xlu1 %v3618_v17, %s4403_s24  ;;  %v6866_v17 = vld [vmem:[#allocation24_spill] sm:$0xff] }
  0x86   : > { %3614 = vrot.lane.b32.xlu0 %v3613_v30, %s4403_s24 }
  0x89   : > { %3629 = vrot.lane.b32.xlu1 %v3628_v49, %s4403_s24  ;;  %v3748_v49 = vpack.i.bf16 %v5076_v61, %v6866_v17 }
  0x8a   : > { %3624 = vrot.lane.b32.xlu0 %v3623_v41, %s4403_s24  ;;  %v6867_v41 = vld [vmem:[#allocation7_spill] sm:$0xff] }
  0x8d   : > { %3639 = vrot.lane.b32.xlu1 %v6829_v56, %s4404_s25  ;;  %v6869_v56 = vpack.i.bf16 %v6867_v41, %v6868_v50  ;;  %v6895_v50 = vld [vmem:[#allocation18_spill] sm:$0xff] }
  0x8e   : > { %3634 = vrot.lane.b32.xlu0 %v6830_v31, %s4404_s25  ;;  %v6873_v31 = vld [vmem:[#allocation11_spill] sm:$0xff] }
  0x8f   : > { %v4968_v23 = vpop.permute.xlu1 %3364 }
  0x90   : > { %6831 = vst [vmem:[#allocation40_spill] sm:$0xff] %v4968_v23  ;;  %v4970_v30 = vpop.permute.xlu0 %3354  ;;  %v5569_v23 = vld [vmem:[%s4483_s28 + $0x51] sm:$0xff] }
  0x91   : > { %6832 = vst [vmem:[#allocation41_spill] sm:$0xff] %v4970_v30  ;;  %3649 = vrot.lane.b32.xlu1 %v3648_v28, %s4404_s25  ;;  %v6872_v28 = vld [vmem:[#allocation10_spill] sm:$0xff] }
  0x92   : > { %3644 = vrot.lane.b32.xlu0 %v6833_v44, %s4404_s25  ;;  %v6874_v29 = vpack.i.bf16 %v6872_v28, %v6873_v31  ;;  %v5102_v44 = vld [vmem:[%s4483_s28 + $0x290] sm:$0xff] }
  0x93   : > { %v4978_v9 = vpop.permute.xlu1 %3369 }
  0x94   : > { %6834 = vst [vmem:[#allocation42_spill] sm:$0xff] %v4978_v9  ;;  %v4980_v6 = vpop.permute.xlu0 %3359 }
  0x95   : > { %6835 = vst [vmem:[#allocation43_spill] sm:$0xff] %v4980_v6  ;;  %3659 = vrot.lane.b32.xlu1 %v6836_v4, %s4390_s29 }
  0x96   : > { %3654 = vrot.lane.b32.xlu0 %v6837_v12, %s4390_s29  ;;  %v6878_v12 = vld [vmem:[#allocation13_spill] sm:$0xff] }
  0x97   : > { %v4991_v1 = vpop.permute.xlu1 %3379 }
  0x98   : > { %6838 = vst [vmem:[#allocation44_spill] sm:$0xff] %v4991_v1  ;;  %v4993_v5 = vpop.permute.xlu0 %3374  ;;  %v2963_v1 = vld [vmem:[%s4483_s28 + $0x11] sm:$0xff] }
  0x99   : > { %6839 = vst [vmem:[#allocation45_spill] sm:$0xff] %v4993_v5  ;;  %3669 = vrot.lane.b32.xlu1 %v3668_v8, %s4390_s29  ;;  %v6877_v8 = vld [vmem:[#allocation15_spill] sm:$0xff] }
  0x9a   : > { %3664 = vrot.lane.b32.xlu0 %v6840_v7, %s4390_s29  ;;  %v6879_v7 = vpack.i.bf16 %v6877_v8, %v6878_v12  ;;  %v6900_v8 = vld [vmem:[#allocation22_spill] sm:$0xff]  ;;  %v6901_v12 = vld [vmem:[#allocation23_spill] sm:$0xff] }
  0x9b   : > { %v5001_v25 = vpop.permute.xlu1 %3389 }
  0x9c   : > { %6841 = vst [vmem:[#allocation46_spill] sm:$0xff] %v5001_v25  ;;  %v5003_v57 = vpop.permute.xlu0 %3384  ;;  %v5543_v25 = vld [vmem:[%s4483_s28 + $0x61] sm:$0xff] }
  0x9d   : > { %6842 = vst [vmem:[#allocation47_spill] sm:$0xff] %v5003_v57  ;;  %3679 = vrot.lane.b32.xlu1 %v6843_v20, %s4391_s30  ;;  %v3768_v20 = vpack.i.bf16 %v5102_v44, %v6880_v21  ;;  %v5154_v21 = vld [vmem:[%s4483_s28 + $0x291] sm:$0xff]  ;;  %6960 = vst [vmem:[#allocation71_spill] sm:$0xff] %v5543_v25 }
  0x9e   : > { %3674 = vrot.lane.b32.xlu0 %v6844_v55, %s4391_s30  ;;  %v6882_v55 = vld [vmem:[#allocation14_spill] sm:$0xff] }
  0x9f   : > { %v5014_v24 = vpop.permute.xlu1 %3399 }
  0xa0   : > { %6845 = vst [vmem:[#allocation48_spill] sm:$0xff] %v5014_v24  ;;  %v5016_v26 = vpop.permute.xlu0 %3394  ;;  %v5538_v24 = vld [vmem:[%s4483_s28 + $0x21] sm:$0xff] }
  0xa1   : > { %6846 = vst [vmem:[#allocation49_spill] sm:$0xff] %v5016_v26  ;;  %3689 = vrot.lane.b32.xlu1 %v3688_v22, %s4391_s30  ;;  %v6881_v22 = vld [vmem:[#allocation12_spill] sm:$0xff]  ;;  %6959 = vst [vmem:[#allocation70_spill] sm:$0xff] %v5538_v24 }
  0xa2   : > { %3684 = vrot.lane.b32.xlu0 %v6847_v45, %s4391_s30  ;;  %v6883_v45 = vpack.i.bf16 %v6881_v22, %v6882_v55  ;;  %v6905_v55 = vpack.i.bf16 %v4781_v40, %v4775_v10  ;;  %v6909_v10 = vpack.i.bf16 %v4795_v63, %v4798_v19  ;;  %v5180_v40 = vld [vmem:[%s4483_s28 + $0x1e2] sm:$0xff] }
  0xa3   : > { %v5026_v38 = vpop.permute.xlu1 %3409  ;;  %v6914_v19 = vld [vmem:[#allocation27_spill] sm:$0xff] }
  0xa4   : > { %6848 = vst [vmem:[#allocation50_spill] sm:$0xff] %v5026_v38  ;;  %v5028_v18 = vpop.permute.xlu0 %3404 }
  0xa5   : > { %6849 = vst [vmem:[#allocation51_spill] sm:$0xff] %v5028_v18  ;;  %3699 = vrot.lane.b32.xlu1 %v6850_v34, %s4392_s4  ;;  %v5512_v18 = vld [vmem:[%s4483_s28 + $0x71] sm:$0xff] }
  0xa6   : > { %3694 = vrot.lane.b32.xlu0 %v6851_v2, %s4392_s4  ;;  %v6886_v2 = vld [vmem:[#allocation16_spill] sm:$0xff] }
  0xa7   : > { %v5040_v37 = vpop.permute.xlu1 %3419 }
  0xa8   : > { %6852 = vst [vmem:[#allocation52_spill] sm:$0xff] %v5040_v37  ;;  %v5042_v39 = vpop.permute.xlu0 %3414 }
  0xa9   : > { %6853 = vst [vmem:[#allocation53_spill] sm:$0xff] %v5042_v39  ;;  %3709 = vrot.lane.b32.xlu1 %v3708_v36, %s4392_s4 }
  0xaa   : > { %3704 = vrot.lane.b32.xlu0 %v6854_v47, %s4392_s4  ;;  %v6887_v47 = vld [vmem:[#allocation17_spill] sm:$0xff] }
  0xab   : > { %v5052_v16 = vpop.permute.xlu1 %3429 }
  0xac   : > { %6855 = vst [vmem:[#allocation54_spill] sm:$0xff] %v5052_v16  ;;  %v5054_v46 = vpop.permute.xlu0 %3424  ;;  %v5498_v16 = vld [vmem:[%s4483_s28 + $0x100] sm:$0xff] }
  0xad   : > { %6856 = vst [vmem:[#allocation55_spill] sm:$0xff] %v5054_v46  ;;  %3719 = vrot.lane.b32.xlu1 %v6857_v42, %s4393_s5  ;;  %v6888_v42 = vpack.i.bf16 %v6886_v2, %v6887_v47  ;;  %v6906_v2 = vpack.i.bf16 %v4772_v32, %v4778_v13  ;;  %v6912_v32 = vpack.i.bf16 %v4820_v15, %v4814_v27  ;;  %v5206_v15 = vld [vmem:[%s4483_s28 + $0x292] sm:$0xff] }
  0xae   : > { %3714 = vrot.lane.b32.xlu0 %v6858_v62, %s4393_s5  ;;  %v5495_v46 = vld [vmem:[%s4483_s28 + $0x150] sm:$0xff] }
  0xaf   : > { %v5066_v51 = vpop.permute.xlu1 %3439 }
  0xb0   : > { %6859 = vst [vmem:[#allocation56_spill] sm:$0xff] %v5066_v51  ;;  %v5068_v52 = vpop.permute.xlu0 %3434  ;;  %v5492_v51 = vld [vmem:[%s4483_s28 + $0x140] sm:$0xff] }
  0xb1   : > { %6860 = vst [vmem:[#allocation57_spill] sm:$0xff] %v5068_v52  ;;  %3729 = vrot.lane.b32.xlu1 %v3728_v43, %s4393_s5  ;;  %v5128_v43 = vld [vmem:[%s4483_s28 + $0x1e1] sm:$0xff]  ;;  %v5523_v52 = vld [vmem:[%s4483_s28 + $0x31] sm:$0xff] }
  0xb2   : > { %3724 = vrot.lane.b32.xlu0 %v6861_v59, %s4393_s5  ;;  %6957 = vst [vmem:[#allocation68_spill] sm:$0xff] %v5523_v52 }
  0xb3   : > { %v5078_v54 = vpop.permute.xlu1 %3449 }
  0xb4   : > { %6862 = vst [vmem:[#allocation58_spill] sm:$0xff] %v5078_v54  ;;  %v5080_v53 = vpop.permute.xlu0 %3444  ;;  %v5526_v54 = vld [vmem:[%s4483_s28 + $0x41] sm:$0xff] }
  0xb5   : > { %6863 = vst [vmem:[#allocation59_spill] sm:$0xff] %v5080_v53  ;;  %3739 = vrot.lane.b32.xlu1 %v6865_v60, %s4394_s6  ;;  %v6892_v60 = vld [vmem:[#allocation19_spill] sm:$0xff]  ;;  %6958 = vst [vmem:[#allocation69_spill] sm:$0xff] %v5526_v54 }
  0xb6   : > { %3734 = vrot.lane.b32.xlu0 %v6869_v56, %s4394_s6  ;;  %v6893_v17 = vpack.i.bf16 %v6891_v58, %v6892_v60  ;;  %v6896_v56 = vld [vmem:[#allocation20_spill] sm:$0xff]  ;;  %v3828_v58 = vpack.i.bf16 %v5180_v40, %v4909_v3  ;;  %v6913_v60 = vld [vmem:[#allocation26_spill] sm:$0xff] }
  0xb7   : > { %v5092_v11 = vpop.permute.xlu1 %3459  ;;  %v6897_v28 = vpack.i.bf16 %v6895_v50, %v6896_v56  ;;  %v6915_v63 = vpack.i.bf16 %v6913_v60, %v6914_v19  ;;  %v6919_v50 = vld [vmem:[#allocation29_spill] sm:$0xff] }
  0xb8   : > { %6870 = vst [vmem:[#allocation8_spill] sm:$0xff] %v5092_v11  ;;  %v5094_v14 = vpop.permute.xlu0 %3454  ;;  %v5479_v11 = vld [vmem:[%s4483_s28 + $0xd0] sm:$0xff] }
  0xb9   : > { %6871 = vst [vmem:[#allocation24_spill] sm:$0xff] %v5094_v14  ;;  %3749 = vrot.lane.b32.xlu1 %v3748_v49, %s4394_s6  ;;  %v6894_v49 = vld [vmem:[#allocation30_spill] sm:$0xff]  ;;  %v5476_v14 = vld [vmem:[%s4483_s28 + $0x110] sm:$0xff] }
  0xba   : > { %3744 = vrot.lane.b32.xlu0 %v6874_v29, %s4394_s6  ;;  %v3788_v41 = vpack.i.bf16 %v5128_v43, %v6894_v49 }
  0xbb   : > { %v5104_v0 = vpop.permute.xlu1 %3469 }
  0xbc   : > { %6875 = vst [vmem:[#allocation7_spill] sm:$0xff] %v5104_v0  ;;  %v5106_v4 = vpop.permute.xlu0 %3464 }
  0xbd   : > { %6876 = vst [vmem:[#allocation9_spill] sm:$0xff] %v5106_v4  ;;  %3759 = vrot.lane.b32.xlu1 %v6879_v7, %s4395_s7  ;;  %v6902_v7 = vpack.i.bf16 %v6900_v8, %v6901_v12  ;;  %v6924_v8 = vld [vmem:[#allocation32_spill] sm:$0xff] }
  0xbe   : > { %3754 = vrot.lane.b32.xlu0 %v6883_v45, %s4395_s7  ;;  %v3808_v45 = vpack.i.bf16 %v5154_v21, %v4886_v33 }
  0xbf   : > { %v5118_v34 = vpop.permute.xlu1 %3479 }
  0xc0   : > { %6884 = vst [vmem:[#allocation10_spill] sm:$0xff] %v5118_v34  ;;  %v5120_v36 = vpop.permute.xlu0 %3474 }
  0xc1   : > { %6885 = vst [vmem:[#allocation11_spill] sm:$0xff] %v5120_v36  ;;  %3769 = vrot.lane.b32.xlu1 %v3768_v20, %s4395_s7  ;;  %v5457_v36 = vld [vmem:[%s4483_s28 + $0x130] sm:$0xff] }
  0xc2   : > { %3764 = vrot.lane.b32.xlu0 %v6888_v42, %s4395_s7 }
  0xc3   : > { %v5130_v62 = vpop.permute.xlu1 %3489 }
  0xc4   : > { %6889 = vst [vmem:[#allocation15_spill] sm:$0xff] %v5130_v62  ;;  %v5132_v59 = vpop.permute.xlu0 %3484 }
  0xc5   : > { %6890 = vst [vmem:[#allocation13_spill] sm:$0xff] %v5132_v59  ;;  %3779 = vrot.lane.b32.xlu1 %v6893_v17, %s4396_s8  ;;  %v5452_v59 = vld [vmem:[%s4483_s28 + $0x120] sm:$0xff] }
  0xc6   : > { %3774 = vrot.lane.b32.xlu0 %v6897_v28, %s4396_s8  ;;  %v6923_v28 = vld [vmem:[#allocation34_spill] sm:$0xff] }
  0xc7   : > { %v5144_v31 = vpop.permute.xlu1 %3499  ;;  %v6925_v12 = vpack.i.bf16 %v6923_v28, %v6924_v8  ;;  %v3101_v28 = vld [vmem:[%s4483_s28 + $0xf2] sm:$0xff]  ;;  %v3102_v8 = vld [vmem:[%s4483_s28 + $0x102] sm:$0xff] }
  0xc8   : > { %6898 = vst [vmem:[#allocation25_spill] sm:$0xff] %v5144_v31  ;;  %v5146_v29 = vpop.permute.xlu0 %3494  ;;  %v5449_v31 = vld [vmem:[%s4483_s28 + $0x50] sm:$0xff] }
  0xc9   : > { %6899 = vst [vmem:[#allocation12_spill] sm:$0xff] %v5146_v29  ;;  %3789 = vrot.lane.b32.xlu1 %v3788_v41, %s4396_s8  ;;  %v6918_v41 = vld [vmem:[#allocation28_spill] sm:$0xff]  ;;  %v5446_v29 = vld [vmem:[%s4483_s28 + $0xa0] sm:$0xff] }
  0xca   : > { %3784 = vrot.lane.b32.xlu0 %v6902_v7, %s4396_s8  ;;  %v6920_v27 = vpack.i.bf16 %v6918_v41, %v6919_v50  ;;  %v6926_v7 = vld [vmem:[#allocation39_spill] sm:$0xff]  ;;  %v6933_v50 = vld [vmem:[#allocation36_spill] sm:$0xff] }
  0xcb   : > { %v5156_v20 = vpop.permute.xlu1 %3509  ;;  %v6932_v41 = vld [vmem:[#allocation35_spill] sm:$0xff] }
  0xcc   : > { %6903 = vst [vmem:[#allocation14_spill] sm:$0xff] %v5156_v20  ;;  %v5158_v22 = vpop.permute.xlu0 %3504 }
  0xcd   : > { %6904 = vst [vmem:[#allocation16_spill] sm:$0xff] %v5158_v22  ;;  %3799 = vrot.lane.b32.xlu1 %v6905_v55, %s4397_s9  ;;  %v3848_v55 = vpack.i.bf16 %v5206_v15, %v6926_v7  ;;  %v3103_v7 = vld [vmem:[%s4483_s28 + $0x112] sm:$0xff] }
  0xce   : > { %3794 = vrot.lane.b32.xlu0 %v6906_v2, %s4397_s9  ;;  %v6928_v2 = vld [vmem:[#allocation33_spill] sm:$0xff] }
  0xcf   : > { %v5170_v47 = vpop.permute.xlu1 %3519  ;;  %v5441_v22 = vld [vmem:[%s4483_s28 + $0x90] sm:$0xff] }
  0xd0   : > { %6907 = vst [vmem:[#allocation17_spill] sm:$0xff] %v5170_v47  ;;  %v5172_v42 = vpop.permute.xlu0 %3514  ;;  %v5438_v47 = vld [vmem:[%s4483_s28 + $0x20] sm:$0xff] }
  0xd1   : > { %6908 = vst [vmem:[#allocation21_spill] sm:$0xff] %v5172_v42  ;;  %3809 = vrot.lane.b32.xlu1 %v3808_v45, %s4397_s9  ;;  %v6927_v45 = vld [vmem:[#allocation31_spill] sm:$0xff] }
  0xd2   : > { %3804 = vrot.lane.b32.xlu0 %v6909_v10, %s4397_s9  ;;  %v6929_v10 = vpack.i.bf16 %v6927_v45, %v6928_v2  ;;  %v3104_v45 = vld [vmem:[%s4483_s28 + $0x122] sm:$0xff] }
  0xd3   : > { %v5182_v33 = vpop.permute.xlu1 %3529  ;;  %v5430_v42 = vld [vmem:[%s4483_s28 + $0x40] sm:$0xff] }
  0xd4   : > { %6910 = vst [vmem:[#allocation19_spill] sm:$0xff] %v5182_v33  ;;  %v5184_v13 = vpop.permute.xlu0 %3524  ;;  %v5424_v33 = vld [vmem:[%s4483_s28 + $0x80] sm:$0xff] }
  0xd5   : > { %6911 = vst [vmem:[#allocation30_spill] sm:$0xff] %v5184_v13  ;;  %3819 = vrot.lane.b32.xlu1 %v6912_v32, %s4398_s10  ;;  %v3099_v32 = vld [vmem:[%s4483_s28 + $0xd2] sm:$0xff] }
  0xd6   : > { %3814 = vrot.lane.b32.xlu0 %v6915_v63, %s4398_s10 }
  0xd7   : > { %v5196_v17 = vpop.permute.xlu1 %3539 }
  0xd8   : > { %6916 = vst [vmem:[#allocation18_spill] sm:$0xff] %v5196_v17  ;;  %v5198_v49 = vpop.permute.xlu0 %3534  ;;  %v5419_v17 = vld [vmem:[%s4483_s28 + $0x70] sm:$0xff] }
  0xd9   : > { %6917 = vst [vmem:[#allocation20_spill] sm:$0xff] %v5198_v49  ;;  %3829 = vrot.lane.b32.xlu1 %v3828_v58, %s4398_s10  ;;  %v3100_v58 = vld [vmem:[%s4483_s28 + $0xe2] sm:$0xff]  ;;  %v4048_v4 = vpack.i.bf16 %v5424_v33, %v5419_v17 }
  0xda   : > { %3824 = vrot.lane.b32.xlu0 %v6920_v27, %s4398_s10  ;;  %v3858_v63 = vpack.i.bf16 %v3100_v58, %v3099_v32  ;;  %v6934_v27 = vpack.i.bf16 %v6932_v41, %v6933_v50  ;;  %v6938_v32 = vld [vmem:[#allocation38_spill] sm:$0xff]  ;;  %v3863_v41 = vpack.i.bf16 %v3104_v45, %v3103_v7 }
  0xdb   : > { %v5208_v3 = vpop.permute.xlu1 %3549  ;;  %v3107_v50 = vld [vmem:[%s4483_s28 + $0x23] sm:$0xff] }
  0xdc   : > { %6921 = vst [vmem:[#allocation22_spill] sm:$0xff] %v5208_v3  ;;  %v5210_v56 = vpop.permute.xlu0 %3544  ;;  %v3111_v45 = vld [vmem:[%s4483_s28 + $0x63] sm:$0xff] }
  0xdd   : > { %6922 = vst [vmem:[#allocation23_spill] sm:$0xff] %v5210_v56  ;;  %3839 = vrot.lane.b32.xlu1 %v6925_v12, %s4399_s11 }
  0xde   : > { %3834 = vrot.lane.b32.xlu0 %v6929_v10, %s4399_s11  ;;  %v6937_v10 = vld [vmem:[#allocation37_spill] sm:$0xff] }
  0xdf   : > { %v5224_v60 = vpop.permute.xlu1 %3559  ;;  %v6939_v58 = vpack.i.bf16 %v6937_v10, %v6938_v32  ;;  %v3110_v10 = vld [vmem:[%s4483_s28 + $0x53] sm:$0xff] }
  0xe0   : > { %6930 = vst [vmem:[#allocation26_spill] sm:$0xff] %v5224_v60  ;;  %v5226_v19 = vpop.permute.xlu0 %3554  ;;  %v3112_v32 = vld [vmem:[%s4483_s28 + $0x73] sm:$0xff] }
  0xe1   : > { %6931 = vst [vmem:[#allocation27_spill] sm:$0xff] %v5226_v19  ;;  %3849 = vrot.lane.b32.xlu1 %v3848_v55, %s4399_s11  ;;  %v3868_v55 = vpack.i.bf16 %v3102_v8, %v3101_v28  ;;  %v3106_v19 = vld [vmem:[%s4483_s28 + $0x142] sm:$0xff] }
  0xe2   : > { %3844 = vrot.lane.b32.xlu0 %v6934_v27, %s4399_s11  ;;  %v3108_v27 = vld [vmem:[%s4483_s28 + $0x33] sm:$0xff]  ;;  %v3873_v28 = vpack.i.bf16 %v3106_v19, %v5024_v35  ;;  %v3109_v8 = vld [vmem:[%s4483_s28 + $0x43] sm:$0xff] }
  0xe3   : > { %v5235_v12 = vpop.permute.xlu1 %3569  ;;  %v3116_v35 = vld [vmem:[%s4483_s28 + $0x190] sm:$0xff] }
  0xe4   : > { %6935 = vst [vmem:[#allocation28_spill] sm:$0xff] %v5235_v12  ;;  %v5239_v2 = vpop.permute.xlu0 %3564 }
  0xe5   : > { %6936 = vst [vmem:[#allocation29_spill] sm:$0xff] %v5239_v2  ;;  %3859 = vrot.lane.b32.xlu1 %v3858_v63, %s4390_s29  ;;  %v3878_v63 = vpack.i.bf16 %v3108_v27, %v3107_v50  ;;  %v3115_v50 = vld [vmem:[%s4483_s28 + $0x180] sm:$0xff]  ;;  %v3114_v27 = vld [vmem:[%s4483_s28 + $0x93] sm:$0xff] }
  0xe6   : > { %3854 = vrot.lane.b32.xlu0 %v6939_v58, %s4400_s17 }
  0xe7   : > { %v5248_v12 = vpop.permute.xlu1 %3579 }
  0xe8   : > { %6940 = vst [vmem:[#allocation34_spill] sm:$0xff] %v5248_v12  ;;  %v5251_v60 = vpop.permute.xlu0 %3574 }
  0xe9   : > { %6941 = vst [vmem:[#allocation32_spill] sm:$0xff] %v5251_v60  ;;  %3869 = vrot.lane.b32.xlu1 %v3868_v55, %s4390_s29  ;;  %v3888_v55 = vpack.i.bf16 %v3110_v10, %v3109_v8  ;;  %v3117_v8 = vld [vmem:[%s4483_s28 + $0x1a0] sm:$0xff] }
  0xea   : > { %3864 = vrot.lane.b32.xlu0 %v3863_v41, %s4390_s29  ;;  %v3883_v41 = vpack.i.bf16 %v3112_v32, %v3111_v45  ;;  %v3119_v45 = vld [vmem:[%s4483_s28 + $0x1c0] sm:$0xff]  ;;  %v3120_v32 = vld [vmem:[%s4483_s28 + $0x1d0] sm:$0xff] }
  0xeb   : > { %v5258_v7 = vpop.permute.xlu1 %3589 }
  0xec   : > { %6942 = vst [vmem:[#allocation39_spill] sm:$0xff] %v5258_v7  ;;  %v5262_v58 = vpop.permute.xlu0 %3584 }
  0xed   : > { %6943 = vst [vmem:[#allocation31_spill] sm:$0xff] %v5262_v58  ;;  %3879 = vrot.lane.b32.xlu1 %v3878_v63, %s4391_s30  ;;  %v3898_v58 = vpack.i.bf16 %v3116_v35, %v3115_v50  ;;  %v3893_v63 = vpack.i.bf16 %v3114_v27, %v5050_v48  ;;  %v3123_v50 = vld [vmem:[%s4483_s28 + $0x230] sm:$0xff]  ;;  %v3124_v48 = vld [vmem:[%s4483_s28 + $0x240] sm:$0xff] }
  0xee   : > { %3874 = vrot.lane.b32.xlu0 %v3873_v28, %s4390_s29  ;;  %v3118_v28 = vld [vmem:[%s4483_s28 + $0x1b0] sm:$0xff]  ;;  %s4407_s29 = smov 96  }
  0xef   : > { %v5268_v19 = vpop.permute.xlu1 %3599  ;;  %v3122_v27 = vld [vmem:[%s4483_s28 + $0x1f0] sm:$0xff] }
  0xf0   : > { %6944 = vst [vmem:[#allocation33_spill] sm:$0xff] %v5268_v19  ;;  %v5271_v7 = vpop.permute.xlu0 %3594 }
  0xf1   : > { %6945 = vst [vmem:[#allocation35_spill] sm:$0xff] %v5271_v7  ;;  %3889 = vrot.lane.b32.xlu1 %v3888_v55, %s4391_s30  ;;  %v3908_v55 = vpack.i.bf16 %v3118_v28, %v3117_v8  ;;  %v3125_v8 = vld [vmem:[%s4483_s28 + $0x250] sm:$0xff] }
  0xf2   : > { %3884 = vrot.lane.b32.xlu0 %v3883_v41, %s4391_s30  ;;  %v3903_v41 = vpack.i.bf16 %v3120_v32, %v3119_v45  ;;  %v3127_v45 = vld [vmem:[%s4483_s28 + $0x270] sm:$0xff]  ;;  %v3128_v32 = vld [vmem:[%s4483_s28 + $0x280] sm:$0xff] }
  0xf3   : > { %v5278_v10 = vpop.permute.xlu1 %3609 }
  0xf4   : > { %6946 = vst [vmem:[#allocation36_spill] sm:$0xff] %v5278_v10  ;;  %v5282_v19 = vpop.permute.xlu0 %3604 }
  0xf5   : > { %6947 = vst [vmem:[#allocation37_spill] sm:$0xff] %v5282_v19  ;;  %3899 = vrot.lane.b32.xlu1 %v3898_v58, %s4392_s4  ;;  %v3918_v19 = vpack.i.bf16 %v3124_v48, %v3123_v50  ;;  %v3913_v58 = vpack.i.bf16 %v3122_v27, %v5076_v61  ;;  %v3131_v50 = vld [vmem:[%s4483_s28 + $0x181] sm:$0xff]  ;;  %v3132_v61 = vld [vmem:[%s4483_s28 + $0x191] sm:$0xff] }
  0xf6   : > { %3894 = vrot.lane.b32.xlu0 %v3893_v63, %s4391_s30  ;;  %v3126_v63 = vld [vmem:[%s4483_s28 + $0x260] sm:$0xff] }
  0xf7   : > { %v5288_v35 = vpop.permute.xlu1 %3619  ;;  %v3130_v27 = vld [vmem:[%s4483_s28 + $0x2a0] sm:$0xff] }
  0xf8   : > { %6948 = vst [vmem:[#allocation38_spill] sm:$0xff] %v5288_v35  ;;  %v5291_v10 = vpop.permute.xlu0 %3614 }
  0xf9   : > { %6949 = vst [vmem:[#allocation60_spill] sm:$0xff] %v5291_v10  ;;  %3909 = vrot.lane.b32.xlu1 %v3908_v55, %s4392_s4  ;;  %v3928_v55 = vpack.i.bf16 %v3126_v63, %v3125_v8  ;;  %v3133_v8 = vld [vmem:[%s4483_s28 + $0x1a1] sm:$0xff] }
  0xfa   : > { %3904 = vrot.lane.b32.xlu0 %v3903_v41, %s4392_s4  ;;  %v3923_v41 = vpack.i.bf16 %v3128_v32, %v3127_v45  ;;  %v3135_v45 = vld [vmem:[%s4483_s28 + $0x1c1] sm:$0xff]  ;;  %v3136_v32 = vld [vmem:[%s4483_s28 + $0x1d1] sm:$0xff] }
  0xfb   : > { %v5298_v28 = vpop.permute.xlu1 %3629 }
  0xfc   : > { %6950 = vst [vmem:[#allocation61_spill] sm:$0xff] %v5298_v28  ;;  %v5302_v35 = vpop.permute.xlu0 %3624 }
  0xfd   : > { %6951 = vst [vmem:[#allocation62_spill] sm:$0xff] %v5302_v35  ;;  %3919 = vrot.lane.b32.xlu1 %v3918_v19, %s4393_s5  ;;  %v3938_v35 = vpack.i.bf16 %v3132_v61, %v3131_v50  ;;  %v3933_v19 = vpack.i.bf16 %v3130_v27, %v5102_v44  ;;  %v3139_v50 = vld [vmem:[%s4483_s28 + $0x231] sm:$0xff]  ;;  %v3140_v44 = vld [vmem:[%s4483_s28 + $0x241] sm:$0xff] }
  0xfe   : > { %3914 = vrot.lane.b32.xlu0 %v3913_v58, %s4392_s4  ;;  %v3134_v58 = vld [vmem:[%s4483_s28 + $0x1b1] sm:$0xff] }
  0xff   : > { %v5308_v48 = vpop.permute.xlu1 %3639  ;;  %v3138_v27 = vld [vmem:[%s4483_s28 + $0x1f1] sm:$0xff] }
 0x100   : > { %6952 = vst [vmem:[#allocation63_spill] sm:$0xff] %v5308_v48  ;;  %v5311_v28 = vpop.permute.xlu0 %3634 }
 0x101   : > { %6953 = vst [vmem:[#allocation64_spill] sm:$0xff] %v5311_v28  ;;  %3929 = vrot.lane.b32.xlu1 %v3928_v55, %s4393_s5  ;;  %v3948_v55 = vpack.i.bf16 %v3134_v58, %v3133_v8  ;;  %v3141_v8 = vld [vmem:[%s4483_s28 + $0x251] sm:$0xff] }
 0x102   : > { %3924 = vrot.lane.b32.xlu0 %v3923_v41, %s4393_s5  ;;  %v3943_v41 = vpack.i.bf16 %v3136_v32, %v3135_v45  ;;  %v3143_v45 = vld [vmem:[%s4483_s28 + $0x271] sm:$0xff]  ;;  %v3144_v32 = vld [vmem:[%s4483_s28 + $0x281] sm:$0xff] }
 0x103   : > { %v5318_v63 = vpop.permute.xlu1 %3649 }
 0x104   : > { %6954 = vst [vmem:[#allocation65_spill] sm:$0xff] %v5318_v63  ;;  %v5322_v48 = vpop.permute.xlu0 %3644 }
 0x105   : > { %6955 = vst [vmem:[#allocation66_spill] sm:$0xff] %v5322_v48  ;;  %3939 = vrot.lane.b32.xlu1 %v3938_v35, %s4394_s6  ;;  %v3958_v48 = vpack.i.bf16 %v3140_v44, %v3139_v50  ;;  %v3953_v35 = vpack.i.bf16 %v3138_v27, %v5128_v43  ;;  %v3147_v50 = vld [vmem:[%s4483_s28 + $0x182] sm:$0xff]  ;;  %v3148_v43 = vld [vmem:[%s4483_s28 + $0x192] sm:$0xff] }
 0x106   : > { %3934 = vrot.lane.b32.xlu0 %v3933_v19, %s4393_s5  ;;  %v3142_v19 = vld [vmem:[%s4483_s28 + $0x261] sm:$0xff]  ;;  %v3978_v7 = vpack.i.bf16 %v3148_v43, %v3147_v50  ;;  %v3155_v50 = vld [vmem:[%s4483_s28 + $0x232] sm:$0xff]  ;;  %s161_s5 = sand.u32 1, %s4380_s13  }
 0x107   : > { %v5328_v61 = vpop.permute.xlu1 %3659  ;;  %v3146_v27 = vld [vmem:[%s4483_s28 + $0x2a1] sm:$0xff] }
 0x108   : > { %v5331_v63 = vpop.permute.xlu0 %3654  ;;  %v3662_v39 = vunpack.i.h.bf16 %v5328_v61  ;;  %v3661_v37 = vunpack.i.l.bf16 %v5328_v61 }
 0x109   : > { %3949 = vrot.lane.b32.xlu1 %v3948_v55, %s4394_s6  ;;  %v3968_v55 = vpack.i.bf16 %v3142_v19, %v3141_v8  ;;  %v3149_v8 = vld [vmem:[%s4483_s28 + $0x1a2] sm:$0xff]  ;;  %v3657_v61 = vunpack.i.h.bf16 %v5331_v63 }
 0x10a   : > { %3944 = vrot.lane.b32.xlu0 %v3943_v41, %s4394_s6  ;;  %v3963_v41 = vpack.i.bf16 %v3144_v32, %v3143_v45  ;;  %v3151_v45 = vld [vmem:[%s4483_s28 + $0x1c2] sm:$0xff]  ;;  %v3152_v32 = vld [vmem:[%s4483_s28 + $0x1d2] sm:$0xff]  ;;  %v1673_v26 = vsel %vm1055_vm0, %v5526_v54, %v3662_v39 }
 0x10b   : > { %v5338_v58 = vpop.permute.xlu1 %3669 }
 0x10c   : > { %v5342_v28 = vpop.permute.xlu0 %3664  ;;  %v3672_v57 = vunpack.i.h.bf16 %v5338_v58 }
 0x10d   : > { %3959 = vrot.lane.b32.xlu1 %v3958_v48, %s4395_s7  ;;  %v3973_v48 = vpack.i.bf16 %v3146_v27, %v5154_v21  ;;  %v3156_v21 = vld [vmem:[%s4483_s28 + $0x242] sm:$0xff]  ;;  %v3154_v27 = vld [vmem:[%s4483_s28 + $0x1f2] sm:$0xff]  ;;  %v3667_v6 = vunpack.i.h.bf16 %v5342_v28  ;;  %v3666_v30 = vunpack.i.l.bf16 %v5342_v28 }
 0x10e   : > { %3954 = vrot.lane.b32.xlu0 %v3953_v35, %s4394_s6  ;;  %v3150_v35 = vld [vmem:[%s4483_s28 + $0x1b2] sm:$0xff]  ;;  %v3998_v2 = vpack.i.bf16 %v3156_v21, %v3155_v50  ;;  %s2865_s6 = sshll.u32 %s161_s5, 4 }
 0x10f   : > { %v5348_v44 = vpop.permute.xlu1 %3679 }
 0x110   : > { %v5351_v10 = vpop.permute.xlu0 %3674 }
 0x111   : > { %3969 = vrot.lane.b32.xlu1 %v3968_v55, %s4395_s7  ;;  %v3988_v55 = vpack.i.bf16 %v3150_v35, %v3149_v8  ;;  %v3157_v8 = vld [vmem:[%s4483_s28 + $0x252] sm:$0xff]  ;;  %v3677_v9 = vunpack.i.h.bf16 %v5351_v10  ;;  %v3676_v39 = vunpack.i.l.bf16 %v5351_v10  ;;  %v1675_v10 = vsel %vm1055_vm0, %v5543_v25, %v3667_v6 }
 0x112   : > { %3964 = vrot.lane.b32.xlu0 %v3963_v41, %s4395_s7  ;;  %v3983_v41 = vpack.i.bf16 %v3152_v32, %v3151_v45  ;;  %v3159_v45 = vld [vmem:[%s4483_s28 + $0x272] sm:$0xff]  ;;  %v3160_v32 = vld [vmem:[%s4483_s28 + $0x282] sm:$0xff] }
 0x113   : > { %v5358_v19 = vpop.permute.xlu1 %3689  ;;  %v4003_v50 = vpack.i.bf16 %v3160_v32, %v3159_v45  ;;  %v5404_v32 = vld [vmem:[%s4483_s28 + $0x1d3] sm:$0xff] }
 0x114   : > { %v5362_v60 = vpop.permute.xlu0 %3684 }
 0x115   : > { %3979 = vrot.lane.b32.xlu1 %v3978_v7, %s4396_s8  ;;  %v3993_v7 = vpack.i.bf16 %v3154_v27, %v5180_v40  ;;  %v5388_v40 = vld [vmem:[%s4483_s28 + $0x193] sm:$0xff]  ;;  %v3162_v27 = vld [vmem:[%s4483_s28 + $0x2a2] sm:$0xff] }
 0x116   : > { %3974 = vrot.lane.b32.xlu0 %v3973_v48, %s4395_s7  ;;  %v3158_v48 = vld [vmem:[%s4483_s28 + $0x262] sm:$0xff]  ;;  %s4405_s7 = smov 32  }
 0x117   : > { %v5368_v43 = vpop.permute.xlu1 %3699 }
 0x118   : > { %v5371_v12 = vpop.permute.xlu0 %3694 }
 0x119   : > { %3989 = vrot.lane.b32.xlu1 %v3988_v55, %s4396_s8  ;;  %v4008_v55 = vpack.i.bf16 %v3158_v48, %v3157_v8  ;;  %v3055_v8 = vld [vmem:[%s4483_s28 + $0x1b3] sm:$0xff]  ;;  %v3056_v48 = vld [vmem:[%s4483_s28 + $0x1c3] sm:$0xff] }
 0x11a   : > { %3984 = vrot.lane.b32.xlu0 %v3983_v41, %s4396_s8  ;;  %v3163_v41 = vld [vmem:[%s4483_s28 + $0x183] sm:$0xff] }
 0x11b   : > { %v5378_v35 = vpop.permute.xlu1 %3709 }
 0x11c   : > { %v5382_v56 = vpop.permute.xlu0 %3704 }
 0x11d   : > { %3999 = vrot.lane.b32.xlu1 %v3998_v2, %s4397_s9  ;;  %v4018_v2 = vpack.i.bf16 %v5388_v40, %v3163_v41  ;;  %v3170_v41 = vld [vmem:[%s4483_s28 + $0x1f3] sm:$0xff] }
 0x11e   : > { %3994 = vrot.lane.b32.xlu0 %v3993_v7, %s4396_s8  ;;  %v4013_v7 = vpack.i.bf16 %v3162_v27, %v5206_v15  ;;  %v4023_v15 = vpack.i.bf16 %v5404_v32, %v3056_v48  ;;  %v5416_v27 = vld [vmem:[%s4483_s28 + $0x1a3] sm:$0xff]  ;;  %s163_s8 = scalar_lea.vmem [#allocation4], %s2865_s6 }
 0x11f   : > { %v5390_v21 = vpop.permute.xlu1 %3719  ;;  %v4033_v62 = vpack.i.bf16 %v3055_v8, %v5416_v27  ;;  %v6962_v6 = vpack.i.bf16 %v5416_v27, %v5388_v40  ;;  %v3711_v40 = vunpack.i.l.bf16 %v5378_v35 }
 0x120   : > { %v5393_v3 = vpop.permute.xlu0 %3714 }
 0x121   : > { %4009 = vrot.lane.b32.xlu1 %v4008_v55, %s4397_s9  ;;  %v4028_v55 = vpack.i.bf16 %v3056_v48, %v3055_v8  ;;  %v5435_v48 = vld [vmem:[%s4483_s28 + $0x60] sm:$0xff]  ;;  %v3671_v8 = vunpack.i.l.bf16 %v5338_v58  ;;  %v3681_v58 = vunpack.i.l.bf16 %v5348_v44 }
 0x122   : > { %4004 = vrot.lane.b32.xlu0 %v4003_v50, %s4397_s9  ;;  %v5410_v50 = vld [vmem:[%s4483_s28 + $0x1e3] sm:$0xff] }
 0x123   : > { %v5401_v45 = vpop.permute.xlu1 %3729  ;;  %v4038_v20 = vpack.i.bf16 %v3170_v41, %v5410_v50  ;;  %v5463_v41 = vld [vmem:[%s4483_s28 + $0xf0] sm:$0xff] }
 0x124   : > { %v5406_v49 = vpop.permute.xlu0 %3724 }
 0x125   : > { %4019 = vrot.lane.b32.xlu1 %v4018_v2, %s4398_s10  ;;  %v5427_v2 = vld [vmem:[%s4483_s28 + $0x30] sm:$0xff] }
 0x126   : > { %4014 = vrot.lane.b32.xlu0 %v4013_v7, %s4397_s9  ;;  %v4043_v0 = vpack.i.bf16 %v5430_v42, %v5427_v2  ;;  %s2799_s9 = sshll.u32 %s163_s8, 4  ;;  %s6643_s9 = int_to_ptr.vmem [resolvable:$true] %s2799_s9 }
 0x127   : > { %v5421_v13 = vpop.permute.xlu1 %3739 }
 0x128   : > { %v5432_v7 = vpop.permute.xlu0 %3734 }
 0x129   : > { %4029 = vrot.lane.b32.xlu1 %v4028_v55, %s4400_s17  ;;  %v5460_v55 = vld [vmem:[%s4483_s28 + $0xe0] sm:$0xff] }
 0x12a   : > { %4024 = vrot.lane.b32.xlu0 %v4023_v15, %s4398_s10  ;;  %v3656_v15 = vunpack.i.l.bf16 %v5331_v63  ;;  %v3682_v63 = vunpack.i.h.bf16 %v5348_v44  ;;  %v1676_v44 = vsel %vm1055_vm0, %v5512_v18, %v3671_v8  ;;  %v3701_v8 = vunpack.i.l.bf16 %v5368_v43 }
 0x12b   : > { %v5465_v34 = vpop.permute.xlu1 %3749 }
 0x12c   : > { %v5481_v53 = vpop.permute.xlu0 %3744 }
 0x12d   : > { %4039 = vrot.lane.b32.xlu1 %v4038_v20, %s4398_s10  ;;  %v5515_v20 = vld [vmem:[%s4483_s28 + $0x81] sm:$0xff] }
 0x12e   : > { %6956 = vst [vmem:[#allocation67_spill] sm:$0xff] %v5515_v20  ;;  %4034 = vrot.lane.b32.xlu0 %v4033_v62, %s4398_s10  ;;  %v1672_v62 = vsel %vm1055_vm0, %v5523_v52, %v3661_v37  ;;  %v1670_v37 = vsel %vm1055_vm0, %v2963_v1, %v3656_v15  ;;  %v1677_v28 = vsel %vm1055_vm0, %v5515_v20, %v3672_v57  ;;  %v3691_v52 = vunpack.i.l.bf16 %v5358_v19 }
 0x12f   : > { %v5529_v38 = vpop.permute.xlu1 %3759  ;;  %v3686_v1 = vunpack.i.l.bf16 %v5362_v60  ;;  %v6961_v57 = vpack.i.bf16 %v5410_v50, %v5404_v32  ;;  %v1680_v15 = vsel %vm1064_vm1, %v1672_v62, %v3681_v58  ;;  %v3702_v20 = vunpack.i.h.bf16 %v5368_v43 }
 0x130   : > { %v5545_v5 = vpop.permute.xlu0 %3754  ;;  %v5604_v25 = vsel %vm1064_vm1, %v1670_v37, %v3676_v39  ;;  %v1684_v62 = vsel %vm1064_vm1, %v1676_v44, %v3691_v52  ;;  %v3712_v58 = vunpack.i.h.bf16 %v5378_v35  ;;  %v6963_v52 = vpack.i.bf16 %v5419_v17, %v5435_v48 }
 0x131   : > { %4049 = vrot.lane.b32.xlu1 %v4048_v4, %s4399_s11  ;;  %v1671_v4 = vsel %vm1055_vm0, %v5538_v24, %v3657_v61  ;;  %v3687_v24 = vunpack.i.h.bf16 %v5362_v60  ;;  %v1681_v60 = vsel %vm1064_vm1, %v1673_v26, %v3682_v63  ;;  %v1688_v39 = vsel %vm1073_vm2, %v1680_v15, %v3701_v8 }
 0x132   : > { %4044 = vrot.lane.b32.xlu0 %v4043_v0, %s4399_s11  ;;  %v3692_v0 = vunpack.i.h.bf16 %v5358_v19  ;;  %v1674_v19 = vsel %vm1055_vm0, %v5569_v23, %v3666_v30  ;;  %v1679_v32 = vsel %vm1064_vm1, %v1671_v4, %v3677_v9  ;;  %v3697_v30 = vunpack.i.h.bf16 %v5371_v12 }
 0x133   : > { %v5574_v54 = vpop.permute.xlu1 %3769  ;;  %v1682_v26 = vsel %vm1064_vm1, %v1674_v19, %v3686_v1  ;;  %v1683_v63 = vsel %vm1064_vm1, %v1675_v10, %v3687_v24  ;;  %v3707_v9 = vunpack.i.h.bf16 %v5382_v56  ;;  %v3706_v4 = vunpack.i.l.bf16 %v5382_v56 }
 0x134   : > { %v5581_v61 = vpop.permute.xlu0 %3764  ;;  %v1685_v43 = vsel %vm1064_vm1, %v1677_v28, %v3692_v0  ;;  %v1689_v35 = vsel %vm1073_vm2, %v1681_v60, %v3702_v20  ;;  %v3696_v37 = vunpack.i.l.bf16 %v5371_v12  ;;  %v3721_v28 = vunpack.i.l.bf16 %v5390_v21 }
 0x135   : > { %4059 = vrot.lane.b32.xlu1 %v6961_v57, %s4400_s17  ;;  %v6964_v24 = vpack.i.bf16 %v5427_v2, %v5438_v47  ;;  %v1687_v56 = vsel %vm1073_vm2, %v1679_v32, %v3697_v30  ;;  %v3722_v0 = vunpack.i.h.bf16 %v5390_v21  ;;  %v3717_v17 = vunpack.i.h.bf16 %v5393_v3 }
 0x136   : > { %4054 = vrot.lane.b32.xlu0 %v6962_v6, %s4400_s17  ;;  %v3731_v44 = vunpack.i.l.bf16 %v5401_v45  ;;  %v1692_v20 = vsel %vm1073_vm2, %v1684_v62, %v3711_v40  ;;  %v1693_v1 = vsel %vm1073_vm2, %v1685_v43, %v3712_v58  ;;  %v3732_v57 = vunpack.i.h.bf16 %v5401_v45 }
 0x137   : > { %v5608_v50 = vpop.permute.xlu1 %3779  ;;  %v3726_v47 = vunpack.i.l.bf16 %v5406_v49  ;;  %v1690_v19 = vsel %vm1073_vm2, %v1682_v26, %v3706_v4  ;;  %v1691_v21 = vsel %vm1073_vm2, %v1683_v63, %v3707_v9  ;;  %v3716_v15 = vunpack.i.l.bf16 %v5393_v3 }
 0x138   : > { %v5614_v27 = vpop.permute.xlu0 %3774  ;;  %v3727_v8 = vunpack.i.h.bf16 %v5406_v49  ;;  %v6965_v6 = vpack.i.bf16 %v5446_v29, %v5441_v22  ;;  %v1696_v60 = vsel %vm1082_vm3, %v1688_v39, %v3721_v28  ;;  %v3742_v45 = vunpack.i.h.bf16 %v5421_v13 }
 0x139   : > { %4069 = vrot.lane.b32.xlu1 %v6963_v52, %s4401_s19  ;;  %v3741_v32 = vunpack.i.l.bf16 %v5421_v13  ;;  %v3737_v30 = vunpack.i.h.bf16 %v5432_v7  ;;  %v6966_v62 = vpack.i.bf16 %v5435_v48, %v5449_v31  ;;  %v1697_v49 = vsel %vm1082_vm3, %v1689_v35, %v3722_v0 }
 0x13a   : > { %4064 = vrot.lane.b32.xlu0 %v6964_v24, %s4401_s19  ;;  %v1695_v43 = vsel %vm1082_vm3, %v1687_v56, %v3717_v17  ;;  %v1700_v29 = vsel %vm1082_vm3, %v1692_v20, %v3731_v44  ;;  %v3751_v58 = vunpack.i.l.bf16 %v5465_v34  ;;  %v1701_v13 = vsel %vm1082_vm3, %v1693_v1, %v3732_v57 }
 0x13b   : > { %v5636_v10 = vpop.permute.xlu1 %3789  ;;  %v1698_v26 = vsel %vm1082_vm3, %v1690_v19, %v3726_v47  ;;  %v3752_v63 = vunpack.i.h.bf16 %v5465_v34  ;;  %v3746_v48 = vunpack.i.l.bf16 %v5481_v53  ;;  %v1699_v4 = vsel %vm1082_vm3, %v1691_v21, %v3727_v8 }
 0x13c   : > { %v5642_v2 = vpop.permute.xlu0 %3784  ;;  %v3736_v52 = vunpack.i.l.bf16 %v5432_v7  ;;  %v3747_v39 = vunpack.i.h.bf16 %v5481_v53  ;;  %v3761_v35 = vunpack.i.l.bf16 %v5529_v38  ;;  %v6967_v28 = vpack.i.bf16 %v5457_v36, %v5452_v59 }
 0x13d   : > { %4079 = vrot.lane.b32.xlu1 %v6965_v6, %s4399_s11  ;;  %v1704_v34 = vsel %vm1091_vm4, %v1696_v60, %v3741_v32  ;;  %v1705_v24 = vsel %vm1091_vm4, %v1697_v49, %v3742_v45  ;;  %v1703_v56 = vsel %vm1091_vm4, %v1695_v43, %v3737_v30  ;;  %v3762_v0 = vunpack.i.h.bf16 %v5529_v38 }
 0x13e   : > { %4074 = vrot.lane.b32.xlu0 %v6966_v62, %s4399_s11  ;;  %v6968_v53 = vpack.i.bf16 %v5463_v41, %v5460_v55  ;;  %v1708_v17 = vsel %vm1091_vm4, %v1700_v29, %v3751_v58  ;;  %v3757_v44 = vunpack.i.h.bf16 %v5545_v5  ;;  %v3772_v20 = vunpack.i.h.bf16 %v5574_v54 }
 0x13f   : > { %v5664_v40 = vpop.permute.xlu1 %3799  ;;  %v3771_v1 = vunpack.i.l.bf16 %v5574_v54  ;;  %v1709_v47 = vsel %vm1091_vm4, %v1701_v13, %v3752_v63  ;;  %v1706_v19 = vsel %vm1091_vm4, %v1698_v26, %v3746_v48  ;;  %v3767_v38 = vunpack.i.h.bf16 %v5581_v61 }
 0x140   : > { %v5670_v9 = vpop.permute.xlu0 %3794  ;;  %v3766_v21 = vunpack.i.l.bf16 %v5581_v61  ;;  %v1707_v6 = vsel %vm1091_vm4, %v1699_v4, %v3747_v39  ;;  %v1712_v60 = vsel %vm1100_vm5, %v1704_v34, %v3761_v35  ;;  %v3781_v45 = vunpack.i.l.bf16 %v5608_v50 }
 0x141   : > { %4089 = vrot.lane.b32.xlu1 %v6967_v28, %s4400_s17  ;;  %v3791_v32 = vunpack.i.l.bf16 %v5636_v10  ;;  %v6969_v54 = vpack.i.bf16 %v5441_v22, %v5424_v33  ;;  %v1713_v30 = vsel %vm1100_vm5, %v1705_v24, %v3762_v0  ;;  %v3792_v62 = vunpack.i.h.bf16 %v5636_v10 }
 0x142   : > { %4084 = vrot.lane.b32.xlu0 %v6968_v53, %s4400_s17  ;;  %v3787_v61 = vunpack.i.h.bf16 %v5642_v2  ;;  %v3786_v49 = vunpack.i.l.bf16 %v5642_v2  ;;  %v6970_v43 = vpack.i.bf16 %v5449_v31, %v5430_v42  ;;  %v1711_v29 = vsel %vm1100_vm5, %v1703_v56, %v3757_v44 }
 0x143   : > { %v3810_v57 = vpop.permute.xlu1 %3809  ;;  %v1716_v58 = vsel %vm1100_vm5, %v1708_v17, %v3771_v1  ;;  %v1717_v22 = vsel %vm1100_vm5, %v1709_v47, %v3772_v20  ;;  %v1714_v26 = vsel %vm1100_vm5, %v1706_v19, %v3766_v21  ;;  %v1715_v10 = vsel %vm1100_vm5, %v1707_v6, %v3767_v38 }
 0x144   : > { %v3805_v8 = vpop.permute.xlu0 %3804  ;;  %v3811_v33 = vunpack.i.l.bf16 %v3810_v57  ;;  %v3812_v63 = vunpack.i.h.bf16 %v3810_v57  ;;  %v3782_v31 = vunpack.i.h.bf16 %v5608_v50  ;;  %v1720_v42 = vsel %vm1109_vm6, %v1712_v60, %v3781_v45 }
 0x145   : > { %4099 = vrot.lane.b32.xlu1 %v6969_v54, %s4401_s19  ;;  %v3806_v48 = vunpack.i.l.bf16 %v3805_v8  ;;  %v3777_v4 = vunpack.i.h.bf16 %v5614_v27  ;;  %v1724_v39 = vsel %vm1109_vm6, %v1716_v58, %v3791_v32  ;;  %v6971_v35 = vpack.i.bf16 %v5452_v59, %v5476_v14 }
 0x146   : > { %4094 = vrot.lane.b32.xlu0 %v6970_v43, %s4401_s19  ;;  %v1725_v28 = vsel %vm1109_vm6, %v1717_v22, %v3792_v62  ;;  %v1722_v34 = vsel %vm1109_vm6, %v1714_v26, %v3786_v49  ;;  %v1723_v24 = vsel %vm1109_vm6, %v1715_v10, %v3787_v61  ;;  %v3807_v56 = vunpack.i.h.bf16 %v3805_v8 }
 0x147   : > { %v3820_v13 = vpop.permute.xlu1 %3819  ;;  %v6972_v50 = vpack.i.bf16 %v5460_v55, %v5479_v11  ;;  %v3802_v0 = vunpack.i.h.bf16 %v5664_v40  ;;  %v3801_v53 = vunpack.i.l.bf16 %v5664_v40  ;;  %v3797_v17 = vunpack.i.h.bf16 %v5670_v9 }
 0x148   : > { %v5717_v2 = vpop.permute.xlu0 %3814  ;;  %v1732_v59 = vsel %vm1118_vm7, %v1724_v39, %v3811_v33  ;;  %v1733_v20 = vsel %vm1118_vm7, %v1725_v28, %v3812_v63  ;;  %v1730_v1 = vsel %vm1118_vm7, %v1722_v34, %v3806_v48  ;;  %v3822_v38 = vunpack.i.h.bf16 %v3820_v13  ;;  %v6977_v39 = vld [vmem:[#allocation69_spill] sm:$0xff] }
 0x149   : > { %4109 = vrot.lane.b32.xlu1 %v6971_v35, %s4402_s20  ;;  %v3821_v21 = vunpack.i.l.bf16 %v3820_v13  ;;  %v6973_v40 = vpack.i.bf16 %v5495_v46, %v5492_v51  ;;  %v1731_v8 = vsel %vm1118_vm7, %v1723_v24, %v3807_v56  ;;  %v3817_v6 = vunpack.i.h.bf16 %v5717_v2  ;;  %v6978_v35 = vld [vmem:[#allocation68_spill] sm:$0xff] }
 0x14a   : > { %4104 = vrot.lane.b32.xlu0 %v6972_v50, %s4402_s20  ;;  %v6974_v32 = vpack.i.bf16 %v5476_v14, %v5498_v16  ;;  %v1721_v54 = vsel %vm1109_vm6, %v1713_v30, %v3782_v31  ;;  %v1719_v62 = vsel %vm1109_vm6, %v1711_v29, %v3777_v4  ;;  %v1728_v43 = vsel %vm1118_vm7, %v1720_v42, %v3801_v53  ;;  %v6975_v29 = vld [vmem:[#allocation67_spill] sm:$0xff]  ;;  %v6980_v50 = vld [vmem:[#allocation70_spill] sm:$0xff] }
 0x14b   : > { %v3830_v44 = vpop.permute.xlu1 %3829  ;;  %v1729_v58 = vsel %vm1118_vm7, %v1721_v54, %v3802_v0  ;;  %v1727_v26 = vsel %vm1118_vm7, %v1719_v62, %v3797_v17  ;;  %v1736_v14 = vsel %vm1127_vm8, %v1728_v43, %v3821_v21  ;;  %v6976_v63 = vpack.i.bf16 %v6975_v29, %v5512_v18 }
 0x14c   : > { %v3832_v57 = vunpack.i.h.bf16 %v3830_v44  ;;  %v3831_v47 = vunpack.i.l.bf16 %v3830_v44  ;;  %v3825_v19 = vpop.permute.xlu0 %3824  ;;  %v1737_v30 = vsel %vm1127_vm8, %v1729_v58, %v3822_v38  ;;  %v3756_v48 = vunpack.i.l.bf16 %v5545_v5 }
 0x14d   : > { %v3827_v11 = vunpack.i.h.bf16 %v3825_v19  ;;  %v3826_v55 = vunpack.i.l.bf16 %v3825_v19  ;;  %4119 = vrot.lane.b32.xlu1 %v6973_v40, %s4400_s17  ;;  %v1735_v31 = vsel %vm1127_vm8, %v1727_v26, %v3817_v6  ;;  %v6979_v28 = vpack.i.bf16 %v6977_v39, %v6978_v35 }
 0x14e   : > { %v1740_v60 = vsel %vm1127_vm8, %v1732_v59, %v3831_v47  ;;  %v1741_v45 = vsel %vm1127_vm8, %v1733_v20, %v3832_v57  ;;  %4114 = vrot.lane.b32.xlu0 %v6974_v32, %s4400_s17  ;;  %v1686_v34 = vsel %vm1073_vm2, %v5604_v25, %v3696_v37  ;;  %v3776_v5 = vunpack.i.l.bf16 %v5614_v27  ;;  %v5834_v32 = vld [vmem:[%s4483_s28 + $0x131] sm:$0xff]  ;;  %s2786_s17 = scalar_lea.sflag [#allocation5], %s161_s5 }
 0x14f   : > { %v1738_v46 = vsel %vm1127_vm8, %v1730_v1, %v3826_v55  ;;  %v1739_v61 = vsel %vm1127_vm8, %v1731_v8, %v3827_v11  ;;  %v3840_v49 = vpop.permute.xlu1 %3839  ;;  %v4143_v0 = vpack.i.bf16 %v6978_v35, %v6980_v50  ;;  %v1694_v53 = vsel %vm1082_vm3, %v1686_v34, %v3716_v15  ;;  %v6983_v55 = vld [vmem:[#allocation71_spill] sm:$0xff]  ;;  %v3083_v34 = vld [vmem:[%s4483_s28 + $0xd1] sm:$0xff] }
 0x150   : > { %v3842_v22 = vunpack.i.h.bf16 %v3840_v49  ;;  %v3841_v33 = vunpack.i.l.bf16 %v3840_v49  ;;  %v3835_v13 = vpop.permute.xlu0 %3834  ;;  %v3796_v17 = vunpack.i.l.bf16 %v5670_v9  ;;  %v1702_v25 = vsel %vm1091_vm4, %v1694_v53, %v3736_v52  ;;  %v5809_v52 = vld [vmem:[%s4483_s28 + $0x91] sm:$0xff]  ;;  %v5875_v53 = vld [vmem:[%s4483_s28 + $0x62] sm:$0xff] }
 0x151   : > { %v3837_v10 = vunpack.i.h.bf16 %v3835_v13  ;;  %4129 = vrot.lane.b32.xlu1 %v6976_v63, %s4401_s19  ;;  %v3816_v27 = vunpack.i.l.bf16 %v5717_v2  ;;  %v6981_v3 = vpack.i.bf16 %v5492_v51, %v5457_v36  ;;  %v1710_v15 = vsel %vm1100_vm5, %v1702_v25, %v3756_v48  ;;  %v3194_v2 = vld [vmem:[%s4483_s28 + $0xa1] sm:$0xff]  ;;  %v5871_v50 = vld [vmem:[%s4483_s28 + $0x52] sm:$0xff] }
 0x152   : > { %v5768_v42 = vsel %vm1136_vm9, %v1736_v14, %v3841_v33  ;;  %v5771_v4 = vsel %vm1136_vm9, %v1737_v30, %v3842_v22  ;;  %4124 = vrot.lane.b32.xlu0 %v6979_v28, %s4401_s19  ;;  %v3836_v1 = vunpack.i.l.bf16 %v3835_v13  ;;  %v6982_v7 = vpack.i.bf16 %v5498_v16, %v5463_v41  ;;  %v3091_v33 = vld [vmem:[%s4483_s28 + $0x22] sm:$0xff]  ;;  %v5853_v13 = vld [vmem:[%s4483_s28 + $0x32] sm:$0xff] }
 0x153   : > { %v1743_v24 = vsel %vm1136_vm9, %v1735_v31, %v3837_v10  ;;  %v3850_v56 = vpop.permute.xlu1 %3849  ;;  %v1718_v51 = vsel %vm1109_vm6, %v1710_v15, %v3776_v5  ;;  %v6984_v40 = vpack.i.bf16 %v5512_v18, %v6983_v55  ;;  %v4158_v8 = vpack.i.bf16 %v3194_v2, %v5809_v52  ;;  %v5861_v28 = vld [vmem:[%s4483_s28 + $0x111] sm:$0xff] }
 0x154   : > { %v3852_v12 = vunpack.i.h.bf16 %v3850_v56  ;;  %v3851_v59 = vunpack.i.l.bf16 %v3850_v56  ;;  %v3845_v44 = vpop.permute.xlu0 %3844  ;;  %v1726_v38 = vsel %vm1118_vm7, %v1718_v51, %v3796_v17  ;;  %v4178_v30 = vpack.i.bf16 %v5809_v52, %v6975_v29  ;;  %v5868_v56 = vld [vmem:[%s4483_s28 + $0x42] sm:$0xff]  ;;  %v5878_v17 = vld [vmem:[%s4483_s28 + $0x72] sm:$0xff] }
 0x155   : > { %v3847_v37 = vunpack.i.h.bf16 %v3845_v44  ;;  %v3846_v20 = vunpack.i.l.bf16 %v3845_v44  ;;  %4139 = vrot.lane.b32.xlu1 %v6981_v3, %s4402_s20  ;;  %v1734_v16 = vsel %vm1127_vm8, %v1726_v38, %v3816_v27  ;;  %v4173_v44 = vpack.i.bf16 %v5569_v23, %v6977_v39 }
 0x156   : > { %v5799_v9 = vsel %vm1136_vm9, %v1740_v60, %v3851_v59  ;;  %v5802_v57 = vsel %vm1136_vm9, %v1741_v45, %v3852_v12  ;;  %4134 = vrot.lane.b32.xlu0 %v6982_v7, %s4402_s20  ;;  %v1742_v6 = vsel %vm1136_vm9, %v1734_v16, %v3836_v1  ;;  %v4153_v60 = vpack.i.bf16 %v6983_v55, %v5569_v23  ;;  %v5831_v45 = vld [vmem:[%s4483_s28 + $0x121] sm:$0xff] }
 0x157   : > { %v5814_v36 = vsel %vm1136_vm9, %v1738_v46, %v3846_v20  ;;  %v5817_v47 = vsel %vm1136_vm9, %v1739_v61, %v3847_v37  ;;  %v3860_v19 = vpop.permute.xlu1 %3859  ;;  %v5843_v46 = vld [vmem:[%s4483_s28 + $0xe1] sm:$0xff]  ;;  %v5846_v61 = vld [vmem:[%s4483_s28 + $0xf1] sm:$0xff]  ;;  %v4168_v22 = vpack.i.bf16 %v5834_v32, %v5831_v45  ;;  %v4188_v27 = vpack.i.bf16 %v5831_v45, %v5861_v28 }
 0x158   : > { %v3855_v21 = vpop.permute.xlu0 %3854  ;;  %v3862_v43 = vunpack.i.h.bf16 %v3860_v19  ;;  %v3861_v58 = vunpack.i.l.bf16 %v3860_v19  ;;  %v4163_v26 = vpack.i.bf16 %v5846_v61, %v5843_v46  ;;  %v4183_v37 = vpack.i.bf16 %v5843_v46, %v3083_v34  ;;  %v3201_v16 = vld [vmem:[%s4483_s28 + $0x141] sm:$0xff] }
 0x159   : > { %v3857_v41 = vunpack.i.h.bf16 %v3855_v21  ;;  %v3856_v11 = vunpack.i.l.bf16 %v3855_v21  ;;  %4149 = vrot.lane.b32.xlu1 %v6984_v40, %s4403_s24  ;;  %v3097_v55 = vld [vmem:[%s4483_s28 + $0x82] sm:$0xff]  ;;  %v5905_v40 = vld [vmem:[%s4483_s28 + $0x92] sm:$0xff] }
 0x15a   : > { %4144 = vrot.lane.b32.xlu0 %v4143_v0, %s4403_s24  ;;  %v2271_v5 = vsel %vm1055_vm0, %v5853_v13, %v3862_v43 }
 0x15b   : > { %v5837_v54 = vsel %vm1145_vm10, %v1742_v6, %v3856_v11  ;;  %v5840_v18 = vsel %vm1145_vm10, %v1743_v24, %v3857_v41  ;;  %v3870_v62 = vpop.permute.xlu1 %3869  ;;  %v2270_v24 = vsel %vm1055_vm0, %v3091_v33, %v3861_v58  ;;  %v3202_v41 = vld [vmem:[%s4483_s28 + $0x151] sm:$0xff]  ;;  %v3197_v11 = vld [vmem:[%s4483_s28 + $0x101] sm:$0xff] }
 0x15c   : > { %v3865_v49 = vpop.permute.xlu0 %3864  ;;  %v3872_v10 = vunpack.i.h.bf16 %v3870_v62  ;;  %v3871_v63 = vunpack.i.l.bf16 %v3870_v62  ;;  %v4198_v58 = vpack.i.bf16 %v3202_v41, %v3201_v16  ;;  %v4223_v41 = vpack.i.bf16 %v5875_v53, %v5871_v50 }
 0x15d   : > { %4159 = vrot.lane.b32.xlu1 %v4158_v8, %s4401_s19  ;;  %v3867_v0 = vunpack.i.h.bf16 %v3865_v49  ;;  %v3866_v29 = vunpack.i.l.bf16 %v3865_v49 }
 0x15e   : > { %4154 = vrot.lane.b32.xlu0 %v4153_v60, %s4401_s19  ;;  %v2273_v20 = vsel %vm1055_vm0, %v5871_v50, %v3872_v10  ;;  %v2272_v3 = vsel %vm1055_vm0, %v5868_v56, %v3871_v63  ;;  %s4328_s19 = scalar_lea.vmem %s6643_s9, 256 }
 0x15f   : > { %v3880_v14 = vpop.permute.xlu1 %3879  ;;  %v2275_v39 = vsel %vm1055_vm0, %v5878_v17, %v3867_v0  ;;  %v2274_v7 = vsel %vm1055_vm0, %v5875_v53, %v3866_v29  ;;  %p4329_p11 = scmp.ne.s32.totalorder %s6643_s9, %s4328_s19 }
 0x160   : > { %v3882_v48 = vunpack.i.h.bf16 %v3880_v14  ;;  %v3881_v31 = vunpack.i.l.bf16 %v3880_v14  ;;  %v3875_v35 = vpop.permute.xlu0 %3874 }
 0x161   : > { %4169 = vrot.lane.b32.xlu1 %v4168_v22, %s4402_s20  ;;  %v3877_v51 = vunpack.i.h.bf16 %v3875_v35  ;;  %v3876_v19 = vunpack.i.l.bf16 %v3875_v35  ;;  %v4193_v22 = vpack.i.bf16 %v5861_v28, %v3197_v11  ;;  %p4330_p12 = pnand %p4329_p11, %p4468_p5 }
 0x162   : > { %v2278_v12 = vsel %vm1064_vm1, %v2270_v24, %v3881_v31  ;;  %v2279_v59 = vsel %vm1064_vm1, %v2271_v5, %v3882_v48  ;;  %4164 = vrot.lane.b32.xlu0 %v4163_v26, %s4402_s20  ;;  %v4208_v24 = vpack.i.bf16 %v3097_v55, %v5878_v17 }
 0x163   : > { %v3890_v25 = vpop.permute.xlu1 %3889  ;;  %v2277_v33 = vsel %vm1055_vm0, %v5905_v40, %v3877_v51  ;;  %v2276_v26 = vsel %vm1055_vm0, %v3097_v55, %v3876_v19  ;;  %v3216_v55 = vld [vmem:[%s4483_s28 + $0x132] sm:$0xff]  ;;  %p4331_p13 = pneg %p4330_p12 }
 0x164   : > { %v3892_v15 = vunpack.i.h.bf16 %v3890_v25  ;;  %v3891_v1 = vunpack.i.l.bf16 %v3890_v25  ;;  %v3885_v23 = vpop.permute.xlu0 %3884 }
 0x165   : > { %v3887_v52 = vunpack.i.h.bf16 %v3885_v23  ;;  %v3886_v2 = vunpack.i.l.bf16 %v3885_v23  ;;  %4179 = vrot.lane.b32.xlu1 %v4178_v30, %s4403_s24 }
 0x166   : > { %v2280_v38 = vsel %vm1064_vm1, %v2272_v3, %v3891_v1  ;;  %v2281_v21 = vsel %vm1064_vm1, %v2273_v20, %v3892_v15  ;;  %4174 = vrot.lane.b32.xlu0 %v4173_v44, %s4403_s24  ;;  %v4218_v15 = vpack.i.bf16 %v3201_v16, %v5834_v32 }
 0x167   : > { %v2282_v8 = vsel %vm1064_vm1, %v2274_v7, %v3886_v2  ;;  %v2283_v6 = vsel %vm1064_vm1, %v2275_v39, %v3887_v52  ;;  %v3900_v60 = vpop.permute.xlu1 %3899 }
 0x168   : > { %v3902_v45 = vunpack.i.h.bf16 %v3900_v60  ;;  %v3901_v62 = vunpack.i.l.bf16 %v3900_v60  ;;  %v3895_v46 = vpop.permute.xlu0 %3894 }
 0x169   : > { %v3897_v49 = vunpack.i.h.bf16 %v3895_v46  ;;  %v3896_v43 = vunpack.i.l.bf16 %v3895_v46  ;;  %4189 = vrot.lane.b32.xlu1 %v4188_v27, %s4404_s25 }
 0x16a   : > { %v2286_v14 = vsel %vm1073_vm2, %v2278_v12, %v3901_v62  ;;  %v2287_v30 = vsel %vm1073_vm2, %v2279_v59, %v3902_v45  ;;  %4184 = vrot.lane.b32.xlu0 %v4183_v37, %s4404_s25  ;;  %v4203_v12 = vpack.i.bf16 %v5868_v56, %v5853_v13  ;;  %v4213_v13 = vpack.i.bf16 %v3197_v11, %v5846_v61  ;;  %v3210_v56 = vld [vmem:[%s4483_s28 + $0xa2] sm:$0xff] }
 0x16b   : > { %v2284_v10 = vsel %vm1064_vm1, %v2276_v26, %v3896_v43  ;;  %v2285_v63 = vsel %vm1064_vm1, %v2277_v33, %v3897_v49  ;;  %v3910_v48 = vpop.permute.xlu1 %3909  ;;  %v3215_v11 = vld [vmem:[%s4483_s28 + $0x122] sm:$0xff] }
 0x16c   : > { %v3912_v31 = vunpack.i.h.bf16 %v3910_v48  ;;  %v3911_v35 = vunpack.i.l.bf16 %v3910_v48  ;;  %v3905_v34 = vpop.permute.xlu0 %3904  ;;  %v3211_v45 = vld [vmem:[%s4483_s28 + $0xe2] sm:$0xff]  ;;  %v4238_v50 = vpack.i.bf16 %v3216_v55, %v3215_v11 }
 0x16d   : > { %v3907_v28 = vunpack.i.h.bf16 %v3905_v34  ;;  %v3906_v5 = vunpack.i.l.bf16 %v3905_v34  ;;  %4199 = vrot.lane.b32.xlu1 %v4198_v58, %s4402_s20  ;;  %v3217_v26 = vld [vmem:[%s4483_s28 + $0x142] sm:$0xff] }
 0x16e   : > { %v2288_v0 = vsel %vm1073_vm2, %v2280_v38, %v3911_v35  ;;  %v2289_v29 = vsel %vm1073_vm2, %v2281_v21, %v3912_v31  ;;  %4194 = vrot.lane.b32.xlu0 %v4193_v22, %s4402_s20  ;;  %v4228_v21 = vpack.i.bf16 %v3210_v56, %v5905_v40  ;;  %v3212_v40 = vld [vmem:[%s4483_s28 + $0xf2] sm:$0xff]  ;;  %v3213_v48 = vld [vmem:[%s4483_s28 + $0x102] sm:$0xff]  ;;  %s4409_s20 = smov [#allocation4]  }
 0x16f   : > { %v2290_v59 = vsel %vm1073_vm2, %v2282_v8, %v3906_v5  ;;  %v2291_v44 = vsel %vm1073_vm2, %v2283_v6, %v3907_v28  ;;  %v3920_v25 = vpop.permute.xlu1 %3919  ;;  %v4233_v33 = vpack.i.bf16 %v3212_v40, %v3211_v45  ;;  %v3214_v31 = vld [vmem:[%s4483_s28 + $0x112] sm:$0xff] }
 0x170   : > { %v3922_v27 = vunpack.i.h.bf16 %v3920_v25  ;;  %v3921_v37 = vunpack.i.l.bf16 %v3920_v25  ;;  %v3915_v20 = vpop.permute.xlu0 %3914 }
 0x171   : > { %v3917_v3 = vunpack.i.h.bf16 %v3915_v20  ;;  %v3916_v17 = vunpack.i.l.bf16 %v3915_v20  ;;  %4209 = vrot.lane.b32.xlu1 %v4208_v24, %s4403_s24 }
 0x172   : > { %v2294_v1 = vsel %vm1082_vm3, %v2286_v14, %v3921_v37  ;;  %v2295_v23 = vsel %vm1082_vm3, %v2287_v30, %v3922_v27  ;;  %4204 = vrot.lane.b32.xlu0 %v4203_v12, %s4403_s24  ;;  %v3218_v14 = vld [vmem:[%s4483_s28 + $0x152] sm:$0xff] }
 0x173   : > { %v2292_v39 = vsel %vm1073_vm2, %v2284_v10, %v3916_v17  ;;  %v2293_v7 = vsel %vm1073_vm2, %v2285_v63, %v3917_v3  ;;  %v3930_v52 = vpop.permute.xlu1 %3929 }
 0x174   : > { %v3932_v2 = vunpack.i.h.bf16 %v3930_v52  ;;  %v3931_v51 = vunpack.i.l.bf16 %v3930_v52  ;;  %v3925_v32 = vpop.permute.xlu0 %3924 }
 0x175   : > { %v3927_v19 = vunpack.i.h.bf16 %v3925_v32  ;;  %v3926_v38 = vunpack.i.l.bf16 %v3925_v32  ;;  %4219 = vrot.lane.b32.xlu1 %v4218_v15, %s4404_s25 }
 0x176   : > { %v2296_v61 = vsel %vm1082_vm3, %v2288_v0, %v3931_v51  ;;  %v2297_v16 = vsel %vm1082_vm3, %v2289_v29, %v3932_v2  ;;  %4214 = vrot.lane.b32.xlu0 %v4213_v13, %s4404_s25  ;;  %v4248_v0 = vpack.i.bf16 %v3218_v14, %v3217_v26 }
 0x177   : > { %v2298_v8 = vsel %vm1082_vm3, %v2290_v59, %v3926_v38  ;;  %v2299_v6 = vsel %vm1082_vm3, %v2291_v44, %v3927_v19  ;;  %v3940_v60 = vpop.permute.xlu1 %3939  ;;  %v4243_v59 = vpack.i.bf16 %v3214_v31, %v3213_v48 }
 0x178   : > { %v3942_v62 = vunpack.i.h.bf16 %v3940_v60  ;;  %v3941_v46 = vunpack.i.l.bf16 %v3940_v60  ;;  %v3935_v49 = vpop.permute.xlu0 %3934 }
 0x179   : > { %v3937_v43 = vunpack.i.h.bf16 %v3935_v49  ;;  %v3936_v58 = vunpack.i.l.bf16 %v3935_v49  ;;  %4229 = vrot.lane.b32.xlu1 %v4228_v21, %s4403_s24 }
 0x17a   : > { %v2302_v53 = vsel %vm1091_vm4, %v2294_v1, %v3941_v46  ;;  %v2303_v22 = vsel %vm1091_vm4, %v2295_v23, %v3942_v62  ;;  %4224 = vrot.lane.b32.xlu0 %v4223_v41, %s4403_s24  ;;  %s4332_s24 = sshll.u32 %s4409_s20, 4  ;;  %s4333_s24 = int_to_ptr.vmem [resolvable:$false] %s4332_s24 }
 0x17b   : > { %v2300_v30 = vsel %vm1082_vm3, %v2292_v39, %v3936_v58  ;;  %v2301_v10 = vsel %vm1082_vm3, %v2293_v7, %v3937_v43  ;;  %v3950_v63 = vpop.permute.xlu1 %3949  ;;  %p4335_p0 = scmp.lt.s32.totalorder %s6643_s9, %s4333_s24 }
 0x17c   : > { %v3952_v35 = vunpack.i.h.bf16 %v3950_v63  ;;  %v3951_v34 = vunpack.i.l.bf16 %v3950_v63  ;;  %v3945_v28 = vpop.permute.xlu0 %3944 }
 0x17d   : > { %v3947_v5 = vunpack.i.h.bf16 %v3945_v28  ;;  %v3946_v24 = vunpack.i.l.bf16 %v3945_v28  ;;  %4239 = vrot.lane.b32.xlu1 %v4238_v50, %s4404_s25 }
 0x17e   : > { %v2304_v29 = vsel %vm1091_vm4, %v2296_v61, %v3951_v34  ;;  %v2305_v12 = vsel %vm1091_vm4, %v2297_v16, %v3952_v35  ;;  %4234 = vrot.lane.b32.xlu0 %v4233_v33, %s4404_s25 }
 0x17f   : > { %v2306_v44 = vsel %vm1091_vm4, %v2298_v8, %v3946_v24  ;;  %v2307_v25 = vsel %vm1091_vm4, %v2299_v6, %v3947_v5  ;;  %v3960_v27 = vpop.permute.xlu1 %3959 }
 0x180   : > { %v3962_v37 = vunpack.i.h.bf16 %v3960_v27  ;;  %v3961_v20 = vunpack.i.l.bf16 %v3960_v27  ;;  %v3955_v3 = vpop.permute.xlu0 %3954 }
 0x181   : > { %v3957_v17 = vunpack.i.h.bf16 %v3955_v3  ;;  %v3956_v15 = vunpack.i.l.bf16 %v3955_v3  ;;  %4249 = vrot.lane.b32.xlu1 %v4248_v0, %s4404_s25 }
 0x182   : > { %v2310_v1 = vsel %vm1100_vm5, %v2302_v53, %v3961_v20  ;;  %v2311_v23 = vsel %vm1100_vm5, %v2303_v22, %v3962_v37  ;;  %4244 = vrot.lane.b32.xlu0 %v4243_v59, %s4404_s25  ;;  %s4334_s25 = scalar_lea.vmem %s4333_s24, 512 }
 0x183   : > { %v2308_v13 = vsel %vm1091_vm4, %v2300_v30, %v3956_v15  ;;  %v2309_v56 = vsel %vm1091_vm4, %v2301_v10, %v3957_v17  ;;  %v3970_v39 = vpop.permute.xlu1 %3969  ;;  %p4336_p1 = scmp.lt.s32.totalorder %s4334_s25, %s4328_s19 }
 0x184   : > { %v3972_v7 = vunpack.i.h.bf16 %v3970_v39  ;;  %v3971_v52 = vunpack.i.l.bf16 %v3970_v39  ;;  %v3965_v2 = vpop.permute.xlu0 %3964 }
 0x185   : > { %v3967_v51 = vunpack.i.h.bf16 %v3965_v2  ;;  %v3966_v32 = vunpack.i.l.bf16 %v3965_v2  ;;  %p4337_p2 = por %p4336_p1, %p4335_p0 }
 0x186   : > { %v2312_v19 = vsel %vm1100_vm5, %v2304_v29, %v3971_v52  ;;  %v2313_v38 = vsel %vm1100_vm5, %v2305_v12, %v3972_v7 }
 0x187   : > { %v2314_v21 = vsel %vm1100_vm5, %v2306_v44, %v3966_v32  ;;  %v2315_v61 = vsel %vm1100_vm5, %v2307_v25, %v3967_v51  ;;  %v3980_v16 = vpop.permute.xlu1 %3979  ;;  %p4338_p3 = pnand %p4337_p2, %p4331_p13 }
 0x188   : > { %v3982_v41 = vunpack.i.h.bf16 %v3980_v16  ;;  %v3981_v11 = vunpack.i.l.bf16 %v3980_v16  ;;  %v3975_v55 = vpop.permute.xlu0 %3974 }
 0x189   : > { %v3977_v8 = vunpack.i.h.bf16 %v3975_v55  ;;  %v3976_v6 = vunpack.i.l.bf16 %v3975_v55 }
 0x18a   : > { %v2318_v60 = vsel %vm1109_vm6, %v2310_v1, %v3981_v11  ;;  %v2319_v45 = vsel %vm1109_vm6, %v2311_v23, %v3982_v41 }
 0x18b   : > { %v2316_v40 = vsel %vm1100_vm5, %v2308_v13, %v3976_v6  ;;  %v2317_v62 = vsel %vm1100_vm5, %v2309_v56, %v3977_v8  ;;  %v3990_v46 = vpop.permute.xlu1 %3989 }
 0x18c   : > { %v3992_v49 = vunpack.i.h.bf16 %v3990_v46  ;;  %v3991_v43 = vunpack.i.l.bf16 %v3990_v46  ;;  %v3985_v58 = vpop.permute.xlu0 %3984 }
 0x18d   : > { %v3987_v50 = vunpack.i.h.bf16 %v3985_v58  ;;  %v3986_v53 = vunpack.i.l.bf16 %v3985_v58 }
 0x18e   : > { %v2320_v22 = vsel %vm1109_vm6, %v2312_v19, %v3991_v43  ;;  %v2321_v33 = vsel %vm1109_vm6, %v2313_v38, %v3992_v49 }
 0x18f   : > { %v2322_v26 = vsel %vm1109_vm6, %v2314_v21, %v3986_v53  ;;  %v2323_v14 = vsel %vm1109_vm6, %v2315_v61, %v3987_v50  ;;  %v4000_v30 = vpop.permute.xlu1 %3999 }
 0x190   : > { %v4002_v10 = vunpack.i.h.bf16 %v4000_v30  ;;  %v4001_v63 = vunpack.i.l.bf16 %v4000_v30  ;;  %v3995_v48 = vpop.permute.xlu0 %3994 }
 0x191   : > { %v3997_v31 = vunpack.i.h.bf16 %v3995_v48  ;;  %v3996_v35 = vunpack.i.l.bf16 %v3995_v48 }
 0x192   : > { %v2326_v34 = vsel %vm1118_vm7, %v2318_v60, %v4001_v63  ;;  %v2327_v28 = vsel %vm1118_vm7, %v2319_v45, %v4002_v10 }
 0x193   : > { %v2324_v5 = vsel %vm1109_vm6, %v2316_v40, %v3996_v35  ;;  %v2325_v24 = vsel %vm1109_vm6, %v2317_v62, %v3997_v31  ;;  %v4010_v0 = vpop.permute.xlu1 %4009 }
 0x194   : > { %v4012_v29 = vunpack.i.h.bf16 %v4010_v0  ;;  %v4011_v12 = vunpack.i.l.bf16 %v4010_v0  ;;  %v4005_v59 = vpop.permute.xlu0 %4004 }
 0x195   : > { %v4007_v44 = vunpack.i.h.bf16 %v4005_v59  ;;  %v4006_v25 = vunpack.i.l.bf16 %v4005_v59 }
 0x196   : > { %v2328_v27 = vsel %vm1118_vm7, %v2320_v22, %v4011_v12  ;;  %v2329_v37 = vsel %vm1118_vm7, %v2321_v33, %v4012_v29 }
 0x197   : > { %v2330_v20 = vsel %vm1118_vm7, %v2322_v26, %v4006_v25  ;;  %v2331_v3 = vsel %vm1118_vm7, %v2323_v14, %v4007_v44  ;;  %v4020_v17 = vpop.permute.xlu1 %4019 }
 0x198   : > { %v4022_v15 = vunpack.i.h.bf16 %v4020_v17  ;;  %v4021_v1 = vunpack.i.l.bf16 %v4020_v17  ;;  %v4015_v23 = vpop.permute.xlu0 %4014 }
 0x199   : > { %v4017_v13 = vunpack.i.h.bf16 %v4015_v23  ;;  %v4016_v56 = vunpack.i.l.bf16 %v4015_v23 }
 0x19a   : > { %v2334_v39 = vsel %vm1127_vm8, %v2326_v34, %v4021_v1  ;;  %v2335_v7 = vsel %vm1127_vm8, %v2327_v28, %v4022_v15 }
 0x19b   : > { %v2332_v52 = vsel %vm1118_vm7, %v2324_v5, %v4016_v56  ;;  %v2333_v2 = vsel %vm1118_vm7, %v2325_v24, %v4017_v13  ;;  %v4030_v51 = vpop.permute.xlu1 %4029 }
 0x19c   : > { %v4025_v32 = vpop.permute.xlu0 %4024 }
 0x19d   : > { %v4027_v19 = vunpack.i.h.bf16 %v4025_v32  ;;  %v4026_v38 = vunpack.i.l.bf16 %v4025_v32 }
 0x19f   : > { %v2338_v21 = vsel %vm1127_vm8, %v2330_v20, %v4026_v38  ;;  %v2339_v61 = vsel %vm1127_vm8, %v2331_v3, %v4027_v19  ;;  %v4040_v16 = vpop.permute.xlu1 %4039  ;;  %v4031_v20 = vunpack.i.l.bf16 %v4030_v51  ;;  %v4032_v3 = vunpack.i.h.bf16 %v4030_v51 }
 0x1a0   : > { %v4042_v41 = vunpack.i.h.bf16 %v4040_v16  ;;  %v4041_v11 = vunpack.i.l.bf16 %v4040_v16  ;;  %v4035_v55 = vpop.permute.xlu0 %4034 }
 0x1a1   : > { %v4037_v8 = vunpack.i.h.bf16 %v4035_v55  ;;  %v4036_v6 = vunpack.i.l.bf16 %v4035_v55  ;;  %v1755_v51 = vsel %vm1145_vm10, %v5817_v47, %v4032_v3 }
 0x1a2   : > { %v5999_v60 = vsel %vm1127_vm8, %v2332_v52, %v4041_v11  ;;  %v6002_v45 = vsel %vm1127_vm8, %v2333_v2, %v4042_v41  ;;  %v1754_v2 = vsel %vm1145_vm10, %v5814_v36, %v4031_v20 }
 0x1a3   : > { %v6005_v40 = vsel %vm1127_vm8, %v2329_v37, %v4037_v8  ;;  %v6008_v62 = vsel %vm1127_vm8, %v2328_v27, %v4036_v6  ;;  %v4050_v46 = vpop.permute.xlu1 %4049 }
 0x1a4   : > { %v4052_v49 = vunpack.i.h.bf16 %v4050_v46  ;;  %v4051_v43 = vunpack.i.l.bf16 %v4050_v46  ;;  %v4045_v58 = vpop.permute.xlu0 %4044 }
 0x1a5   : > { %v4047_v50 = vunpack.i.h.bf16 %v4045_v58  ;;  %v4046_v53 = vunpack.i.l.bf16 %v4045_v58 }
 0x1a6   : > { %v6011_v22 = vsel %vm1136_vm9, %v2338_v21, %v4051_v43  ;;  %v6014_v33 = vsel %vm1136_vm9, %v2339_v61, %v4052_v49 }
 0x1a7   : > { %v6017_v26 = vsel %vm1136_vm9, %v2335_v7, %v4047_v50  ;;  %v6020_v14 = vsel %vm1136_vm9, %v2334_v39, %v4046_v53  ;;  %v4060_v30 = vpop.permute.xlu1 %4059 }
 0x1a8   : > { %v4055_v10 = vpop.permute.xlu0 %4054  ;;  %v4062_v17 = vunpack.i.h.bf16 %v4060_v30  ;;  %v4061_v15 = vunpack.i.l.bf16 %v4060_v30 }
 0x1a9   : > { %v4057_v23 = vunpack.i.h.bf16 %v4055_v10  ;;  %v4056_v13 = vunpack.i.l.bf16 %v4055_v10 }
 0x1aa   : > { %v1756_v19 = vsel %vm1145_vm10, %v5799_v9, %v4061_v15  ;;  %v1757_v38 = vsel %vm1145_vm10, %v5802_v57, %v4062_v17 }
 0x1ab   : > { %v4070_v63 = vpop.permute.xlu1 %4069  ;;  %v1753_v16 = vsel %vm1145_vm10, %v5771_v4, %v4057_v23  ;;  %v1752_v36 = vsel %vm1145_vm10, %v5768_v42, %v4056_v13 }
 0x1ac   : > { %v4065_v48 = vpop.permute.xlu0 %4064  ;;  %v4071_v56 = vunpack.i.l.bf16 %v4070_v63  ;;  %v4072_v7 = vunpack.i.h.bf16 %v4070_v63  ;;  %v3223_v63 = vld [vmem:[%s4483_s28 + $0x73] sm:$0xff] }
 0x1ad   : > { %v4066_v52 = vunpack.i.l.bf16 %v4065_v48  ;;  %v4067_v32 = vunpack.i.h.bf16 %v4065_v48 }
 0x1ae   : > { %v1762_v41 = vsel %vm1154_vm11, %v1754_v2, %v4071_v56  ;;  %v1763_v47 = vsel %vm1154_vm11, %v1755_v51, %v4072_v7 }
 0x1af   : > { %v4080_v31 = vpop.permute.xlu1 %4079  ;;  %v1758_v9 = vsel %vm1154_vm11, %v5837_v54, %v4066_v52  ;;  %v1759_v6 = vsel %vm1154_vm11, %v5840_v18, %v4067_v32 }
 0x1b0   : > { %v4075_v35 = vpop.permute.xlu0 %4074  ;;  %v4081_v21 = vunpack.i.l.bf16 %v4080_v31  ;;  %v4082_v11 = vunpack.i.h.bf16 %v4080_v31 }
 0x1b1   : > { %v4077_v57 = vunpack.i.h.bf16 %v4075_v35  ;;  %v4076_v8 = vunpack.i.l.bf16 %v4075_v35 }
 0x1b2   : > { %v6077_v49 = vsel %vm1136_vm9, %v5999_v60, %v4081_v21  ;;  %v6086_v18 = vsel %vm1136_vm9, %v6002_v45, %v4082_v11 }
 0x1b3   : > { %v6022_v34 = vpop.permute.xlu1 %4089  ;;  %v6096_v48 = vsel %vm1136_vm9, %v6008_v62, %v4076_v8  ;;  %v6100_v31 = vsel %vm1136_vm9, %v6005_v40, %v4077_v57 }
 0x1b4   : > { %v6024_v28 = vpop.permute.xlu0 %4084  ;;  %v4092_v4 = vunpack.i.h.bf16 %v6022_v34  ;;  %v4091_v42 = vunpack.i.l.bf16 %v6022_v34  ;;  %v3224_v34 = vld [vmem:[%s4483_s28 + $0x83] sm:$0xff] }
 0x1b5   : > { %v4086_v46 = vunpack.i.l.bf16 %v6024_v28  ;;  %v4087_v43 = vunpack.i.h.bf16 %v6024_v28  ;;  %v4313_v28 = vld [vmem:[%s6689_s1 + $0x38] sm:$0xff]   ;;  %v6149_v23 = vsel %vm1055_vm0, %v3224_v34, 0.0 }
 0x1b6   : > { %v6113_v62 = vsel %vm1145_vm10, %v6011_v22, %v4091_v42  ;;  %v6117_v40 = vsel %vm1145_vm10, %v6014_v33, %v4092_v4  ;;  %v6137_v33 = vsel %vm1055_vm0, %v3223_v63, 0.0  ;;  %3254 = vmatprep.subr.bf16.mxu0 %v4313_v28  ;;  %3278 = vmatprep.subr.bf16.mxu1 %v4313_v28 }
 0x1b7   : > { %v6026_v5 = vpop.permute.xlu1 %4099  ;;  %v6126_v20 = vsel %vm1145_vm10, %v6017_v26, %v4087_v43  ;;  %3255 = vmatpush3.bf16.msra.mxu0 %v4313_v28  ;;  %3286 = vmatpush3.bf16.msra.mxu1 %v4313_v28 }
 0x1b8   : > { %v6028_v24 = vpop.permute.xlu0 %4094  ;;  %v4102_v54 = vunpack.i.h.bf16 %v6026_v5  ;;  %v4101_v58 = vunpack.i.l.bf16 %v6026_v5  ;;  %v4314_v5 = vld [vmem:[%s6689_s1 + $0x30] sm:$0xff]  }
 0x1b9   : > { %v4097_v53 = vunpack.i.h.bf16 %v6028_v24  ;;  %v4096_v30 = vunpack.i.l.bf16 %v6028_v24  ;;  %v6121_v24 = vsel %vm1145_vm10, %v6020_v14, %v4086_v46  ;;  %3256 = vmatprep.subr.bf16.mxu0 %v4314_v5  ;;  %3279 = vmatprep.subr.bf16.mxu1 %v4314_v5 }
 0x1ba   : > { %v6129_v3 = vsel %vm1154_vm11, %v1756_v19, %v4101_v58  ;;  %v6132_v22 = vsel %vm1154_vm11, %v1757_v38, %v4102_v54 }
 0x1bb   : > { %v6030_v0 = vpop.permute.xlu1 %4109  ;;  %v6140_v14 = vsel %vm1154_vm11, %v1752_v36, %v4096_v30  ;;  %3257 = vmatpush3.bf16.msra.mxu0 %v4314_v5  ;;  %3287 = vmatpush3.bf16.msra.mxu1 %v4314_v5 }
 0x1bc   : > { %v6032_v29 = vpop.permute.xlu0 %4104  ;;  %v4111_v60 = vunpack.i.l.bf16 %v6030_v0  ;;  %v4112_v45 = vunpack.i.h.bf16 %v6030_v0 }
 0x1bd   : > { %v4106_v35 = vunpack.i.l.bf16 %v6032_v29  ;;  %v4107_v0 = vunpack.i.h.bf16 %v6032_v29  ;;  %v6143_v29 = vsel %vm1154_vm11, %v1753_v16, %v4097_v53 }
 0x1be   : > { %v1770_v26 = vsel %vm1163_vm12, %v1762_v41, %v4111_v60  ;;  %v1771_v13 = vsel %vm1163_vm12, %v1763_v47, %v4112_v45 }
 0x1bf   : > { %v6034_v12 = vpop.permute.xlu1 %4119  ;;  %v1766_v56 = vsel %vm1163_vm12, %v1758_v9, %v4106_v35  ;;  %v1767_v2 = vsel %vm1163_vm12, %v1759_v6, %v4107_v0 }
 0x1c0   : > { %v6036_v59 = vpop.permute.xlu0 %4114  ;;  %v4122_v32 = vunpack.i.h.bf16 %v6034_v12  ;;  %v4121_v38 = vunpack.i.l.bf16 %v6034_v12 }
 0x1c1   : > { %v4117_v21 = vunpack.i.h.bf16 %v6036_v59  ;;  %v4116_v16 = vunpack.i.l.bf16 %v6036_v59 }
 0x1c2   : > { %v2356_v30 = vsel %vm1145_vm10, %v6077_v49, %v4121_v38  ;;  %v6187_v34 = vsel %vm1145_vm10, %v6086_v18, %v4122_v32 }
 0x1c3   : > { %v6038_v44 = vpop.permute.xlu1 %4129  ;;  %v6191_v28 = vsel %vm1145_vm10, %v6096_v48, %v4116_v16 }
 0x1c4   : > { %v6040_v25 = vpop.permute.xlu0 %4124  ;;  %v4132_v36 = vunpack.i.h.bf16 %v6038_v44 }
 0x1c5   : > { %v4127_v11 = vunpack.i.h.bf16 %v6040_v25  ;;  %v4126_v46 = vunpack.i.l.bf16 %v6040_v25  ;;  %v4315_v25 = vld [vmem:[%s6689_s1 + $0x28] sm:$0xff]  }
 0x1c6   : > { %v6206_v18 = vsel %vm1154_vm11, %v6117_v40, %v4132_v36  ;;  %3258 = vmatprep.subr.bf16.mxu0 %v4315_v25  ;;  %3280 = vmatprep.subr.bf16.mxu1 %v4315_v25  ;;  %v4316_v40 = vld [vmem:[%s6689_s1 + $0x20] sm:$0xff]  }
 0x1c7   : > { %v6042_v27 = vpop.permute.xlu1 %4139  ;;  %3259 = vmatpush3.bf16.msra.mxu0 %v4315_v25  ;;  %3288 = vmatpush3.bf16.msra.mxu1 %v4315_v25 }
 0x1c8   : > { %v6044_v37 = vpop.permute.xlu0 %4134  ;;  %v4142_v60 = vunpack.i.h.bf16 %v6042_v27  ;;  %v4141_v63 = vunpack.i.l.bf16 %v6042_v27  ;;  %v6198_v27 = vsel %vm1145_vm10, %v6100_v31, %v4117_v21  ;;  %v6216_v31 = vsel %vm1154_vm11, %v6126_v20, %v4127_v11  ;;  %3260 = vmatprep.subr.bf16.mxu0 %v4316_v40  ;;  %3281 = vmatprep.subr.bf16.mxu1 %v4316_v40 }
 0x1c9   : > { %v4137_v49 = vunpack.i.h.bf16 %v6044_v37  ;;  %v4136_v5 = vunpack.i.l.bf16 %v6044_v37  ;;  %v6212_v37 = vsel %vm1154_vm11, %v6121_v24, %v4126_v46 }
 0x1ca   : > { %v1772_v24 = vsel %vm1163_vm12, %v6129_v3, %v4141_v63 }
 0x1cb   : > { %v6046_v1 = vpop.permute.xlu1 %4149  ;;  %3261 = vmatpush3.bf16.msra.mxu0 %v4316_v40  ;;  %3289 = vmatpush3.bf16.msra.mxu1 %v4316_v40 }
 0x1cc   : > { %v6048_v39 = vpop.permute.xlu0 %4144  ;;  %v4152_v7 = vunpack.i.h.bf16 %v6046_v1  ;;  %v4151_v52 = vunpack.i.l.bf16 %v6046_v1  ;;  %v4131_v1 = vunpack.i.l.bf16 %v6038_v44 }
 0x1cd   : > { %v4147_v51 = vunpack.i.h.bf16 %v6048_v39  ;;  %v4146_v19 = vunpack.i.l.bf16 %v6048_v39 }
 0x1ce   : > { %v1778_v39 = vsel %vm1172_vm13, %v1770_v26, %v4151_v52  ;;  %v1779_v12 = vsel %vm1172_vm13, %v1771_v13, %v4152_v7  ;;  %v6202_v0 = vsel %vm1154_vm11, %v6113_v62, %v4131_v1 }
 0x1cf   : > { %v6058_v61 = vpop.permute.xlu1 %4159  ;;  %v1774_v59 = vsel %vm1172_vm13, %v1766_v56, %v4146_v19  ;;  %v1775_v4 = vsel %vm1172_vm13, %v1767_v2, %v4147_v51  ;;  %v1773_v56 = vsel %vm1163_vm12, %v6132_v22, %v4142_v60  ;;  %v1769_v2 = vsel %vm1163_vm12, %v6143_v29, %v4137_v49 }
 0x1d0   : > { %v6065_v55 = vpop.permute.xlu0 %4154  ;;  %v4161_v48 = vunpack.i.l.bf16 %v6058_v61  ;;  %v4162_v32 = vunpack.i.h.bf16 %v6058_v61 }
 0x1d1   : > { %v4157_v3 = vunpack.i.h.bf16 %v6065_v55  ;;  %v4156_v51 = vunpack.i.l.bf16 %v6065_v55 }
 0x1d2   : > { %v2364_v22 = vsel %vm1154_vm11, %v2356_v30, %v4161_v48  ;;  %v2365_v46 = vsel %vm1154_vm11, %v6187_v34, %v4162_v32  ;;  %v4318_v30 = vld [vmem:[%s6689_s1 + $0x10] sm:$0xff]  }
 0x1d3   : > { %v6082_v50 = vpop.permute.xlu1 %4169  ;;  %v2361_v60 = vsel %vm1154_vm11, %v6198_v27, %v4157_v3 }
 0x1d4   : > { %v6091_v10 = vpop.permute.xlu0 %4164  ;;  %v4171_v19 = vunpack.i.l.bf16 %v6082_v50 }
 0x1d5   : > { %v4167_v38 = vunpack.i.h.bf16 %v6091_v10 }
 0x1d6   : > { %v2370_v63 = vsel %vm1163_vm12, %v6202_v0, %v4171_v19 }
 0x1d7   : > { %v6134_v17 = vpop.permute.xlu1 %4179  ;;  %v2367_v34 = vsel %vm1163_vm12, %v6216_v31, %v4167_v38  ;;  %v3219_v38 = vld [vmem:[%s4483_s28 + $0x33] sm:$0xff] }
 0x1d8   : > { %v6146_v15 = vpop.permute.xlu0 %4174  ;;  %v4182_v62 = vunpack.i.h.bf16 %v6134_v17  ;;  %v4181_v26 = vunpack.i.l.bf16 %v6134_v17  ;;  %v1768_v17 = vsel %vm1163_vm12, %v6140_v14, %v4136_v5  ;;  %v4166_v14 = vunpack.i.l.bf16 %v6091_v10 }
 0x1d9   : > { %v4177_v20 = vunpack.i.h.bf16 %v6146_v15  ;;  %v4176_v7 = vunpack.i.l.bf16 %v6146_v15  ;;  %v4172_v15 = vunpack.i.h.bf16 %v6082_v50  ;;  %v4317_v50 = vld [vmem:[%s6689_s1 + $0x18] sm:$0xff]  }
 0x1da   : > { %v1780_v29 = vsel %vm1172_vm13, %v1772_v24, %v4181_v26  ;;  %v1781_v61 = vsel %vm1172_vm13, %v1773_v56, %v4182_v62  ;;  %3262 = vmatprep.subr.bf16.mxu0 %v4317_v50  ;;  %3282 = vmatprep.subr.bf16.mxu1 %v4317_v50  ;;  %v2366_v25 = vsel %vm1163_vm12, %v6212_v37, %v4166_v14 }
 0x1db   : > { %v4190_v41 = vpop.permute.xlu1 %4189  ;;  %v1776_v16 = vsel %vm1172_vm13, %v1768_v17, %v4176_v7  ;;  %v1777_v36 = vsel %vm1172_vm13, %v1769_v2, %v4177_v20  ;;  %3263 = vmatpush3.bf16.msra.mxu0 %v4317_v50  ;;  %3290 = vmatpush3.bf16.msra.mxu1 %v4317_v50 }
 0x1dc   : > { %v4192_v47 = vunpack.i.h.bf16 %v4190_v41  ;;  %v4191_v9 = vunpack.i.l.bf16 %v4190_v41  ;;  %v4185_v57 = vpop.permute.xlu0 %4184  ;;  %3264 = vmatprep.subr.bf16.mxu0 %v4318_v30  ;;  %3283 = vmatprep.subr.bf16.mxu1 %v4318_v30 }
 0x1dd   : > { %v4187_v8 = vunpack.i.h.bf16 %v4185_v57  ;;  %v4186_v6 = vunpack.i.l.bf16 %v4185_v57 }
 0x1de   : > { %v1786_v42 = vsel %vm1181_vm14, %v1778_v39, %v4191_v9  ;;  %v1787_v44 = vsel %vm1181_vm14, %v1779_v12, %v4192_v47 }
 0x1df   : > { %v4258_v43 = vpack.i.bf16 %v1787_v44, %v1786_v42  ;;  %v1782_v54 = vsel %vm1181_vm14, %v1774_v59, %v4186_v6  ;;  %v1783_v58 = vsel %vm1181_vm14, %v1775_v4, %v4187_v8  ;;  %v6174_v53 = vpop.permute.xlu1 %4199  ;;  %3265 = vmatpush3.bf16.msra.mxu0 %v4318_v30  ;;  %3291 = vmatpush3.bf16.msra.mxu1 %v4318_v30 }
 0x1e0   : > { %v4253_v45 = vpack.i.bf16 %v1783_v58, %v1782_v54  ;;  %v6180_v35 = vpop.permute.xlu0 %4194  ;;  %v4202_v10 = vunpack.i.h.bf16 %v6174_v53  ;;  %v4201_v11 = vunpack.i.l.bf16 %v6174_v53 }
 0x1e1   : > { %4259 = vrot.lane.b32.xlu1 %v4258_v43, %s4405_s7  ;;  %v4196_v57 = vunpack.i.l.bf16 %v6180_v35  ;;  %v2360_v43 = vsel %vm1154_vm11, %v6191_v28, %v4156_v51  ;;  %v4197_v27 = vunpack.i.h.bf16 %v6180_v35  ;;  %v4319_v35 = vld [vmem:[%s6689_s1 + $0x8] sm:$0xff]  }
 0x1e2   : > { %4254 = vrot.lane.b32.xlu0 %v4253_v45, %s4405_s7  ;;  %v2371_v45 = vsel %vm1163_vm12, %v6206_v18, %v4172_v15  ;;  %v2372_v28 = vsel %vm1163_vm12, %v2364_v22, %v4201_v11  ;;  %v2373_v49 = vsel %vm1163_vm12, %v2365_v46, %v4202_v10  ;;  %3266 = vmatprep.subr.bf16.mxu0 %v4319_v35  ;;  %v3222_v46 = vld [vmem:[%s4483_s28 + $0x63] sm:$0xff] }
 0x1e3   : > { %v6220_v13 = vpop.permute.xlu1 %4209  ;;  %v2368_v0 = vsel %vm1163_vm12, %v2360_v43, %v4196_v57  ;;  %3284 = vmatprep.subr.bf16.mxu1 %v4319_v35  ;;  %v2369_v3 = vsel %vm1163_vm12, %v2361_v60, %v4197_v27  ;;  %3267 = vmatpush3.bf16.msra.mxu0 %v4319_v35  ;;  %v2390_v57 = vsel %vm1055_vm0, %v3219_v38, 0.0  ;;  %v4298_v43 = vpack.i.bf16 %v6149_v23, %v6137_v33  ;;  %v6985_v23 = vld [vmem:[#allocation40_spill] sm:$0xff]  ;;  %v6987_v27 = vld [vmem:[#allocation42_spill] sm:$0xff] }
 0x1e4   : > { %v6231_v52 = vpop.permute.xlu0 %4204  ;;  %v4212_v39 = vunpack.i.h.bf16 %v6220_v13  ;;  %v4211_v6 = vunpack.i.l.bf16 %v6220_v13  ;;  %3292 = vmatpush3.bf16.msra.mxu1 %v4319_v35  ;;  %v2393_v60 = vsel %vm1055_vm0, %v3222_v46, 0.0 }
 0x1e5   : > { %v4206_v54 = vunpack.i.l.bf16 %v6231_v52  ;;  %v4207_v5 = vunpack.i.h.bf16 %v6231_v52 }
 0x1e6   : > { %v2378_v18 = vsel %vm1172_vm13, %v2370_v63, %v4211_v6  ;;  %v2379_v48 = vsel %vm1172_vm13, %v2371_v45, %v4212_v39  ;;  %v3366_v45 = vunpack.i.l.bf16 %v6985_v23 }
 0x1e7   : > { %v4220_v21 = vpop.permute.xlu1 %4219  ;;  %v2374_v31 = vsel %vm1172_vm13, %v2366_v25, %v4206_v54  ;;  %v2375_v52 = vsel %vm1172_vm13, %v2367_v34, %v4207_v5  ;;  %v3367_v25 = vunpack.i.h.bf16 %v6985_v23  ;;  %v6986_v34 = vld [vmem:[#allocation41_spill] sm:$0xff]  ;;  %v170_v5 = vld [vmem:[%s4483_s28] sm:$0xff] }
 0x1e8   : > { %v4222_v41 = vunpack.i.h.bf16 %v4220_v21  ;;  %v4221_v55 = vunpack.i.l.bf16 %v4220_v21  ;;  %v4215_v1 = vpop.permute.xlu0 %4214 }
 0x1e9   : > { %v4217_v47 = vunpack.i.h.bf16 %v4215_v1  ;;  %v4216_v9 = vunpack.i.l.bf16 %v4215_v1 }
 0x1ea   : > { %v1788_v12 = vsel %vm1181_vm14, %v1780_v29, %v4221_v55  ;;  %v1789_v8 = vsel %vm1181_vm14, %v1781_v61, %v4222_v41  ;;  %v4320_v41 = vld [vmem:[%s6689_s1] sm:$0xff]  }
 0x1eb   : > { %v4268_v59 = vpack.i.bf16 %v1789_v8, %v1788_v12  ;;  %v1784_v4 = vsel %vm1181_vm14, %v1776_v16, %v4216_v9  ;;  %v1785_v42 = vsel %vm1181_vm14, %v1777_v36, %v4217_v47  ;;  %v4230_v44 = vpop.permute.xlu1 %4229  ;;  %v3220_v36 = vld [vmem:[%s4483_s28 + $0x43] sm:$0xff]  ;;  %3268 = vmatprep.subr.bf16.mxu0 %v4320_v41  ;;  %3285 = vmatprep.subr.bf16.mxu1 %v4320_v41 }
 0x1ec   : > { %v4263_v58 = vpack.i.bf16 %v1785_v42, %v1784_v4  ;;  %v4225_v53 = vpop.permute.xlu0 %4224  ;;  %v4231_v62 = vunpack.i.l.bf16 %v4230_v44  ;;  %v4232_v24 = vunpack.i.h.bf16 %v4230_v44  ;;  %v2391_v6 = vsel %vm1055_vm0, %v3220_v36, 0.0  ;;  %v3226_v4 = vld [vmem:[%s4483_s28 + $0xa3] sm:$0xff]  ;;  %3269 = vmatpush3.bf16.msra.mxu0 %v4320_v41  ;;  %v3221_v44 = vld [vmem:[%s4483_s28 + $0x53] sm:$0xff]  ;;  %3293 = vmatpush3.bf16.msra.mxu1 %v4320_v41 }
 0x1ed   : > { %4269 = vrot.lane.b32.xlu1 %v4268_v59, %s4405_s7  ;;  %v4226_v56 = vunpack.i.l.bf16 %v4225_v53  ;;  %v4227_v17 = vunpack.i.h.bf16 %v4225_v53  ;;  %v3225_v59 = vld [vmem:[%s4483_s28 + $0x93] sm:$0xff]  ;;  %v4293_v54 = vpack.i.bf16 %v2391_v6, %v2390_v57  ;;  %v2397_v53 = vsel %vm1055_vm0, %v3226_v4, 0.0 }
 0x1ee   : > { %4264 = vrot.lane.b32.xlu0 %v4263_v58, %s4405_s7  ;;  %v2380_v14 = vsel %vm1172_vm13, %v2372_v28, %v4231_v62  ;;  %v2381_v55 = vsel %vm1172_vm13, %v2373_v49, %v4232_v24  ;;  %v2396_v58 = vsel %vm1055_vm0, %v3225_v59, 0.0  ;;  %v2392_v30 = vsel %vm1055_vm0, %v3221_v44, 0.0  ;;  %v4322_v62 = vld [vmem:[%s4483_s28 + $0x50] sm:$0xff]  ;;  %s3241_s7 = sshll.u32 %s4451_s16, 8 }
 0x1ef   : > { %v4240_v37 = vpop.permute.xlu1 %4239  ;;  %v2376_v1 = vsel %vm1172_vm13, %v2368_v0, %v4226_v56  ;;  %v2377_v11 = vsel %vm1172_vm13, %v2369_v3, %v4227_v17  ;;  %v4308_v63 = vpack.i.bf16 %v2397_v53, %v2396_v58  ;;  %v4303_v33 = vpack.i.bf16 %v2393_v60, %v2392_v30  ;;  %v4326_v41 = vld [vmem:[%s4483_s28 + $0x30] sm:$0xff]  ;;  %v6996_v60 = vld [vmem:[#allocation51_spill] sm:$0xff]  ;;  %s6641_s11 = scalar_lea.hbm %s6691_s3, %s3241_s7 }
 0x1f0   : > { %v4242_v26 = vunpack.i.h.bf16 %v4240_v37  ;;  %v4241_v13 = vunpack.i.l.bf16 %v4240_v37  ;;  %v4235_v40 = vpop.permute.xlu0 %4234  ;;  %v3357_v28 = vunpack.i.h.bf16 %v6986_v34  ;;  %v3356_v49 = vunpack.i.l.bf16 %v6986_v34  ;;  %v4321_v37 = vld [vmem:[%s4483_s28 + $0x40] sm:$0xff] }
 0x1f1   : > { %v4237_v20 = vunpack.i.h.bf16 %v4235_v40  ;;  %v4236_v7 = vunpack.i.l.bf16 %v4235_v40  ;;  %v3371_v0 = vunpack.i.l.bf16 %v6987_v27  ;;  %v4323_v40 = vld [vmem:[%s4483_s28 + $0x10] sm:$0xff]  ;;  %v3372_v56 = vunpack.i.h.bf16 %v6987_v27 }
 0x1f2   : > { %v2386_v2 = vsel %vm1181_vm14, %v2378_v18, %v4241_v13  ;;  %v2387_v32 = vsel %vm1181_vm14, %v2379_v48, %v4242_v26  ;;  %v6988_v18 = vld [vmem:[#allocation43_spill] sm:$0xff]  ;;  %v1061_v26 = vsel %vm1055_vm0, %v4322_v62, %v3367_v25  ;;  %v1056_v13 = vsel %vm1055_vm0, %v170_v5, %v3356_v49  ;;  %v6998_v49 = vld [vmem:[#allocation53_spill] sm:$0xff] }
 0x1f3   : > { %v4278_v22 = vpack.i.bf16 %v2387_v32, %v2386_v2  ;;  %v2382_v51 = vsel %vm1181_vm14, %v2374_v31, %v4236_v7  ;;  %v2383_v15 = vsel %vm1181_vm14, %v2375_v52, %v4237_v20  ;;  %v4250_v19 = vpop.permute.xlu1 %4249  ;;  %v3361_v48 = vunpack.i.l.bf16 %v6988_v18  ;;  %v4324_v20 = vld [vmem:[%s4483_s28 + $0x60] sm:$0xff]  ;;  %v6989_v52 = vld [vmem:[#allocation44_spill] sm:$0xff] }
 0x1f4   : > { %v4273_v29 = vpack.i.bf16 %v2383_v15, %v2382_v51  ;;  %v4252_v61 = vunpack.i.h.bf16 %v4250_v19  ;;  %v4251_v21 = vunpack.i.l.bf16 %v4250_v19  ;;  %v4245_v16 = vpop.permute.xlu0 %4244  ;;  %v1060_v31 = vsel %vm1055_vm0, %v4321_v37, %v3366_v45  ;;  %v4325_v32 = vld [vmem:[%s4483_s28 + $0x20] sm:$0xff]  ;;  %v6997_v45 = vld [vmem:[#allocation52_spill] sm:$0xff] }
 0x1f5   : > { %v4247_v50 = vunpack.i.h.bf16 %v4245_v16  ;;  %v4246_v10 = vunpack.i.l.bf16 %v4245_v16  ;;  %4279 = vrot.lane.b32.xlu1 %v4278_v22, %s4406_s27  ;;  %v1057_v35 = vsel %vm1055_vm0, %v4323_v40, %v3357_v28  ;;  %v3362_v24 = vunpack.i.h.bf16 %v6988_v18  ;;  %v6990_v22 = vld [vmem:[#allocation45_spill] sm:$0xff]  ;;  %v6991_v19 = vld [vmem:[#allocation46_spill] sm:$0xff]  ;;  %v6993_v16 = vld [vmem:[#allocation48_spill] sm:$0xff] }
 0x1f6   : > { %v2388_v47 = vsel %vm1181_vm14, %v2380_v14, %v4251_v21  ;;  %v2389_v9 = vsel %vm1181_vm14, %v2381_v55, %v4252_v61  ;;  %4274 = vrot.lane.b32.xlu0 %v4273_v29, %s4406_s27  ;;  %v1062_v7 = vsel %vm1055_vm0, %v4324_v20, %v3371_v0  ;;  %v3382_v17 = vunpack.i.h.bf16 %v6989_v52  ;;  %v6992_v29 = vld [vmem:[#allocation47_spill] sm:$0xff]  ;;  %v6999_v0 = vld [vmem:[#allocation54_spill] sm:$0xff] }
 0x1f7   : > { %v4288_v39 = vpack.i.bf16 %v2389_v9, %v2388_v47  ;;  %v2384_v12 = vsel %vm1181_vm14, %v2376_v1, %v4246_v10  ;;  %v2385_v8 = vsel %vm1181_vm14, %v2377_v11, %v4247_v50  ;;  %v3381_v2 = vunpack.i.l.bf16 %v6989_v52  ;;  %v6994_v50 = vld [vmem:[#allocation49_spill] sm:$0xff]  ;;  %v7000_v37 = vld [vmem:[#allocation55_spill] sm:$0xff] }
 0x1f8   : > { %v4283_v42 = vpack.i.bf16 %v2385_v8, %v2384_v12  ;;  %v1058_v3 = vsel %vm1055_vm0, %v4325_v32, %v3361_v48  ;;  %v3377_v51 = vunpack.i.h.bf16 %v6990_v22  ;;  %v3376_v15 = vunpack.i.l.bf16 %v6990_v22  ;;  %v4327_v47 = vld [vmem:[%s4483_s28 + $0x70] sm:$0xff]  ;;  %v6995_v12 = vld [vmem:[#allocation50_spill] sm:$0xff] }
 0x1f9   : > { %4289 = vrot.lane.b32.xlu1 %v4288_v39, %s4406_s27  ;;  %v3391_v38 = vunpack.i.l.bf16 %v6991_v19  ;;  %v3392_v14 = vunpack.i.h.bf16 %v6991_v19  ;;  %v3387_v61 = vunpack.i.h.bf16 %v6992_v29  ;;  %v3386_v21 = vunpack.i.l.bf16 %v6992_v29 }
 0x1fa   : > { %4284 = vrot.lane.b32.xlu0 %v4283_v42, %s4406_s27  ;;  %v3401_v36 = vunpack.i.l.bf16 %v6993_v16  ;;  %v1059_v55 = vsel %vm1055_vm0, %v4326_v41, %v3362_v24  ;;  %v3402_v1 = vunpack.i.h.bf16 %v6993_v16  ;;  %v3397_v10 = vunpack.i.h.bf16 %v6994_v50  ;;  %v7002_v24 = vld [vmem:[#allocation57_spill] sm:$0xff] }
 0x1fb   : > { %v3396_v11 = vunpack.i.l.bf16 %v6994_v50  ;;  %v1063_v9 = vsel %vm1055_vm0, %v4327_v47, %v3372_v56  ;;  %v1067_v57 = vsel %vm1064_vm1, %v1058_v3, %v3381_v2  ;;  %v1068_v39 = vsel %vm1064_vm1, %v1059_v55, %v3382_v17  ;;  %v7003_v2 = vld [vmem:[#allocation58_spill] sm:$0xff]  ;;  %v7005_v50 = vld [vmem:[#allocation8_spill] sm:$0xff] }
 0x1fc   : > { %v3411_v8 = vunpack.i.l.bf16 %v6995_v12  ;;  %v1065_v6 = vsel %vm1064_vm1, %v1056_v13, %v3376_v15  ;;  %v1066_v59 = vsel %vm1064_vm1, %v1057_v35, %v3377_v51  ;;  %v1071_v4 = vsel %vm1064_vm1, %v1062_v7, %v3391_v38 }
 0x1fd   : > { %4299 = vrot.lane.b32.xlu1 %v4298_v43, %s4407_s29  ;;  %v3412_v42 = vunpack.i.h.bf16 %v6995_v12  ;;  %v1072_v44 = vsel %vm1064_vm1, %v1063_v9, %v3392_v14  ;;  %v1069_v46 = vsel %vm1064_vm1, %v1060_v31, %v3386_v21  ;;  %v1070_v43 = vsel %vm1064_vm1, %v1061_v26, %v3387_v61  ;;  %v7001_v26 = vld [vmem:[#allocation56_spill] sm:$0xff]  ;;  %v7007_v12 = vld [vmem:[#allocation7_spill] sm:$0xff] }
 0x1fe   : > { %4294 = vrot.lane.b32.xlu0 %v4293_v54, %s4407_s29  ;;  %v1076_v54 = vsel %vm1073_vm2, %v1067_v57, %v3401_v36  ;;  %v1077_v58 = vsel %vm1073_vm2, %v1068_v39, %v3402_v1  ;;  %v1074_v53 = vsel %vm1073_vm2, %v1065_v6, %v3396_v11  ;;  %v1075_v30 = vsel %vm1073_vm2, %v1066_v59, %v3397_v10  ;;  %v7004_v36 = vld [vmem:[#allocation59_spill] sm:$0xff]  ;;  %v7006_v9 = vld [vmem:[#allocation24_spill] sm:$0xff]  ;;  %v7008_v59 = vld [vmem:[#allocation9_spill] sm:$0xff] }
 0x1ff   : > { %v3407_v23 = vunpack.i.h.bf16 %v6996_v60  ;;  %v3422_v25 = vunpack.i.h.bf16 %v6997_v45  ;;  %v3421_v34 = vunpack.i.l.bf16 %v6997_v45  ;;  %v1081_v28 = vsel %vm1073_vm2, %v1072_v44, %v3412_v42  ;;  %v7009_v44 = vld [vmem:[#allocation10_spill] sm:$0xff] }
 0x200   : > { %v3417_v5 = vunpack.i.h.bf16 %v6998_v49  ;;  %v3416_v27 = vunpack.i.l.bf16 %v6998_v49  ;;  %v3431_v18 = vunpack.i.l.bf16 %v6999_v0  ;;  %v3432_v48 = vunpack.i.h.bf16 %v6999_v0 }
 0x201   : > { %4309 = vrot.lane.b32.xlu1 %v4308_v63, %s4407_s29  ;;  %v3406_v63 = vunpack.i.l.bf16 %v6996_v60  ;;  %v3427_v31 = vunpack.i.h.bf16 %v7000_v37  ;;  %v3426_v62 = vunpack.i.l.bf16 %v7000_v37  ;;  %v3441_v13 = vunpack.i.l.bf16 %v7001_v26 }
 0x202   : > { %4304 = vrot.lane.b32.xlu0 %v4303_v33, %s4407_s29  ;;  %v1080_v33 = vsel %vm1073_vm2, %v1071_v4, %v3411_v8  ;;  %v3442_v35 = vunpack.i.h.bf16 %v7001_v26  ;;  %v3437_v56 = vunpack.i.h.bf16 %v7002_v24  ;;  %v3436_v20 = vunpack.i.l.bf16 %v7002_v24 }
 0x203   : > { %v1078_v40 = vsel %vm1073_vm2, %v1069_v46, %v3406_v63  ;;  %v1079_v7 = vsel %vm1073_vm2, %v1070_v43, %v3407_v23  ;;  %v1085_v52 = vsel %vm1082_vm3, %v1076_v54, %v3421_v34  ;;  %v1086_v17 = vsel %vm1082_vm3, %v1077_v58, %v3422_v25  ;;  %v7010_v58 = vld [vmem:[#allocation11_spill] sm:$0xff] }
 0x204   : > { %v3451_v32 = vunpack.i.l.bf16 %v7003_v2  ;;  %v1083_v3 = vsel %vm1082_vm3, %v1074_v53, %v3416_v27  ;;  %v1084_v22 = vsel %vm1082_vm3, %v1075_v30, %v3417_v5  ;;  %v1089_v51 = vsel %vm1082_vm3, %v1080_v33, %v3431_v18  ;;  %v7011_v23 = vld [vmem:[#allocation15_spill] sm:$0xff] }
 0x205   : > { %v3452_v15 = vunpack.i.h.bf16 %v7003_v2  ;;  %v1090_v19 = vsel %vm1082_vm3, %v1081_v28, %v3432_v48  ;;  %v1087_v38 = vsel %vm1082_vm3, %v1078_v40, %v3426_v62  ;;  %v1088_v14 = vsel %vm1082_vm3, %v1079_v7, %v3427_v31  ;;  %v7012_v62 = vld [vmem:[#allocation13_spill] sm:$0xff]  ;;  %v7014_v7 = vld [vmem:[#allocation12_spill] sm:$0xff]  ;;  %v7015_v2 = vld [vmem:[#allocation14_spill] sm:$0xff] }
 0x206   : > { %v1094_v29 = vsel %vm1091_vm4, %v1085_v52, %v3441_v13  ;;  %v1095_v61 = vsel %vm1091_vm4, %v1086_v17, %v3442_v35  ;;  %v1092_v21 = vsel %vm1091_vm4, %v1083_v3, %v3436_v20  ;;  %v1093_v16 = vsel %vm1091_vm4, %v1084_v22, %v3437_v56  ;;  %v7013_v35 = vld [vmem:[#allocation25_spill] sm:$0xff]  ;;  %v7016_v22 = vld [vmem:[#allocation16_spill] sm:$0xff] }
 0x207   : > { %v3446_v41 = vunpack.i.l.bf16 %v7004_v36  ;;  %v1098_v55 = vsel %vm1091_vm4, %v1089_v51, %v3451_v32  ;;  %v3447_v1 = vunpack.i.h.bf16 %v7004_v36  ;;  %v3462_v10 = vunpack.i.h.bf16 %v7005_v50 }
 0x208   : > { %v3461_v11 = vunpack.i.l.bf16 %v7005_v50  ;;  %v1099_v47 = vsel %vm1091_vm4, %v1090_v19, %v3452_v15  ;;  %v3457_v57 = vunpack.i.h.bf16 %v7006_v9  ;;  %v3456_v39 = vunpack.i.l.bf16 %v7006_v9  ;;  %v7017_v19 = vld [vmem:[#allocation17_spill] sm:$0xff] }
 0x209   : > { %v3471_v8 = vunpack.i.l.bf16 %v7007_v12  ;;  %v3472_v6 = vunpack.i.h.bf16 %v7007_v12  ;;  %v3467_v4 = vunpack.i.h.bf16 %v7008_v59  ;;  %v3466_v42 = vunpack.i.l.bf16 %v7008_v59 }
 0x20a   : > { %v3481_v46 = vunpack.i.l.bf16 %v7009_v44  ;;  %v1096_v43 = vsel %vm1091_vm4, %v1087_v38, %v3446_v41  ;;  %v3482_v54 = vunpack.i.h.bf16 %v7009_v44  ;;  %v3477_v53 = vunpack.i.h.bf16 %v7010_v58 }
 0x20b   : > { %v3476_v30 = vunpack.i.l.bf16 %v7010_v58  ;;  %v1097_v60 = vsel %vm1091_vm4, %v1088_v14, %v3447_v1  ;;  %v1103_v63 = vsel %vm1100_vm5, %v1094_v29, %v3461_v11  ;;  %v1104_v33 = vsel %vm1100_vm5, %v1095_v61, %v3462_v10  ;;  %v7018_v61 = vld [vmem:[#allocation21_spill] sm:$0xff]  ;;  %v7019_v1 = vld [vmem:[#allocation19_spill] sm:$0xff] }
 0x20c   : > { %v3491_v45 = vunpack.i.l.bf16 %v7011_v23  ;;  %v1101_v25 = vsel %vm1100_vm5, %v1092_v21, %v3456_v39  ;;  %v1102_v34 = vsel %vm1100_vm5, %v1093_v16, %v3457_v57  ;;  %v1107_v28 = vsel %vm1100_vm5, %v1098_v55, %v3471_v8 }
 0x20d   : > { %v3492_v49 = vunpack.i.h.bf16 %v7011_v23  ;;  %v1108_v5 = vsel %vm1100_vm5, %v1099_v47, %v3472_v6  ;;  %v1105_v27 = vsel %vm1100_vm5, %v1096_v43, %v3466_v42  ;;  %v1106_v0 = vsel %vm1100_vm5, %v1097_v60, %v3467_v4  ;;  %v7020_v42 = vld [vmem:[#allocation30_spill] sm:$0xff]  ;;  %v7022_v60 = vld [vmem:[#allocation20_spill] sm:$0xff] }
 0x20e   : > { %v1112_v18 = vsel %vm1109_vm6, %v1103_v63, %v3481_v46  ;;  %v1113_v48 = vsel %vm1109_vm6, %v1104_v33, %v3482_v54  ;;  %v1110_v37 = vsel %vm1109_vm6, %v1101_v25, %v3476_v30  ;;  %v1111_v31 = vsel %vm1109_vm6, %v1102_v34, %v3477_v53  ;;  %v7021_v54 = vld [vmem:[#allocation18_spill] sm:$0xff]  ;;  %v7024_v34 = vld [vmem:[#allocation23_spill] sm:$0xff] }
 0x20f   : > { %v3486_v26 = vunpack.i.l.bf16 %v7012_v62  ;;  %v1116_v13 = vsel %vm1109_vm6, %v1107_v28, %v3491_v45  ;;  %v3487_v40 = vunpack.i.h.bf16 %v7012_v62  ;;  %v3502_v24 = vunpack.i.h.bf16 %v7013_v35  ;;  %v7023_v23 = vld [vmem:[#allocation22_spill] sm:$0xff] }
 0x210   : > { %v3501_v56 = vunpack.i.l.bf16 %v7013_v35  ;;  %v1117_v20 = vsel %vm1109_vm6, %v1108_v5, %v3492_v49  ;;  %v3497_v52 = vunpack.i.h.bf16 %v7014_v7  ;;  %v3496_v17 = vunpack.i.l.bf16 %v7014_v7  ;;  %v7025_v5 = vld [vmem:[#allocation26_spill] sm:$0xff] }
 0x211   : > { %v3511_v32 = vunpack.i.l.bf16 %v7015_v2  ;;  %v3512_v3 = vunpack.i.h.bf16 %v7015_v2  ;;  %v3507_v51 = vunpack.i.h.bf16 %v7016_v22  ;;  %v3506_v15 = vunpack.i.l.bf16 %v7016_v22 }
 0x212   : > { %v3521_v38 = vunpack.i.l.bf16 %v7017_v19  ;;  %v1114_v14 = vsel %vm1109_vm6, %v1105_v27, %v3486_v26  ;;  %v3522_v29 = vunpack.i.h.bf16 %v7017_v19  ;;  %v3517_v21 = vunpack.i.h.bf16 %v7018_v61 }
 0x213   : > { %v3516_v16 = vunpack.i.l.bf16 %v7018_v61  ;;  %v1115_v36 = vsel %vm1109_vm6, %v1106_v0, %v3487_v40  ;;  %v1121_v41 = vsel %vm1118_vm7, %v1112_v18, %v3501_v56  ;;  %v1122_v55 = vsel %vm1118_vm7, %v1113_v48, %v3502_v24  ;;  %v7026_v48 = vld [vmem:[#allocation27_spill] sm:$0xff]  ;;  %v7027_v40 = vld [vmem:[#allocation28_spill] sm:$0xff] }
 0x214   : > { %v3531_v50 = vunpack.i.l.bf16 %v7019_v1  ;;  %v1119_v10 = vsel %vm1118_vm7, %v1110_v37, %v3496_v17  ;;  %v1120_v11 = vsel %vm1118_vm7, %v1111_v31, %v3497_v52  ;;  %v1125_v47 = vsel %vm1118_vm7, %v1116_v13, %v3511_v32 }
 0x215   : > { %v3532_v9 = vunpack.i.h.bf16 %v7019_v1  ;;  %v1126_v57 = vsel %vm1118_vm7, %v1117_v20, %v3512_v3  ;;  %v1123_v39 = vsel %vm1118_vm7, %v1114_v14, %v3506_v15  ;;  %v1124_v12 = vsel %vm1118_vm7, %v1115_v36, %v3507_v51  ;;  %v7028_v15 = vld [vmem:[#allocation29_spill] sm:$0xff]  ;;  %v7030_v36 = vld [vmem:[#allocation32_spill] sm:$0xff]  ;;  %v7031_v1 = vld [vmem:[#allocation39_spill] sm:$0xff] }
 0x216   : > { %v1130_v8 = vsel %vm1127_vm8, %v1121_v41, %v3521_v38  ;;  %v1131_v6 = vsel %vm1127_vm8, %v1122_v55, %v3522_v29  ;;  %v1128_v59 = vsel %vm1127_vm8, %v1119_v10, %v3516_v16  ;;  %v1129_v4 = vsel %vm1127_vm8, %v1120_v11, %v3517_v21  ;;  %v7029_v29 = vld [vmem:[#allocation34_spill] sm:$0xff]  ;;  %v7032_v11 = vld [vmem:[#allocation31_spill] sm:$0xff] }
 0x217   : > { %v3526_v44 = vunpack.i.l.bf16 %v7020_v42  ;;  %v1134_v46 = vsel %vm1127_vm8, %v1125_v47, %v3531_v50  ;;  %v3527_v43 = vunpack.i.h.bf16 %v7020_v42  ;;  %v3542_v58 = vunpack.i.h.bf16 %v7021_v54 }
 0x218   : > { %v3541_v53 = vunpack.i.l.bf16 %v7021_v54  ;;  %v1135_v30 = vsel %vm1127_vm8, %v1126_v57, %v3532_v9  ;;  %v3537_v63 = vunpack.i.h.bf16 %v7022_v60  ;;  %v3536_v33 = vunpack.i.l.bf16 %v7022_v60  ;;  %v7033_v57 = vld [vmem:[#allocation33_spill] sm:$0xff] }
 0x219   : > { %v3551_v45 = vunpack.i.l.bf16 %v7023_v23  ;;  %v3552_v25 = vunpack.i.h.bf16 %v7023_v23  ;;  %v3547_v28 = vunpack.i.h.bf16 %v7024_v34  ;;  %v3546_v49 = vunpack.i.l.bf16 %v7024_v34 }
 0x21a   : > { %v3561_v27 = vunpack.i.l.bf16 %v7025_v5  ;;  %v1132_v0 = vsel %vm1127_vm8, %v1123_v39, %v3526_v44  ;;  %v3562_v18 = vunpack.i.h.bf16 %v7025_v5  ;;  %v3557_v37 = vunpack.i.h.bf16 %v7026_v48  ;;  %v7036_v5 = vld [vmem:[#allocation37_spill] sm:$0xff] }
 0x21b   : > { %v3556_v31 = vunpack.i.l.bf16 %v7026_v48  ;;  %v1133_v62 = vsel %vm1127_vm8, %v1124_v12, %v3527_v43  ;;  %v1139_v26 = vsel %vm1136_vm9, %v1130_v8, %v3541_v53  ;;  %v1140_v13 = vsel %vm1136_vm9, %v1131_v6, %v3542_v58  ;;  %v7034_v6 = vld [vmem:[#allocation35_spill] sm:$0xff]  ;;  %v7035_v43 = vld [vmem:[#allocation36_spill] sm:$0xff] }
 0x21c   : > { %v3571_v35 = vunpack.i.l.bf16 %v7027_v40  ;;  %v1137_v24 = vsel %vm1136_vm9, %v1128_v59, %v3536_v33  ;;  %v1138_v56 = vsel %vm1136_vm9, %v1129_v4, %v3537_v63  ;;  %v1143_v20 = vsel %vm1136_vm9, %v1134_v46, %v3551_v45 }
 0x21d   : > { %v3572_v7 = vunpack.i.h.bf16 %v7027_v40  ;;  %v1144_v52 = vsel %vm1136_vm9, %v1135_v30, %v3552_v25  ;;  %v1141_v17 = vsel %vm1136_vm9, %v1132_v0, %v3546_v49  ;;  %v1142_v2 = vsel %vm1136_vm9, %v1133_v62, %v3547_v28 }
 0x21e   : > { %v1148_v32 = vsel %vm1145_vm10, %v1139_v26, %v3561_v27  ;;  %v1149_v3 = vsel %vm1145_vm10, %v1140_v13, %v3562_v18  ;;  %v1146_v22 = vsel %vm1145_vm10, %v1137_v24, %v3556_v31  ;;  %v1147_v51 = vsel %vm1145_vm10, %v1138_v56, %v3557_v37  ;;  %v7037_v37 = vld [vmem:[#allocation38_spill] sm:$0xff]  ;;  %v7038_v13 = vld [vmem:[#allocation60_spill] sm:$0xff]  ;;  %v7039_v24 = vld [vmem:[#allocation61_spill] sm:$0xff] }
 0x21f   : > { %v3566_v19 = vunpack.i.l.bf16 %v7028_v15  ;;  %v1152_v38 = vsel %vm1145_vm10, %v1143_v20, %v3571_v35  ;;  %v3567_v14 = vunpack.i.h.bf16 %v7028_v15  ;;  %v3582_v61 = vunpack.i.h.bf16 %v7029_v29  ;;  %v7042_v15 = vld [vmem:[#allocation64_spill] sm:$0xff] }
 0x220   : > { %v3581_v21 = vunpack.i.l.bf16 %v7029_v29  ;;  %v1153_v16 = vsel %vm1145_vm10, %v1144_v52, %v3572_v7  ;;  %v3577_v41 = vunpack.i.h.bf16 %v7030_v36  ;;  %v3576_v55 = vunpack.i.l.bf16 %v7030_v36  ;;  %v7040_v7 = vld [vmem:[#allocation62_spill] sm:$0xff] }
 0x221   : > { %v3591_v50 = vunpack.i.l.bf16 %v7031_v1  ;;  %v3592_v10 = vunpack.i.h.bf16 %v7031_v1  ;;  %v3587_v47 = vunpack.i.h.bf16 %v7032_v11  ;;  %v3586_v9 = vunpack.i.l.bf16 %v7032_v11 }
 0x222   : > { %v3601_v39 = vunpack.i.l.bf16 %v7033_v57  ;;  %v1150_v12 = vsel %vm1145_vm10, %v1141_v17, %v3566_v19  ;;  %v3602_v8 = vunpack.i.h.bf16 %v7033_v57  ;;  %v3597_v59 = vunpack.i.h.bf16 %v7034_v6 }
 0x223   : > { %v3596_v4 = vunpack.i.l.bf16 %v7034_v6  ;;  %v1151_v42 = vsel %vm1145_vm10, %v1142_v2, %v3567_v14  ;;  %v1157_v44 = vsel %vm1154_vm11, %v1148_v32, %v3581_v21  ;;  %v1158_v46 = vsel %vm1154_vm11, %v1149_v3, %v3582_v61  ;;  %v7041_v2 = vld [vmem:[#allocation63_spill] sm:$0xff] }
 0x224   : > { %v3611_v54 = vunpack.i.l.bf16 %v7035_v43  ;;  %v1155_v58 = vsel %vm1154_vm11, %v1146_v22, %v3576_v55  ;;  %v1156_v53 = vsel %vm1154_vm11, %v1147_v51, %v3577_v41  ;;  %v1161_v30 = vsel %vm1154_vm11, %v1152_v38, %v3591_v50  ;;  %v7044_v50 = vld [vmem:[#allocation66_spill] sm:$0xff] }
 0x225   : > { %v3612_v60 = vunpack.i.h.bf16 %v7035_v43  ;;  %v1162_v63 = vsel %vm1154_vm11, %v1153_v16, %v3592_v10  ;;  %v1159_v33 = vsel %vm1154_vm11, %v1150_v12, %v3586_v9  ;;  %v1160_v23 = vsel %vm1154_vm11, %v1151_v42, %v3587_v47  ;;  %v7043_v16 = vld [vmem:[#allocation65_spill] sm:$0xff] }
 0x226   : > { %v1166_v45 = vsel %vm1163_vm12, %v1157_v44, %v3601_v39  ;;  %v1167_v34 = vsel %vm1163_vm12, %v1158_v46, %v3602_v8  ;;  %v1164_v28 = vsel %vm1163_vm12, %v1155_v58, %v3596_v4  ;;  %v1165_v49 = vsel %vm1163_vm12, %v1156_v53, %v3597_v59 }
 0x227   : > { %v3606_v27 = vunpack.i.l.bf16 %v7036_v5  ;;  %v1170_v18 = vsel %vm1163_vm12, %v1161_v30, %v3611_v54  ;;  %v3607_v48 = vunpack.i.h.bf16 %v7036_v5  ;;  %v3622_v31 = vunpack.i.h.bf16 %v7037_v37 }
 0x228   : > { %v3621_v62 = vunpack.i.l.bf16 %v7037_v37  ;;  %v1171_v26 = vsel %vm1163_vm12, %v1162_v63, %v3612_v60  ;;  %v3617_v40 = vunpack.i.h.bf16 %v7038_v13  ;;  %v3616_v35 = vunpack.i.l.bf16 %v7038_v13 }
 0x229   : > { %v3631_v56 = vunpack.i.l.bf16 %v7039_v24  ;;  %v3632_v20 = vunpack.i.h.bf16 %v7039_v24  ;;  %v3627_v52 = vunpack.i.h.bf16 %v7040_v7  ;;  %v3626_v17 = vunpack.i.l.bf16 %v7040_v7 }
 0x22a   : > { %v3641_v32 = vunpack.i.l.bf16 %v7041_v2  ;;  %v1168_v22 = vsel %vm1163_vm12, %v1159_v33, %v3606_v27  ;;  %v3642_v51 = vunpack.i.h.bf16 %v7041_v2  ;;  %v3637_v19 = vunpack.i.h.bf16 %v7042_v15 }
 0x22b   : > { %v3636_v38 = vunpack.i.l.bf16 %v7042_v15  ;;  %v1169_v29 = vsel %vm1163_vm12, %v1160_v23, %v3607_v48  ;;  %v1175_v61 = vsel %vm1172_vm13, %v1166_v45, %v3621_v62  ;;  %v1176_v21 = vsel %vm1172_vm13, %v1167_v34, %v3622_v31 }
 0x22c   : > { %v3651_v36 = vunpack.i.l.bf16 %v7043_v16  ;;  %v1173_v41 = vsel %vm1172_vm13, %v1164_v28, %v3616_v35  ;;  %v1174_v55 = vsel %vm1172_vm13, %v1165_v49, %v3617_v40  ;;  %v1179_v1 = vsel %vm1172_vm13, %v1170_v18, %v3631_v56 }
 0x22d   : > { %v3646_v10 = vunpack.i.l.bf16 %v7044_v50  ;;  %v1180_v11 = vsel %vm1172_vm13, %v1171_v26, %v3632_v20  ;;  %v1177_v47 = vsel %vm1172_vm13, %v1168_v22, %v3626_v17  ;;  %v1178_v9 = vsel %vm1172_vm13, %v1169_v29, %v3627_v52 }
 0x22e   : > { %v1184_v57 = vsel %vm1181_vm14, %v1175_v61, %v3641_v32  ;;  %v1185_v12 = vsel %vm1181_vm14, %v1176_v21, %v3642_v51  ;;  %v3647_v8 = vunpack.i.h.bf16 %v7044_v50  ;;  %v1182_v59 = vsel %vm1181_vm14, %v1173_v41, %v3636_v38 }
 0x22f   : > { %v1183_v4 = vsel %vm1181_vm14, %v1174_v55, %v3637_v19  ;;  %v3652_v42 = vunpack.i.h.bf16 %v7043_v16  ;;  %v1188_v44 = vsel %vm1181_vm14, %v1179_v1, %v3651_v36  ;;  %v1186_v53 = vsel %vm1181_vm14, %v1177_v47, %v3646_v10 }
 0x230   : > { %vm2503_vm0 = vcmask 523264   ;;  %v1187_v49 = vsel %vm1181_vm14, %v1178_v9, %v3647_v8  ;;  %vm2512_vm1 = vcmask 785408   ;;  %vm2669_vm2 = vcmask 516096  }
 0x231   : > { %vm2749_vm3 = vcmask 519168  }
 0x253   : > { %v6534_v25 = vpop.permute.xlu1 %4259 }
 0x254   : > { %v6540_v0 = vpop.permute.xlu0 %4254  ;;  %v4262_v46 = vunpack.i.h.bf16 %v6534_v25  ;;  %v4261_v43 = vunpack.i.l.bf16 %v6534_v25  ;;  %v1189_v25 = vsel %vm1181_vm14, %v1180_v11, %v3652_v42  ;;  %v3227_v42 = vld [vmem:[%s6690_s2] ss:$0 sm:$0xff] }
 0x255   : > { %v4257_v54 = vunpack.i.h.bf16 %v6540_v0  ;;  %v4256_v58 = vunpack.i.l.bf16 %v6540_v0 }
 0x256   : > { %v2499_v5 = vsel %vm2494_vm15, %v1186_v53, %v4261_v43  ;;  %v2500_v27 = vsel %vm2494_vm15, %v1187_v49, %v4262_v46 }
 0x257   : > { %v2495_v48 = vsel %vm2494_vm15, %v1182_v59, %v4256_v58  ;;  %v2496_v37 = vsel %vm2494_vm15, %v1183_v4, %v4257_v54  ;;  %v4408_v4 = vmov 0.0  }
 0x258   : > { %2672 = vst.msk [vmem:[#allocation2 + $0x20] sm:$0x1] %vm2669_vm2, %v4408_v4  ;;  %2670 = vst.msk [vmem:[#allocation2] sm:$0x1] %vm2669_vm2, %v4408_v4 }
 0x259   : > { %2671 = vst.msk [vmem:[#allocation2 + $0x10] sm:$0x1] %vm2669_vm2, %v4408_v4  ;;  %2673 = vst.msk [vmem:[#allocation2 + $0x30] sm:$0x1] %vm2669_vm2, %v4408_v4 }
 0x25a   : > { %2674 = vst.msk [vmem:[#allocation2 + $0x40] sm:$0x1] %vm2669_vm2, %v4408_v4  ;;  %2675 = vst.msk [vmem:[#allocation2 + $0x50] sm:$0x1] %vm2669_vm2, %v4408_v4 }
 0x25b   : > { %2676 = vst.msk [vmem:[#allocation2 + $0x60] sm:$0x1] %vm2669_vm2, %v4408_v4  ;;  %2677 = vst.msk [vmem:[#allocation2 + $0x70] sm:$0x1] %vm2669_vm2, %v4408_v4 }
 0x25c   : > { %2750 = vst.msk [vmem:[#allocation3] sm:$0xf] %vm2749_vm3, %v4408_v4 }
 0x25f   : > { %v4270_v3 = vpop.permute.xlu1 %4269 }
 0x260   : > { %v6558_v14 = vpop.permute.xlu0 %4264  ;;  %v4272_v30 = vunpack.i.h.bf16 %v4270_v3  ;;  %v4271_v60 = vunpack.i.l.bf16 %v4270_v3 }
 0x261   : > { %v4267_v0 = vunpack.i.h.bf16 %v6558_v14  ;;  %v4266_v18 = vunpack.i.l.bf16 %v6558_v14 }
 0x262   : > { %v2501_v31 = vsel %vm2494_vm15, %v1188_v44, %v4271_v60  ;;  %v2502_v62 = vsel %vm2494_vm15, %v1189_v25, %v4272_v30 }
 0x263   : > { %v2497_v19 = vsel %vm2494_vm15, %v1184_v57, %v4266_v18  ;;  %v2498_v21 = vsel %vm2494_vm15, %v1185_v12, %v4267_v0 }
 0x267   : > { %v4280_v39 = vpop.permute.xlu1 %4279 }
 0x268   : > { %v4275_v6 = vpop.permute.xlu0 %4274  ;;  %v4282_v63 = vunpack.i.h.bf16 %v4280_v39  ;;  %v4281_v33 = vunpack.i.l.bf16 %v4280_v39 }
 0x269   : > { %v4277_v45 = vunpack.i.h.bf16 %v4275_v6  ;;  %v4276_v34 = vunpack.i.l.bf16 %v4275_v6 }
 0x26a   : > { %v2508_v13 = vsel %vm2503_vm0, %v2499_v5, %v4281_v33  ;;  %v2509_v40 = vsel %vm2503_vm0, %v2500_v27, %v4282_v63 }
 0x26b   : > { %v4290_v23 = vpop.permute.xlu1 %4289  ;;  %v2504_v20 = vsel %vm2503_vm0, %v2495_v48, %v4276_v34  ;;  %v2505_v7 = vsel %vm2503_vm0, %v2496_v37, %v4277_v45 }
 0x26c   : > { %v4285_v28 = vpop.permute.xlu0 %4284  ;;  %v4292_v52 = vunpack.i.h.bf16 %v4290_v23  ;;  %v4291_v17 = vunpack.i.l.bf16 %v4290_v23 }
 0x26d   : > { %v4287_v3 = vunpack.i.h.bf16 %v4285_v28  ;;  %v4286_v22 = vunpack.i.l.bf16 %v4285_v28 }
 0x26e   : > { %v2510_v1 = vsel %vm2503_vm0, %v2501_v31, %v4291_v17  ;;  %v2511_v50 = vsel %vm2503_vm0, %v2502_v62, %v4292_v52 }
 0x26f   : > { %v4300_v26 = vpop.permute.xlu1 %4299  ;;  %v2506_v47 = vsel %vm2503_vm0, %v2497_v19, %v4286_v22  ;;  %v2507_v9 = vsel %vm2503_vm0, %v2498_v21, %v4287_v3 }
 0x270   : > { %v4302_v35 = vunpack.i.h.bf16 %v4300_v26  ;;  %v4301_v24 = vunpack.i.l.bf16 %v4300_v26  ;;  %v4295_v56 = vpop.permute.xlu0 %4294 }
 0x271   : > { %v4297_v2 = vunpack.i.h.bf16 %v4295_v56  ;;  %v4296_v32 = vunpack.i.l.bf16 %v4295_v56 }
 0x272   : > { %v2517_v51 = vsel %vm2512_vm1, %v2508_v13, %v4301_v24  ;;  %v2518_v15 = vsel %vm2512_vm1, %v2509_v40, %v4302_v35 }
 0x273   : > { %v4310_v38 = vpop.permute.xlu1 %4309  ;;  %v2513_v14 = vsel %vm2512_vm1, %v2504_v20, %v4296_v32  ;;  %v2514_v29 = vsel %vm2512_vm1, %v2505_v7, %v4297_v2  ;;  %v2523_v61 = vpack.c.bf16 %v2518_v15, %v2517_v51 }
 0x274   : > { %v4312_v16 = vunpack.i.h.bf16 %v4310_v38  ;;  %v4311_v36 = vunpack.i.l.bf16 %v4310_v38  ;;  %v4305_v41 = vpop.permute.xlu0 %4304  ;;  %v2521_v55 = vpack.c.bf16 %v2514_v29, %v2513_v14 }
 0x275   : > { %v4307_v10 = vunpack.i.h.bf16 %v4305_v41  ;;  %v4306_v11 = vunpack.i.l.bf16 %v4305_v41  ;;  %3274 = vmatprep.mubr.bf16.mxu1 %v2523_v61 }
 0x276   : > { %3270 = vmatprep.mubr.bf16.mxu0 %v2521_v55  ;;  %v2519_v57 = vsel %vm2512_vm1, %v2510_v1, %v4311_v36  ;;  %v2520_v39 = vsel %vm2512_vm1, %v2511_v50, %v4312_v16 }
 0x277   : > { %v2515_v12 = vsel %vm2512_vm1, %v2506_v47, %v4306_v11  ;;  %v2516_v8 = vsel %vm2512_vm1, %v2507_v9, %v4307_v10  ;;  %v2524_v6 = vpack.c.bf16 %v2520_v39, %v2519_v57 }
 0x278   : > { %v2522_v59 = vpack.c.bf16 %v2516_v8, %v2515_v12 }
 0x279   : > { %3275 = vmatmul.mubr.bf16.vlgmr.msra.gmra.mxu1 %v2524_v6 }
 0x27a   : > { %3271 = vmatmul.mubr.bf16.vlgmr.msra.gmra.mxu0 %v2522_v59 }
 0x339   : > { %v3276_v44 = vpop.f32.mrf.mxu1 }
 0x33a   : > { %v3272_v46 = vpop.f32.mrf.mxu0  ;;  %v2655_v43 = vadd.f32 %v3276_v44, %v3227_v42  ;;  %v2760_v44 = vld [vmem:[#allocation3] sm:$0xf] }
 0x33b   : > { %v2639_v54 = vadd.f32 %v3272_v46, %v3227_v42  ;;  %v2646_v58 = vpop.f32.mrf.mxu1 }
 0x33c   : > { %v2667_v53 = vmax.f32 %v2655_v43, 0.0  ;;  %v2630_v30 = vpop.f32.mrf.mxu0  ;;  %v2647_v60 = vadd.f32 %v3227_v42, %v2646_v58 }
 0x33d   : > { %v2663_v63 = vmax.f32 %v2639_v54, 0.0  ;;  %v2631_v33 = vadd.f32 %v3227_v42, %v2630_v30  ;;  %v3277_v23 = vpop.f32.mrf.mxu1 }
 0x33e   : > { %2684 = vst.msk [vmem:[#allocation2 + $0x61] sm:$0xff] %vm2503_vm0, %v2667_v53  ;;  %v2665_v45 = vmax.f32 %v2647_v60, 0.0  ;;  %v3273_v34 = vpop.f32.mrf.mxu0  ;;  %v2658_v28 = vadd.f32 %v3277_v23, %v3227_v42 }
 0x33f   : > { %2680 = vst.msk [vmem:[#allocation2 + $0x21] sm:$0xff] %vm2503_vm0, %v2663_v63  ;;  %v2661_v49 = vmax.f32 %v2631_v33, 0.0  ;;  %v2642_v25 = vadd.f32 %v3273_v34, %v3227_v42  ;;  %v2649_v5 = vpop.f32.mrf.mxu1 }
 0x340   : > { %2682 = vst.msk [vmem:[#allocation2 + $0x41] sm:$0xff] %vm2503_vm0, %v2665_v45  ;;  %v2668_v27 = vmax.f32 %v2658_v28, 0.0  ;;  %v2633_v0 = vpop.f32.mrf.mxu0  ;;  %v2650_v18 = vadd.f32 %v3227_v42, %v2649_v5 }
 0x341   : > { %2678 = vst.msk [vmem:[#allocation2 + $0x1] sm:$0xff] %vm2503_vm0, %v2661_v49  ;;  %v2664_v48 = vmax.f32 %v2642_v25, 0.0  ;;  %v2634_v37 = vadd.f32 %v3227_v42, %v2633_v0 }
 0x342   : > { %2685 = vst.msk [vmem:[#allocation2 + $0x71] sm:$0xff] %vm2503_vm0, %v2668_v27  ;;  %v2666_v31 = vmax.f32 %v2650_v18, 0.0 }
 0x343   : > { %2681 = vst.msk [vmem:[#allocation2 + $0x31] sm:$0xff] %vm2503_vm0, %v2664_v48  ;;  %v2662_v62 = vmax.f32 %v2634_v37, 0.0 }
 0x344   : > { %2683 = vst.msk [vmem:[#allocation2 + $0x51] sm:$0xff] %vm2503_vm0, %v2666_v31 }
 0x345   : > { %v2698_v26 = vld [vmem:[#allocation2 + $0x60] ss:$2 sm:$0xf]  ;;  %v2714_v13 = vld [vmem:[#allocation2 + $0x61] ss:$2 sm:$0xf] }
 0x346   : > { %2679 = vst.msk [vmem:[#allocation2 + $0x11] sm:$0xff] %vm2503_vm0, %v2662_v62  ;;  %v2690_v40 = vld [vmem:[#allocation2 + $0x20] ss:$2 sm:$0xf]  ;;  %v2723_v24 = vmax.f32 %v2698_v26, %v2714_v13 }
 0x347   : > { %v2706_v35 = vld [vmem:[#allocation2 + $0x21] ss:$2 sm:$0xf]  ;;  %v2730_v20 = vld [vmem:[#allocation2 + $0x22] ss:$2 sm:$0xf] }
 0x348   : > { %v2719_v56 = vmax.f32 %v2690_v40, %v2706_v35  ;;  %v2738_v7 = vld [vmem:[#allocation2 + $0x62] ss:$2 sm:$0xf]  ;;  %v2702_v2 = vld [vmem:[#allocation2 + $0x1] ss:$2 sm:$0xf] }
 0x349   : > { %v2747_v52 = vmax.f32 %v2723_v24, %v2738_v7  ;;  %v2686_v17 = vld [vmem:[#allocation2] ss:$2 sm:$0xf]  ;;  %v2710_v15 = vld [vmem:[#allocation2 + $0x41] ss:$2 sm:$0xf] }
 0x34a   : > { %v2743_v32 = vmax.f32 %v2719_v56, %v2730_v20  ;;  %v2717_v3 = vmax.f32 %v2686_v17, %v2702_v2  ;;  %v2694_v22 = vld [vmem:[#allocation2 + $0x40] ss:$2 sm:$0xf]  ;;  %v2692_v14 = vld [vmem:[#allocation2 + $0x30] ss:$2 sm:$0xf] }
 0x34b   : > { %2758 = vst.msk [vmem:[#allocation3 + $0x1c] sm:$0xf] %vm2749_vm3, %v2747_v52  ;;  %v2726_v51 = vld [vmem:[#allocation2 + $0x2] ss:$2 sm:$0xf]  ;;  %v2721_v38 = vmax.f32 %v2694_v22, %v2710_v15 }
 0x34c   : > { %2754 = vst.msk [vmem:[#allocation3 + $0xc] sm:$0xf] %vm2749_vm3, %v2743_v32  ;;  %v2741_v19 = vmax.f32 %v2717_v3, %v2726_v51  ;;  %v2708_v29 = vld [vmem:[#allocation2 + $0x31] ss:$2 sm:$0xf] }
 0x34d   : > { %v2734_v61 = vld [vmem:[#allocation2 + $0x42] ss:$2 sm:$0xf]  ;;  %v2720_v21 = vmax.f32 %v2692_v14, %v2708_v29  ;;  %v2700_v16 = vld [vmem:[#allocation2 + $0x70] ss:$2 sm:$0xf] }
 0x34e   : > { %2752 = vst.msk [vmem:[#allocation3 + $0x4] sm:$0xf] %vm2749_vm3, %v2741_v19  ;;  %v2745_v36 = vmax.f32 %v2721_v38, %v2734_v61  ;;  %v2732_v41 = vld [vmem:[#allocation2 + $0x32] ss:$2 sm:$0xf] }
 0x34f   : > { %v2716_v55 = vld [vmem:[#allocation2 + $0x71] ss:$2 sm:$0xf]  ;;  %v2744_v1 = vmax.f32 %v2720_v21, %v2732_v41  ;;  %v2688_v10 = vld [vmem:[#allocation2 + $0x10] ss:$2 sm:$0xf] }
 0x350   : > { %v2724_v50 = vmax.f32 %v2700_v16, %v2716_v55  ;;  %v2704_v11 = vld [vmem:[#allocation2 + $0x11] ss:$2 sm:$0xf]  ;;  %2756 = vst.msk [vmem:[#allocation3 + $0x14] sm:$0xf] %vm2749_vm3, %v2745_v36 }
 0x351   : > { %v2740_v47 = vld [vmem:[#allocation2 + $0x72] ss:$2 sm:$0xf]  ;;  %v2718_v9 = vmax.f32 %v2688_v10, %v2704_v11  ;;  %2755 = vst.msk [vmem:[#allocation3 + $0x10] sm:$0xf] %vm2749_vm3, %v2744_v1 }
 0x352   : > { %v2696_v57 = vld [vmem:[#allocation2 + $0x50] ss:$2 sm:$0xf]  ;;  %v2748_v39 = vmax.f32 %v2724_v50, %v2740_v47  ;;  %v2712_v8 = vld [vmem:[#allocation2 + $0x51] ss:$2 sm:$0xf] }
 0x353   : > { %v2728_v12 = vld [vmem:[#allocation2 + $0x12] ss:$2 sm:$0xf]  ;;  %v2722_v59 = vmax.f32 %v2696_v57, %v2712_v8  ;;  %v2765_v60 = vld [vmem:[#allocation3 + $0xc] sm:$0xf] }
 0x354   : > { %v2742_v6 = vmax.f32 %v2718_v9, %v2728_v12  ;;  %2759 = vst.msk [vmem:[#allocation3 + $0x20] sm:$0xf] %vm2749_vm3, %v2748_v39  ;;  %v2736_v4 = vld [vmem:[#allocation2 + $0x52] ss:$2 sm:$0xf] }
 0x355   : > { %v2746_v42 = vmax.f32 %v2722_v59, %v2736_v4  ;;  %v2764_v46 = vld [vmem:[#allocation3 + $0x4] sm:$0xf]  ;;  %v2767_v33 = vld [vmem:[#allocation3 + $0x1c] sm:$0xf] }
 0x356   : > { %2753 = vst.msk [vmem:[#allocation3 + $0x8] sm:$0xf] %vm2749_vm3, %v2742_v6  ;;  %v2768_v58 = vmax.f32 %v2760_v44, %v2764_v46 }
 0x357   : > { %2757 = vst.msk [vmem:[#allocation3 + $0x18] sm:$0xf] %vm2749_vm3, %v2746_v42  ;;  %v2766_v54 = vld [vmem:[#allocation3 + $0x14] sm:$0xf] }
 0x358   : > { %v2762_v43 = vld [vmem:[#allocation3 + $0x10] sm:$0xf] }
 0x359   : > { %v2770_v53 = vmax.f32 %v2762_v43, %v2766_v54  ;;  %v2774_v28 = vld [vmem:[#allocation3 + $0x10] sm:$0xf] }
 0x35b   : > { %v2776_v0 = vld [vmem:[#allocation3 + $0x20] sm:$0xf] }
 0x35d   : > { %v2761_v30 = vld [vmem:[#allocation3 + $0x8] sm:$0xf] }
 0x35e   : > { %v2773_v63 = vld [vmem:[#allocation3 + $0x8] sm:$0xf]  ;;  %v2769_v23 = vmax.f32 %v2761_v30, %v2765_v60  ;;  %v2763_v34 = vld [vmem:[#allocation3 + $0x18] sm:$0xf] }
 0x35f   : > { %v2777_v45 = vmax.f32 %v2768_v58, %v2773_v63  ;;  %v2775_v49 = vld [vmem:[#allocation3 + $0x18] sm:$0xf]  ;;  %v2771_v25 = vmax.f32 %v2763_v34, %v2767_v33 }
 0x360   : > { %v2778_v5 = vmax.f32 %v2769_v23, %v2774_v28  ;;  %v2779_v27 = vmax.f32 %v2770_v53, %v2775_v49 }
 0x361   : > { %2781 = vst.msk [vmem:[%s163_s8] sm:$0xf] %vm2749_vm3, %v2777_v45  ;;  %v2780_v18 = vmax.f32 %v2771_v25, %v2776_v0 }
 0x362   : > { %2782 = vst.msk [vmem:[%s163_s8 + $0x4] sm:$0xf] %vm2749_vm3, %v2778_v5  ;;  %2783 = vst.msk [vmem:[%s163_s8 + $0x8] sm:$0xf] %vm2749_vm3, %v2779_v27 }
 0x363   : > { %2784 = vst.msk [vmem:[%s163_s8 + $0xc] sm:$0xf] %vm2749_vm3, %v2780_v18 }
 0x364   : > { %4341 = shalt.err (!%p4338_p3)
}
 0x365   : > { %s4342_s26 = scalar_lea.hbm %s6641_s11, 256  ;;  %s4346_s4 = scalar_lea.hbm %s6691_s3, 512 }
 0x366   : > { %p4343_p4 = scmp.ne.s32.totalorder %s6641_s11, %s4342_s26  ;;  %p4347_p9 = scmp.lt.s32.totalorder %s6641_s11, %s6691_s3 }
 0x367   : > { %p4348_p10 = scmp.lt.s32.totalorder %s4346_s4, %s4342_s26 }
 0x368   : > { %p4344_p7 = pnand %p4343_p4, %p4468_p5 }
 0x369   : > { %p4349_p11 = por %p4348_p10, %p4347_p9 }
 0x36a   : > { %p4345_p8 = pneg %p4344_p7 }
 0x36c   : > { %p4350_p12 = pnand %p4349_p11, %p4345_p8 }
 0x36e   : > { %4353 = shalt.err (!%p4350_p12)
}
 0x36f   : > { %3295 = dma.vmem_to_hbm [thread:$0]  (%p4468_p5), %s6643_s9, 256, %s6641_s11, %s2786_s17, %s4406_s27, %s4406_s27, %s4391_s30  }
 0x370 PF: > { %p3301_p13 = scmp.ge.s32.totalorder %s4388_s15, 2  ;;  %s2814_s7 = sand.u32 1, %s4376_s12  }
 0x371   : > { %s2815_s8 = scalar_lea.sflag [#allocation5], %s2814_s7 }
 0x372   : > { %p3298_p0 = pnand %p3301_p13, %p4472_p6 }
 0x374   : > { %p3299_p1 = pneg %p3298_p0 }
 0x376   : > { %4371 = dma.done.wait (%p3299_p1), %s2815_s8, 256  }
 0x377   : > { %4373 = vsyncadd (%p3299_p1), %s2815_s8, 4294967040  ;;  %p13_p2 = scmp.ge.s32.totalorder %s4455_s18, 4   ;;  %s7045_s12 = smov %s4380_s13 }
 0x378   : > { %s7046_s13 = smov %s4384_s14  ;;  %s7047_s14 = smov %s4466_s21 }
 0x379   : > { %s7048_s15 = smov %s4455_s18  ;;  %15 = sbr.rel (!%p13_p2) target bundleno = 3 (0x3), region = 105 }
 0x37e   :  { %2820 = vsyncpa [#allocation5], 1 }
 0x37f   :  { %2822 = vsyncpa [#allocation5 + $0x1], 1 }

</bundles_post_ra>
